<compile_context>
chip_gen: v5e
topology: v5e:2x2
jax: 0.10.0
libtpu: 0.0.40
codegen_flags: <defaults>
</compile_context>

<pallas_src>
import functools

import jax
import jax.numpy as jnp
from jax.experimental import pallas as pl
from jax.experimental.pallas import tpu as pltpu

_VMEM_LIMIT = 32 * 1024 * 1024  # safe scoped limit on v5e / v6e / v7x


# ----------------------------------------------------------------------------
# Helpers
# ----------------------------------------------------------------------------
def _round_up(x, m):
    return ((x + m - 1) // m) * m


def _tile(dim, pref, align):
    """(padded_dim, tile) with tile dividing padded_dim."""
    if dim <= pref:
        p = _round_up(dim, align)
        return p, p
    return _round_up(dim, pref), pref


def _pad_to(x, shape):
    if tuple(x.shape) == tuple(shape):
        return x
    return jnp.pad(x, [(0, t - s) for s, t in zip(x.shape, shape)])


# ----------------------------------------------------------------------------
# Tiled matmul (Linear / conv-im2col / dense head) with fused bias/ReLU/residual
# ----------------------------------------------------------------------------
def _matmul_kernel(a_ref, b_ref, bias_ref, *refs, nk, relu_a, has_res):
    if has_res:
        res_ref = refs[0]
        refs = refs[1:]
    o_ref = refs[0]

    a = a_ref[...]
    if relu_a:
        a = jnp.maximum(a, 0.0)
    part = jnp.dot(a, b_ref[...], preferred_element_type=jnp.float32)

    if nk == 1:
        r = part + bias_ref[...]
        if has_res:
            r = r + res_ref[...].astype(jnp.float32)
        o_ref[...] = r.astype(o_ref.dtype)
    else:
        acc_ref = refs[1]
        k = pl.program_id(2)

        @pl.when(k == 0)
        def _():
            acc_ref[...] = jnp.zeros_like(acc_ref)

        acc_ref[...] += part

        @pl.when(k == nk - 1)
        def _():
            r = acc_ref[...] + bias_ref[...]
            if has_res:
                r = r + res_ref[...].astype(jnp.float32)
            o_ref[...] = r.astype(o_ref.dtype)


def pallas_linear(a, w, bias, *, relu_a=False, res=None, out_dtype=jnp.bfloat16):
    """out = [relu](a) @ w + bias [+ res].  a:(M,K), w:(K,N), bias:(N,)."""
    M, K = a.shape
    K2, N = w.shape
    assert K == K2
    Mp, tm = _tile(M, 256, 8)
    if K <= 1024:
        Kp, tk, nk = K, K, 1
    else:
        Kp = _round_up(K, 128)
        tk = 512 if Kp % 512 == 0 else (256 if Kp % 256 == 0 else 128)
        nk = Kp // tk
    if N <= 512:
        Np, tn = N, N
    else:
        Np = _round_up(N, 128)
        tn = 512 if Np % 512 == 0 else (256 if Np % 256 == 0 else 128)

    a_p = _pad_to(a.astype(jnp.bfloat16), (Mp, Kp))
    w_p = _pad_to(w.astype(jnp.bfloat16), (Kp, Np))
    bias_p = _pad_to(bias.reshape(1, N).astype(jnp.float32), (1, Np))

    has_res = res is not None
    in_specs = [
        pl.BlockSpec((tm, tk), lambda i, j, k: (i, k)),
        pl.BlockSpec((tk, tn), lambda i, j, k: (k, j)),
        pl.BlockSpec((1, tn), lambda i, j, k: (0, j)),
    ]
    inputs = [a_p, w_p, bias_p]
    if has_res:
        in_specs.append(pl.BlockSpec((tm, tn), lambda i, j, k: (i, j)))
        inputs.append(_pad_to(res.astype(jnp.bfloat16), (Mp, Np)))

    out = pl.pallas_call(
        functools.partial(_matmul_kernel, nk=nk, relu_a=relu_a, has_res=has_res),
        out_shape=jax.ShapeDtypeStruct((Mp, Np), out_dtype),
        grid=(Mp // tm, Np // tn, nk),
        in_specs=in_specs,
        out_specs=pl.BlockSpec((tm, tn), lambda i, j, k: (i, j)),
        scratch_shapes=([pltpu.VMEM((tm, tn), jnp.float32)] if nk > 1 else []),
        compiler_params=pltpu.CompilerParams(
            dimension_semantics=("parallel", "parallel", "arbitrary"),
            vmem_limit_bytes=_VMEM_LIMIT),
    )(*inputs)
    if (Mp, Np) != (M, N):
        out = out[:M, :N]
    return out


# ----------------------------------------------------------------------------
# Fused LayerNorm(+ReLU)+Linear (RNN-stage prologue); normalized A tile cached
# ----------------------------------------------------------------------------
def _ln_matmul_kernel(a_ref, g_ref, bt_ref, w_ref, bias_ref, o_ref, an_ref, *,
                      k_true, eps, relu):
    @pl.when(pl.program_id(1) == 0)
    def _():
        a = a_ref[...].astype(jnp.float32)
        s1 = jnp.sum(a, axis=-1, keepdims=True)       # zero-padded cols add 0
        s2 = jnp.sum(a * a, axis=-1, keepdims=True)
        mean = s1 * (1.0 / k_true)
        var = jnp.maximum(s2 * (1.0 / k_true) - mean * mean, 0.0)
        inv = jax.lax.rsqrt(var + eps)
        an = (a - mean) * inv * g_ref[...] + bt_ref[...]
        if relu:
            an = jnp.maximum(an, 0.0)
        an_ref[...] = an.astype(jnp.bfloat16)

    o_ref[...] = (jnp.dot(an_ref[...], w_ref[...],
                          preferred_element_type=jnp.float32)
                  + bias_ref[...]).astype(o_ref.dtype)


def pallas_ln_linear(a, gamma, beta, w, bias, *, k_true, relu=True, eps=1e-5,
                     out_dtype=jnp.bfloat16):
    """out = [relu](LayerNorm(a)) @ w + bias; LN over a's (zero-padded) last dim."""
    M, K = a.shape
    K2, N = w.shape
    assert K == K2
    Mp, tm = _tile(M, 256, 8)
    if N <= 512:
        Np, tn = N, N
    else:
        Np = _round_up(N, 128)
        tn = 512 if Np % 512 == 0 else (256 if Np % 256 == 0 else 128)

    a_p = _pad_to(a.astype(jnp.bfloat16), (Mp, K))
    w_p = _pad_to(w.astype(jnp.bfloat16), (K, Np))
    g_p = gamma.reshape(1, K).astype(jnp.float32)
    bt_p = beta.reshape(1, K).astype(jnp.float32)
    bias_p = _pad_to(bias.reshape(1, N).astype(jnp.float32), (1, Np))

    out = pl.pallas_call(
        functools.partial(_ln_matmul_kernel, k_true=float(k_true), eps=eps,
                          relu=relu),
        out_shape=jax.ShapeDtypeStruct((Mp, Np), out_dtype),
        grid=(Mp // tm, Np // tn),
        in_specs=[
            pl.BlockSpec((tm, K), lambda i, j: (i, 0)),
            pl.BlockSpec((1, K), lambda i, j: (0, 0)),
            pl.BlockSpec((1, K), lambda i, j: (0, 0)),
            pl.BlockSpec((K, tn), lambda i, j: (0, j)),
            pl.BlockSpec((1, tn), lambda i, j: (0, j)),
        ],
        out_specs=pl.BlockSpec((tm, tn), lambda i, j: (i, j)),
        scratch_shapes=[pltpu.VMEM((tm, K), jnp.bfloat16)],
        compiler_params=pltpu.CompilerParams(
            dimension_semantics=("parallel", "arbitrary"),
            vmem_limit_bytes=_VMEM_LIMIT),
    )(a_p, g_p, bt_p, w_p, bias_p)
    if (Mp, Np) != (M, N):
        out = out[:M, :N]
    return out


# ----------------------------------------------------------------------------
# Conv-stage LayerNorm over F, lane-dense (rows, F*C) blocks
# ----------------------------------------------------------------------------
def _ln_feat_kernel(x_ref, g_ref, b_ref, o_ref, *, F, C, eps):
    tr = x_ref.shape[0]
    x = x_ref[...].astype(jnp.float32).reshape(tr, F, C)
    mean = jnp.mean(x, axis=1, keepdims=True)
    var = jnp.mean(jnp.square(x - mean), axis=1, keepdims=True)
    xn = (x - mean) * jax.lax.rsqrt(var + eps) * g_ref[...] + b_ref[...]
    o_ref[...] = xn.reshape(tr, F * C).astype(o_ref.dtype)


def pallas_layernorm_feat(x, gamma, beta, F, C, eps=1e-5):
    """LayerNorm over F of a channels-last tensor viewed as (R, F*C) bf16."""
    R, FC = x.shape
    assert FC == F * C
    Rp, tr = _tile(R, 128, 8)
    x_p = _pad_to(x.astype(jnp.bfloat16), (Rp, FC))
    out = pl.pallas_call(
        functools.partial(_ln_feat_kernel, F=F, C=C, eps=eps),
        out_shape=jax.ShapeDtypeStruct((Rp, FC), jnp.bfloat16),
        grid=(Rp // tr,),
        in_specs=[
            pl.BlockSpec((tr, FC), lambda i: (i, 0)),
            pl.BlockSpec((1, F, 1), lambda i: (0, 0, 0)),
            pl.BlockSpec((1, F, 1), lambda i: (0, 0, 0)),
        ],
        out_specs=pl.BlockSpec((tr, FC), lambda i: (i, 0)),
        compiler_params=pltpu.CompilerParams(
            dimension_semantics=("parallel",),
            vmem_limit_bytes=_VMEM_LIMIT),
    )(x_p, gamma.reshape(1, F, 1).astype(jnp.float32),
      beta.reshape(1, F, 1).astype(jnp.float32))
    if Rp != R:
        out = out[:R]
    return out


# ----------------------------------------------------------------------------
# Bidirectional GRU recurrence: streamed time-chunks, hidden state in scratch
# ----------------------------------------------------------------------------
def _bigru_kernel(x_ref, whh_ref, bhh_ref, o_ref, h_ref, *, chunk, l_true, hp):
    d = pl.program_id(0)                       # 0 = forward, 1 = backward
    c = pl.program_id(2)
    nc = pl.num_programs(2)

    @pl.when(c == 0)
    def _():
        h_ref[...] = jnp.zeros_like(h_ref)

    whh = whh_ref[...]                         # (Hp, 3Hp) bf16, cols [r|z|n]
    bhh = bhh_ref[...]                         # (1, 3Hp) f32
    t0 = (c + d * (nc - 1 - 2 * c)) * chunk    # chunk start in absolute time

    def step(s, h):
        row = jnp.where(d == 0, s, chunk - 1 - s)
        tt = t0 + row
        xg = x_ref[row].astype(jnp.float32)    # (bn, 3Hp): [xr | xz | xn]
        hg = jnp.dot(h.astype(jnp.bfloat16), whh,
                     preferred_element_type=jnp.float32) + bhh
        r = jax.nn.sigmoid(xg[:, :hp] + hg[:, :hp])
        z = jax.nn.sigmoid(xg[:, hp:2 * hp] + hg[:, hp:2 * hp])
        n = jnp.tanh(xg[:, 2 * hp:] + r * hg[:, 2 * hp:])
        h_new = (1.0 - z) * n + z * h
        h_new = jnp.where(tt < l_true, h_new, h)   # mask padded time steps
        o_ref[row] = h_new.astype(o_ref.dtype)
        return h_new

    h_ref[...] = jax.lax.fori_loop(0, chunk, step, h_ref[...])


def bigru(xp, whh, bhh, *, l_true):
    """xp:(L,N,6Hp) bf16, whh:(2,Hp,3Hp) bf16, bhh:(2,1,3Hp) f32 -> (L,N,2Hp) bf16."""
    # TODO(synk): interleave the two directions in one body (shared fori_loop
    # carrying h_fwd/h_bwd) to hide MXU latency on single-TC v5e/v6e.
    L, N, six_hp = xp.shape
    three_hp = six_hp // 2
    hp = whh.shape[1]

    if N <= 512:
        bn, Nb = N, N
    else:
        bn = 128
        Nb = _round_up(N, bn)
    cap = max(1, min(L, 1024 // bn))           # keep chunks a few MiB of VMEM
    chunk = cap
    for c in range(cap, max(1, cap // 2) - 1, -1):
        if L % c == 0:
            chunk = c
            break
    Lp = _round_up(L, chunk)
    nc = Lp // chunk
    nb = Nb // bn
    xp_p = _pad_to(xp, (Lp, Nb, six_hp))

    out = pl.pallas_call(
        functools.partial(_bigru_kernel, chunk=chunk, l_true=L, hp=hp),
        out_shape=jax.ShapeDtypeStruct((Lp, Nb, 2 * hp), jnp.bfloat16),
        grid=(2, nb, nc),
        in_specs=[
            pl.BlockSpec((chunk, bn, three_hp),
                         lambda d, n, c: (c + d * (nc - 1 - 2 * c), n, d)),
            pl.BlockSpec((None, hp, three_hp), lambda d, n, c: (d, 0, 0)),
            pl.BlockSpec((None, 1, three_hp), lambda d, n, c: (d, 0, 0)),
        ],
        out_specs=pl.BlockSpec((chunk, bn, hp),
                               lambda d, n, c: (c + d * (nc - 1 - 2 * c), n, d)),
        scratch_shapes=[pltpu.VMEM((bn, hp), jnp.float32)],
        compiler_params=pltpu.CompilerParams(
            dimension_semantics=("parallel", "parallel", "arbitrary"),
            vmem_limit_bytes=_VMEM_LIMIT),
    )(xp_p, whh, bhh)
    if (Lp, Nb) != (L, N):
        out = out[:L, :N]
    return out


# ----------------------------------------------------------------------------
# Glue: channels-last conv stage, RNN stage, full forward
# ----------------------------------------------------------------------------
def _im2col_nhwc(x, k, stride, pad):
    """(B,H,W,C) bf16 -> (B,Ho,Wo,k*k*C) patches, taps ordered (kh, kw, c)."""
    # TODO(synk): replace im2col with an in-kernel 9-tap accumulating conv to
    # drop the 9x patch tensor from HBM.
    B, H, W, C = x.shape
    xp = jnp.pad(x, ((0, 0), (pad, pad), (pad, pad), (0, 0)))
    Ho = (H + 2 * pad - k) // stride + 1
    Wo = (W + 2 * pad - k) // stride + 1
    cols = [xp[:, kh:kh + stride * Ho:stride, kw:kw + stride * Wo:stride, :]
            for kh in range(k) for kw in range(k)]
    return jnp.concatenate(cols, axis=-1), Ho, Wo


def rnn_layer(x, p, batch_first, k_true):
    """LayerNorm -> ReLU -> bidirectional GRU -> Dropout(id).

    Keeps the PyTorch quirk: batch_first=False layers still receive (B, T, D),
    so their recurrence runs over axis 0 (the batch axis).
    """
    xs = jnp.transpose(x, (1, 0, 2)) if batch_first else x      # (L, N, Dp)
    L, N, Dp = xs.shape
    xp6 = pallas_ln_linear(xs.reshape(L * N, Dp), p["ln_g"], p["ln_b"],
                           p["w_ih6"], p["b_ih6"], k_true=k_true, relu=True)
    out = bigru(xp6.reshape(L, N, -1), p["whh"], p["bhh"], l_true=L)
    return jnp.transpose(out, (1, 0, 2)) if batch_first else out


def forward(params, x, rnn_dim):
    """x: (B, 1, n_feats, T) f32 (PyTorch NCHW). Returns (B, T', n_class) f32."""
    B = x.shape[0]
    # Conv stage in channels-last (B, T, F, C), bf16 activations throughout.
    x = jnp.transpose(x, (0, 3, 2, 1)).astype(jnp.bfloat16)      # (B, T, F, 1)
    patches, T2, F2 = _im2col_nhwc(x, 3, 2, 1)
    y = pallas_linear(patches.reshape(B * T2 * F2, patches.shape[-1]),
                      params["cnn_wm"], params["cnn_b"])          # (M, 32) bf16
    for p in params["res_cnn"]:
        xn_flat = pallas_layernorm_feat(y.reshape(B * T2, F2 * 32),
                                        p["ln_g"], p["ln_b"], F2, 32)
        xn = xn_flat.reshape(B, T2, F2, 32)
        pat, _, _ = _im2col_nhwc(xn, 3, 1, 1)
        # conv(relu(xn)) + xn: ReLU fused on A, residual fused in the epilogue.
        y = pallas_linear(pat.reshape(B * T2 * F2, pat.shape[-1]),
                          p["w_mat"], p["b"], relu_a=True,
                          res=xn_flat.reshape(B * T2 * F2, 32))
    x = pallas_linear(y.reshape(B * T2, F2 * 32), params["fc_wm"],
                      params["fc_b"])                             # (M, Hp) bf16
    x = x.reshape(B, T2, -1)
    for i, p in enumerate(params["rnn"]):
        x = rnn_layer(x, p, batch_first=(i == 0),
                      k_true=(rnn_dim if i == 0 else 2 * rnn_dim))
    Bo, To, Dp = x.shape
    h = pallas_linear(x.reshape(Bo * To, Dp), params["d1_wm"], params["d1_b"])
    out = pallas_linear(h, params["d2_wm"], params["d2_b"], relu_a=True,
                        out_dtype=jnp.float32)
    return out.reshape(Bo, To, -1)


# ----------------------------------------------------------------------------
# Parameters: PyTorch-style init + one-time conversion to kernel layouts
# ----------------------------------------------------------------------------
def _uni(key, shape, fan):
    bound = 1.0 / jnp.sqrt(float(fan))
    return jax.random.uniform(key, shape, jnp.float32, -bound, bound)


def init_params(key, n_cnn_layers, n_rnn_layers, rnn_dim, n_class, n_feats):
    nf = n_feats // 2
    keys = iter(jax.random.split(key, 256))
    p = {}
    p["cnn_w"] = _uni(next(keys), (32, 1, 3, 3), 1 * 9)
    p["cnn_b"] = _uni(next(keys), (32,), 1 * 9)
    p["res_cnn"] = []
    for _ in range(n_cnn_layers):
        p["res_cnn"].append({
            "ln_g": 1.0 + 0.1 * jax.random.normal(next(keys), (nf,), jnp.float32),
            "ln_b": 0.1 * jax.random.normal(next(keys), (nf,), jnp.float32),
            "w": _uni(next(keys), (32, 32, 3, 3), 32 * 9),
            "b": _uni(next(keys), (32,), 32 * 9),
        })
    p["fc_w"] = _uni(next(keys), (rnn_dim, nf * 32), nf * 32)
    p["fc_b"] = _uni(next(keys), (rnn_dim,), nf * 32)
    p["rnn"] = []
    H = rnn_dim
    for i in range(n_rnn_layers):
        D = rnn_dim if i == 0 else 2 * rnn_dim
        layer = {
            "ln_g": 1.0 + 0.1 * jax.random.normal(next(keys), (D,), jnp.float32),
            "ln_b": 0.1 * jax.random.normal(next(keys), (D,), jnp.float32),
        }
        for d in ("f", "b"):
            layer[f"w_ih_{d}"] = _uni(next(keys), (3 * H, D), H)
            layer[f"w_hh_{d}"] = _uni(next(keys), (3 * H, H), H)
            layer[f"b_ih_{d}"] = _uni(next(keys), (3 * H,), H)
            layer[f"b_hh_{d}"] = _uni(next(keys), (3 * H,), H)
        p["rnn"].append(layer)
    p["d1_w"] = _uni(next(keys), (rnn_dim, 2 * rnn_dim), 2 * rnn_dim)
    p["d1_b"] = _uni(next(keys), (rnn_dim,), 2 * rnn_dim)
    p["d2_w"] = _uni(next(keys), (n_class, rnn_dim), rnn_dim)
    p["d2_b"] = _uni(next(keys), (n_class,), rnn_dim)
    return p


def _conv_w_to_mat(w):
    """PyTorch (Cout,Cin,kF,kT) -> (9*Cin, Cout) bf16, rows ordered (kt,kf,c)."""
    cin, cout = w.shape[1], w.shape[0]
    return jnp.transpose(w, (3, 2, 1, 0)).reshape(9 * cin, cout).astype(jnp.bfloat16)


def _place_feat(v, H, Hp, groups):
    """(groups*H,) -> (groups*Hp,), each group's values at the start of its slot."""
    return jnp.concatenate(
        [jnp.pad(v[g * H:(g + 1) * H], (0, Hp - H)) for g in range(groups)], 0)


def _place_rows(w, H, Hp, groups):
    """(groups*H, X) -> (groups*Hp, X) with zero rows in the padded region."""
    return jnp.concatenate(
        [jnp.pad(w[g * H:(g + 1) * H], ((0, Hp - H), (0, 0))) for g in range(groups)], 0)


def _pad_gate_cols(w, H, Hp):
    """(rows, 3H) -> (rows, 3Hp): each gate block zero-padded to Hp columns."""
    return jnp.concatenate(
        [jnp.pad(w[:, g * H:(g + 1) * H], ((0, 0), (0, Hp - H))) for g in range(3)], 1)


def prepare_params(p, rnn_dim, n_feats):
    """One-time conversion to kernel layouts: bf16 weights, lane-aligned Hp."""
    nf = n_feats // 2
    H = rnn_dim
    Hp = _round_up(H, 128)
    q = {"cnn_wm": _conv_w_to_mat(p["cnn_w"]), "cnn_b": p["cnn_b"],
         "res_cnn": [], "rnn": []}
    for r in p["res_cnn"]:
        q["res_cnn"].append({"ln_g": r["ln_g"], "ln_b": r["ln_b"],
                             "w_mat": _conv_w_to_mat(r["w"]), "b": r["b"]})
    # fc: PyTorch flattening is (c, f); channels-last activations give (f, c).
    fcw = jnp.transpose(p["fc_w"].reshape(rnn_dim, 32, nf), (2, 1, 0))
    fcw = fcw.reshape(nf * 32, rnn_dim)
    q["fc_wm"] = _pad_to(fcw, (nf * 32, Hp)).astype(jnp.bfloat16)
    q["fc_b"] = _pad_to(p["fc_b"], (Hp,))
    for i, r in enumerate(p["rnn"]):
        groups = 1 if i == 0 else 2
        w6, b6, whh, bhh = [], [], [], []
        for d in ("f", "b"):
            wih = _place_rows(r[f"w_ih_{d}"].T, H, Hp, groups)       # (Dp, 3H)
            w6.append(_pad_gate_cols(wih, H, Hp))                    # (Dp, 3Hp)
            b6.append(_pad_gate_cols(r[f"b_ih_{d}"].reshape(1, -1), H, Hp)[0])
            whh_t = jnp.pad(r[f"w_hh_{d}"].T, ((0, Hp - H), (0, 0)))  # (Hp, 3H)
            whh.append(_pad_gate_cols(whh_t, H, Hp))                 # (Hp, 3Hp)
            bhh.append(_pad_gate_cols(r[f"b_hh_{d}"].reshape(1, -1), H, Hp))
        q["rnn"].append({
            "ln_g": _place_feat(r["ln_g"], H, Hp, groups),
            "ln_b": _place_feat(r["ln_b"], H, Hp, groups),
            "w_ih6": jnp.concatenate(w6, axis=1).astype(jnp.bfloat16),   # (Dp, 6Hp)
            "b_ih6": jnp.concatenate(b6, axis=0),                        # (6Hp,)
            "whh": jnp.stack(whh, 0).astype(jnp.bfloat16),               # (2, Hp, 3Hp)
            "bhh": jnp.stack(bhh, 0).astype(jnp.float32),                # (2, 1, 3Hp)
        })
    d1 = _place_rows(p["d1_w"].T, H, Hp, 2)                              # (2Hp, H)
    q["d1_wm"] = _pad_to(d1, (2 * Hp, Hp)).astype(jnp.bfloat16)
    q["d1_b"] = _pad_to(p["d1_b"], (Hp,))
    q["d2_wm"] = _pad_to(p["d2_w"].T, (Hp, p["d2_w"].shape[0])).astype(jnp.bfloat16)
    q["d2_b"] = p["d2_b"]
    return q


if __name__ == "__main__":
    key = jax.random.PRNGKey(0)
    B, n_feats, T = 2, 16, 16
    n_cnn_layers, n_rnn_layers, rnn_dim, n_class = 2, 2, 32, 10

    pk, xk = jax.random.split(key)
    raw = init_params(pk, n_cnn_layers, n_rnn_layers, rnn_dim, n_class, n_feats)
    params = prepare_params(raw, rnn_dim, n_feats)
    x = jax.random.normal(xk, (B, 1, n_feats, T), dtype=jnp.float32)

    fwd = jax.jit(functools.partial(forward, rnn_dim=rnn_dim))
    out = jax.block_until_ready(fwd(params, x))

    assert out.shape == (B, T // 2, n_class), out.shape
    assert bool(jnp.all(jnp.isfinite(out)))
    print("KERNEL_OK")
</pallas_src>

<mosaic_0001>
module attributes {stable_mosaic.version = 11 : i64} {
  func.func @_matmul_kernel(%arg0: i32, %arg1: i32, %arg2: i32, %arg3: memref<128x9xbf16, #tpu.memory_space<vmem>>, %arg4: memref<9x32xbf16, #tpu.memory_space<vmem>>, %arg5: memref<1x32xf32, #tpu.memory_space<vmem>>, %arg6: memref<128x32xbf16, #tpu.memory_space<vmem>>) attributes {dimension_semantics = [#tpu.dimension_semantics<parallel>, #tpu.dimension_semantics<parallel>, #tpu.dimension_semantics<arbitrary>], iteration_bounds = array<i64: 1, 1, 1>, scalar_prefetch = 0 : i64, scratch_operands = 0 : i64, tpu.core_type = #tpu.core_type<tc>, window_params = [{transform_indices = @transform_0, window_bounds = array<i64: 128, 9>}, {transform_indices = @transform_1, window_bounds = array<i64: 9, 32>}, {transform_indices = @transform_2, window_bounds = array<i64: 1, 32>}, {transform_indices = @transform_3, window_bounds = array<i64: 128, 32>}]} {
    %c0 = arith.constant 0 : index
    %c0_0 = arith.constant 0 : index
    %0 = vector.load %arg3[%c0, %c0_0] : memref<128x9xbf16, #tpu.memory_space<vmem>>, vector<128x9xbf16>
    %c0_1 = arith.constant 0 : index
    %c0_2 = arith.constant 0 : index
    %1 = vector.load %arg4[%c0_1, %c0_2] : memref<9x32xbf16, #tpu.memory_space<vmem>>, vector<9x32xbf16>
    %cst = arith.constant dense<0.000000e+00> : vector<128x32xf32>
    %2 = tpu.matmul %0, %1, %cst {dimension_numbers = #tpu.dot_dimension_numbers<[1], [0], [0], [1], [0, 0, 1, 1], [], []>} : vector<128x9xbf16>, vector<9x32xbf16>, vector<128x32xf32> -> vector<128x32xf32>
    %c0_3 = arith.constant 0 : index
    %c0_4 = arith.constant 0 : index
    %3 = vector.load %arg5[%c0_3, %c0_4] : memref<1x32xf32, #tpu.memory_space<vmem>>, vector<1x32xf32>
    %4 = vector.broadcast %3 : vector<1x32xf32> to vector<128x32xf32>
    %5 = arith.addf %2, %4 : vector<128x32xf32>
    %6 = arith.truncf %5 : vector<128x32xf32> to vector<128x32xbf16>
    %c0_5 = arith.constant 0 : index
    %c0_6 = arith.constant 0 : index
    %7 = vector.load %arg6[%c0_5, %c0_6] : memref<128x32xbf16, #tpu.memory_space<vmem>>, vector<128x32xbf16>
    tpu.vector_store %arg6[%c0_5, %c0_6], %6 {strides = array<i32>} : memref<128x32xbf16, #tpu.memory_space<vmem>>, vector<128x32xbf16>,
    return
  }
  func.func @transform_0(%arg0: i32, %arg1: i32, %arg2: i32) -> (i32, i32) {
    %c0_i32 = arith.constant 0 : i32
    return %arg0, %arg2 : i32, i32
  }
  func.func @transform_1(%arg0: i32, %arg1: i32, %arg2: i32) -> (i32, i32) {
    %c0_i32 = arith.constant 0 : i32
    return %arg2, %arg1 : i32, i32
  }
  func.func @transform_2(%arg0: i32, %arg1: i32, %arg2: i32) -> (i32, i32) {
    %c0_i32 = arith.constant 0 : i32
    %c0_i32_0 = arith.constant 0 : i32
    return %c0_i32, %arg1 : i32, i32
  }
  func.func @transform_3(%arg0: i32, %arg1: i32, %arg2: i32) -> (i32, i32) {
    %c0_i32 = arith.constant 0 : i32
    return %arg0, %arg1 : i32, i32
  }
}

module attributes {stable_mosaic.version = 11 : i64} {
  func.func @_ln_feat_kernel(%arg0: i32, %arg1: memref<16x256xbf16, #tpu.memory_space<vmem>>, %arg2: memref<1x8x1xf32, #tpu.memory_space<vmem>>, %arg3: memref<1x8x1xf32, #tpu.memory_space<vmem>>, %arg4: memref<16x256xbf16, #tpu.memory_space<vmem>>) attributes {dimension_semantics = [#tpu.dimension_semantics<parallel>], iteration_bounds = array<i64: 1>, scalar_prefetch = 0 : i64, scratch_operands = 0 : i64, tpu.core_type = #tpu.core_type<tc>, window_params = [{transform_indices = @transform_0, window_bounds = array<i64: 16, 256>}, {pipeline_mode = #tpu.pipeline_mode<synchronous>, transform_indices = @transform_1, window_bounds = array<i64: 1, 8, 1>}, {pipeline_mode = #tpu.pipeline_mode<synchronous>, transform_indices = @transform_2, window_bounds = array<i64: 1, 8, 1>}, {transform_indices = @transform_3, window_bounds = array<i64: 16, 256>}]} {
    %c0 = arith.constant 0 : index
    %c0_0 = arith.constant 0 : index
    %0 = vector.load %arg1[%c0, %c0_0] : memref<16x256xbf16, #tpu.memory_space<vmem>>, vector<16x256xbf16>
    %1 = arith.extf %0 : vector<16x256xbf16> to vector<16x256xf32>
    %2 = vector.shape_cast %1 : vector<16x256xf32> to vector<16x8x32xf32>
    %cst = arith.constant dense<0.000000e+00> : vector<16x32xf32>
    %3 = vector.multi_reduction <add>, %2, %cst [1] : vector<16x8x32xf32> to vector<16x32xf32>
    %4 = vector.shape_cast %3 : vector<16x32xf32> to vector<16x1x32xf32>
    %cst_1 = arith.constant 8.000000e+00 : f32
    %5 = vector.broadcast %cst_1 : f32 to vector<16x1x32xf32>
    %6 = arith.divf %4, %5 : vector<16x1x32xf32>
    %7 = vector.broadcast %6 : vector<16x1x32xf32> to vector<16x8x32xf32>
    %8 = arith.subf %2, %7 : vector<16x8x32xf32>
    %9 = arith.mulf %8, %8 : vector<16x8x32xf32>
    %cst_2 = arith.constant dense<0.000000e+00> : vector<16x32xf32>
    %10 = vector.multi_reduction <add>, %9, %cst_2 [1] : vector<16x8x32xf32> to vector<16x32xf32>
    %11 = vector.shape_cast %10 : vector<16x32xf32> to vector<16x1x32xf32>
    %cst_3 = arith.constant 8.000000e+00 : f32
    %12 = vector.broadcast %cst_3 : f32 to vector<16x1x32xf32>
    %13 = arith.divf %11, %12 : vector<16x1x32xf32>
    %14 = vector.broadcast %6 : vector<16x1x32xf32> to vector<16x8x32xf32>
    %15 = arith.subf %2, %14 : vector<16x8x32xf32>
    %cst_4 = arith.constant 9.99999974E-6 : f32
    %16 = vector.broadcast %cst_4 : f32 to vector<16x1x32xf32>
    %17 = arith.addf %13, %16 : vector<16x1x32xf32>
    %18 = math.rsqrt %17 : vector<16x1x32xf32>
    %19 = vector.broadcast %18 : vector<16x1x32xf32> to vector<16x8x32xf32>
    %20 = arith.mulf %15, %19 : vector<16x8x32xf32>
    %c0_5 = arith.constant 0 : index
    %c0_6 = arith.constant 0 : index
    %c0_7 = arith.constant 0 : index
    %21 = vector.load %arg2[%c0_5, %c0_6, %c0_7] : memref<1x8x1xf32, #tpu.memory_space<vmem>>, vector<1x8x1xf32>
    %22 = vector.broadcast %21 : vector<1x8x1xf32> to vector<16x8x32xf32>
    %23 = arith.mulf %20, %22 : vector<16x8x32xf32>
    %c0_8 = arith.constant 0 : index
    %c0_9 = arith.constant 0 : index
    %c0_10 = arith.constant 0 : index
    %24 = vector.load %arg3[%c0_8, %c0_9, %c0_10] : memref<1x8x1xf32, #tpu.memory_space<vmem>>, vector<1x8x1xf32>
    %25 = vector.broadcast %24 : vector<1x8x1xf32> to vector<16x8x32xf32>
    %26 = arith.addf %23, %25 : vector<16x8x32xf32>
    %27 = vector.shape_cast %26 : vector<16x8x32xf32> to vector<16x256xf32>
    %28 = arith.truncf %27 : vector<16x256xf32> to vector<16x256xbf16>
    %c0_11 = arith.constant 0 : index
    %c0_12 = arith.constant 0 : index
    %29 = vector.load %arg4[%c0_11, %c0_12] : memref<16x256xbf16, #tpu.memory_space<vmem>>, vector<16x256xbf16>
    tpu.vector_store %arg4[%c0_11, %c0_12], %28 {strides = array<i32>} : memref<16x256xbf16, #tpu.memory_space<vmem>>, vector<16x256xbf16>,
    return
  }
  func.func @transform_0(%arg0: i32) -> (i32, i32) {
    %c0_i32 = arith.constant 0 : i32
    %c0_i32_0 = arith.constant 0 : i32
    return %arg0, %c0_i32 : i32, i32
  }
  func.func @transform_1(%arg0: i32) -> (i32, i32, i32) {
    %c0_i32 = arith.constant 0 : i32
    %c0_i32_0 = arith.constant 0 : i32
    %c0_i32_1 = arith.constant 0 : i32
    %c0_i32_2 = arith.constant 0 : i32
    return %c0_i32, %c0_i32_0, %c0_i32_1 : i32, i32, i32
  }
  func.func @transform_2(%arg0: i32) -> (i32, i32, i32) {
    %c0_i32 = arith.constant 0 : i32
    %c0_i32_0 = arith.constant 0 : i32
    %c0_i32_1 = arith.constant 0 : i32
    %c0_i32_2 = arith.constant 0 : i32
    return %c0_i32, %c0_i32_0, %c0_i32_1 : i32, i32, i32
  }
  func.func @transform_3(%arg0: i32) -> (i32, i32) {
    %c0_i32 = arith.constant 0 : i32
    %c0_i32_0 = arith.constant 0 : i32
    return %arg0, %c0_i32 : i32, i32
  }
}

module attributes {stable_mosaic.version = 11 : i64} {
  func.func @_matmul_kernel(%arg0: i32, %arg1: i32, %arg2: i32, %arg3: memref<128x288xbf16, #tpu.memory_space<vmem>>, %arg4: memref<288x32xbf16, #tpu.memory_space<vmem>>, %arg5: memref<1x32xf32, #tpu.memory_space<vmem>>, %arg6: memref<128x32xbf16, #tpu.memory_space<vmem>>, %arg7: memref<128x32xbf16, #tpu.memory_space<vmem>>) attributes {dimension_semantics = [#tpu.dimension_semantics<parallel>, #tpu.dimension_semantics<parallel>, #tpu.dimension_semantics<arbitrary>], iteration_bounds = array<i64: 1, 1, 1>, scalar_prefetch = 0 : i64, scratch_operands = 0 : i64, tpu.core_type = #tpu.core_type<tc>, window_params = [{transform_indices = @transform_0, window_bounds = array<i64: 128, 288>}, {transform_indices = @transform_1, window_bounds = array<i64: 288, 32>}, {transform_indices = @transform_2, window_bounds = array<i64: 1, 32>}, {transform_indices = @transform_3, window_bounds = array<i64: 128, 32>}, {transform_indices = @transform_4, window_bounds = array<i64: 128, 32>}]} {
    %c0 = arith.constant 0 : index
    %c0_0 = arith.constant 0 : index
    %0 = vector.load %arg3[%c0, %c0_0] : memref<128x288xbf16, #tpu.memory_space<vmem>>, vector<128x288xbf16>
    %cst = arith.constant 0.000000e+00 : bf16
    %1 = vector.broadcast %cst : bf16 to vector<128x288xbf16>
    %2 = arith.maximumf %0, %1 : vector<128x288xbf16>
    %c0_1 = arith.constant 0 : index
    %c0_2 = arith.constant 0 : index
    %3 = vector.load %arg4[%c0_1, %c0_2] : memref<288x32xbf16, #tpu.memory_space<vmem>>, vector<288x32xbf16>
    %cst_3 = arith.constant dense<0.000000e+00> : vector<128x32xf32>
    %4 = tpu.matmul %2, %3, %cst_3 {dimension_numbers = #tpu.dot_dimension_numbers<[1], [0], [0], [1], [0, 0, 1, 1], [], []>} : vector<128x288xbf16>, vector<288x32xbf16>, vector<128x32xf32> -> vector<128x32xf32>
    %c0_4 = arith.constant 0 : index
    %c0_5 = arith.constant 0 : index
    %5 = vector.load %arg5[%c0_4, %c0_5] : memref<1x32xf32, #tpu.memory_space<vmem>>, vector<1x32xf32>
    %6 = vector.broadcast %5 : vector<1x32xf32> to vector<128x32xf32>
    %7 = arith.addf %4, %6 : vector<128x32xf32>
    %c0_6 = arith.constant 0 : index
    %c0_7 = arith.constant 0 : index
    %8 = vector.load %arg6[%c0_6, %c0_7] : memref<128x32xbf16, #tpu.memory_space<vmem>>, vector<128x32xbf16>
    %9 = arith.extf %8 : vector<128x32xbf16> to vector<128x32xf32>
    %10 = arith.addf %7, %9 : vector<128x32xf32>
    %11 = arith.truncf %10 : vector<128x32xf32> to vector<128x32xbf16>
    %c0_8 = arith.constant 0 : index
    %c0_9 = arith.constant 0 : index
    %12 = vector.load %arg7[%c0_8, %c0_9] : memref<128x32xbf16, #tpu.memory_space<vmem>>, vector<128x32xbf16>
    tpu.vector_store %arg7[%c0_8, %c0_9], %11 {strides = array<i32>} : memref<128x32xbf16, #tpu.memory_space<vmem>>, vector<128x32xbf16>,
    return
  }
  func.func @transform_0(%arg0: i32, %arg1: i32, %arg2: i32) -> (i32, i32) {
    %c0_i32 = arith.constant 0 : i32
    return %arg0, %arg2 : i32, i32
  }
  func.func @transform_1(%arg0: i32, %arg1: i32, %arg2: i32) -> (i32, i32) {
    %c0_i32 = arith.constant 0 : i32
    return %arg2, %arg1 : i32, i32
  }
  func.func @transform_2(%arg0: i32, %arg1: i32, %arg2: i32) -> (i32, i32) {
    %c0_i32 = arith.constant 0 : i32
    %c0_i32_0 = arith.constant 0 : i32
    return %c0_i32, %arg1 : i32, i32
  }
  func.func @transform_3(%arg0: i32, %arg1: i32, %arg2: i32) -> (i32, i32) {
    %c0_i32 = arith.constant 0 : i32
    return %arg0, %arg1 : i32, i32
  }
  func.func @transform_4(%arg0: i32, %arg1: i32, %arg2: i32) -> (i32, i32) {
    %c0_i32 = arith.constant 0 : i32
    return %arg0, %arg1 : i32, i32
  }
}

module attributes {stable_mosaic.version = 11 : i64} {
  func.func @_matmul_kernel(%arg0: i32, %arg1: i32, %arg2: i32, %arg3: memref<16x256xbf16, #tpu.memory_space<vmem>>, %arg4: memref<256x128xbf16, #tpu.memory_space<vmem>>, %arg5: memref<1x128xf32, #tpu.memory_space<vmem>>, %arg6: memref<16x128xbf16, #tpu.memory_space<vmem>>) attributes {dimension_semantics = [#tpu.dimension_semantics<parallel>, #tpu.dimension_semantics<parallel>, #tpu.dimension_semantics<arbitrary>], iteration_bounds = array<i64: 1, 1, 1>, scalar_prefetch = 0 : i64, scratch_operands = 0 : i64, tpu.core_type = #tpu.core_type<tc>, window_params = [{transform_indices = @transform_0, window_bounds = array<i64: 16, 256>}, {transform_indices = @transform_1, window_bounds = array<i64: 256, 128>}, {transform_indices = @transform_2, window_bounds = array<i64: 1, 128>}, {transform_indices = @transform_3, window_bounds = array<i64: 16, 128>}]} {
    %c0 = arith.constant 0 : index
    %c0_0 = arith.constant 0 : index
    %0 = vector.load %arg3[%c0, %c0_0] : memref<16x256xbf16, #tpu.memory_space<vmem>>, vector<16x256xbf16>
    %c0_1 = arith.constant 0 : index
    %c0_2 = arith.constant 0 : index
    %1 = vector.load %arg4[%c0_1, %c0_2] : memref<256x128xbf16, #tpu.memory_space<vmem>>, vector<256x128xbf16>
    %cst = arith.constant dense<0.000000e+00> : vector<16x128xf32>
    %2 = tpu.matmul %0, %1, %cst {dimension_numbers = #tpu.dot_dimension_numbers<[1], [0], [0], [1], [0, 0, 1, 1], [], []>} : vector<16x256xbf16>, vector<256x128xbf16>, vector<16x128xf32> -> vector<16x128xf32>
    %c0_3 = arith.constant 0 : index
    %c0_4 = arith.constant 0 : index
    %3 = vector.load %arg5[%c0_3, %c0_4] : memref<1x128xf32, #tpu.memory_space<vmem>>, vector<1x128xf32>
    %4 = vector.broadcast %3 : vector<1x128xf32> to vector<16x128xf32>
    %5 = arith.addf %2, %4 : vector<16x128xf32>
    %6 = arith.truncf %5 : vector<16x128xf32> to vector<16x128xbf16>
    %c0_5 = arith.constant 0 : index
    %c0_6 = arith.constant 0 : index
    %7 = vector.load %arg6[%c0_5, %c0_6] : memref<16x128xbf16, #tpu.memory_space<vmem>>, vector<16x128xbf16>
    tpu.vector_store %arg6[%c0_5, %c0_6], %6 {strides = array<i32>} : memref<16x128xbf16, #tpu.memory_space<vmem>>, vector<16x128xbf16>,
    return
  }
  func.func @transform_0(%arg0: i32, %arg1: i32, %arg2: i32) -> (i32, i32) {
    %c0_i32 = arith.constant 0 : i32
    return %arg0, %arg2 : i32, i32
  }
  func.func @transform_1(%arg0: i32, %arg1: i32, %arg2: i32) -> (i32, i32) {
    %c0_i32 = arith.constant 0 : i32
    return %arg2, %arg1 : i32, i32
  }
  func.func @transform_2(%arg0: i32, %arg1: i32, %arg2: i32) -> (i32, i32) {
    %c0_i32 = arith.constant 0 : i32
    %c0_i32_0 = arith.constant 0 : i32
    return %c0_i32, %arg1 : i32, i32
  }
  func.func @transform_3(%arg0: i32, %arg1: i32, %arg2: i32) -> (i32, i32) {
    %c0_i32 = arith.constant 0 : i32
    return %arg0, %arg1 : i32, i32
  }
}

module attributes {stable_mosaic.version = 11 : i64} {
  func.func @_ln_matmul_kernel(%arg0: i32, %arg1: i32, %arg2: memref<16x128xbf16, #tpu.memory_space<vmem>>, %arg3: memref<1x128xf32, #tpu.memory_space<vmem>>, %arg4: memref<1x128xf32, #tpu.memory_space<vmem>>, %arg5: memref<128x256xbf16, #tpu.memory_space<vmem>>, %arg6: memref<1x256xf32, #tpu.memory_space<vmem>>, %arg7: memref<16x256xbf16, #tpu.memory_space<vmem>>, %arg8: memref<16x128xbf16, #tpu.memory_space<vmem>>) attributes {dimension_semantics = [#tpu.dimension_semantics<parallel>, #tpu.dimension_semantics<arbitrary>], iteration_bounds = array<i64: 1, 3>, scalar_prefetch = 0 : i64, scratch_operands = 1 : i64, tpu.core_type = #tpu.core_type<tc>, window_params = [{transform_indices = @transform_0, window_bounds = array<i64: 16, 128>}, {pipeline_mode = #tpu.pipeline_mode<synchronous>, transform_indices = @transform_1, window_bounds = array<i64: 1, 128>}, {pipeline_mode = #tpu.pipeline_mode<synchronous>, transform_indices = @transform_2, window_bounds = array<i64: 1, 128>}, {transform_indices = @transform_3, window_bounds = array<i64: 128, 256>}, {transform_indices = @transform_4, window_bounds = array<i64: 1, 256>}, {transform_indices = @transform_5, window_bounds = array<i64: 16, 256>}]} {
    %c0_i32 = arith.constant 0 : i32
    %0 = arith.cmpi eq, %arg1, %c0_i32 : i32
    %1 = arith.extui %0 : i1 to i32
    %c0_i32_0 = arith.constant 0 : i32
    %2 = arith.cmpi ne, %1, %c0_i32_0 : i32
    scf.if %2 {
      %c0_8 = arith.constant 0 : index
      %c0_9 = arith.constant 0 : index
      %11 = vector.load %arg2[%c0_8, %c0_9] : memref<16x128xbf16, #tpu.memory_space<vmem>>, vector<16x128xbf16>
      %12 = arith.extf %11 : vector<16x128xbf16> to vector<16x128xf32>
      %cst_10 = arith.constant dense<0.000000e+00> : vector<16xf32>
      %13 = vector.multi_reduction <add>, %12, %cst_10 [1] : vector<16x128xf32> to vector<16xf32>
      %14 = vector.shape_cast %13 : vector<16xf32> to vector<16x1xf32>
      %15 = arith.mulf %12, %12 : vector<16x128xf32>
      %cst_11 = arith.constant dense<0.000000e+00> : vector<16xf32>
      %16 = vector.multi_reduction <add>, %15, %cst_11 [1] : vector<16x128xf32> to vector<16xf32>
      %17 = vector.shape_cast %16 : vector<16xf32> to vector<16x1xf32>
      %cst_12 = arith.constant 3.125000e-02 : f32
      %18 = vector.broadcast %cst_12 : f32 to vector<16x1xf32>
      %19 = arith.mulf %14, %18 : vector<16x1xf32>
      %cst_13 = arith.constant 3.125000e-02 : f32
      %20 = vector.broadcast %cst_13 : f32 to vector<16x1xf32>
      %21 = arith.mulf %17, %20 : vector<16x1xf32>
      %22 = arith.mulf %19, %19 : vector<16x1xf32>
      %23 = arith.subf %21, %22 : vector<16x1xf32>
      %cst_14 = arith.constant 0.000000e+00 : f32
      %24 = vector.broadcast %cst_14 : f32 to vector<16x1xf32>
      %25 = arith.maximumf %23, %24 : vector<16x1xf32>
      %cst_15 = arith.constant 9.99999974E-6 : f32
      %26 = vector.broadcast %cst_15 : f32 to vector<16x1xf32>
      %27 = arith.addf %25, %26 : vector<16x1xf32>
      %28 = math.rsqrt %27 : vector<16x1xf32>
      %29 = vector.broadcast %19 : vector<16x1xf32> to vector<16x128xf32>
      %30 = arith.subf %12, %29 : vector<16x128xf32>
      %31 = vector.broadcast %28 : vector<16x1xf32> to vector<16x128xf32>
      %32 = arith.mulf %30, %31 : vector<16x128xf32>
      %c0_16 = arith.constant 0 : index
      %c0_17 = arith.constant 0 : index
      %33 = vector.load %arg3[%c0_16, %c0_17] : memref<1x128xf32, #tpu.memory_space<vmem>>, vector<1x128xf32>
      %34 = vector.broadcast %33 : vector<1x128xf32> to vector<16x128xf32>
      %35 = arith.mulf %32, %34 : vector<16x128xf32>
      %c0_18 = arith.constant 0 : index
      %c0_19 = arith.constant 0 : index
      %36 = vector.load %arg4[%c0_18, %c0_19] : memref<1x128xf32, #tpu.memory_space<vmem>>, vector<1x128xf32>
      %37 = vector.broadcast %36 : vector<1x128xf32> to vector<16x128xf32>
      %38 = arith.addf %35, %37 : vector<16x128xf32>
      %cst_20 = arith.constant 0.000000e+00 : f32
      %39 = vector.broadcast %cst_20 : f32 to vector<16x128xf32>
      %40 = arith.maximumf %38, %39 : vector<16x128xf32>
      %41 = arith.truncf %40 : vector<16x128xf32> to vector<16x128xbf16>
      %c0_21 = arith.constant 0 : index
      %c0_22 = arith.constant 0 : index
      %42 = vector.load %arg8[%c0_21, %c0_22] : memref<16x128xbf16, #tpu.memory_space<vmem>>, vector<16x128xbf16>
      tpu.vector_store %arg8[%c0_21, %c0_22], %41 {strides = array<i32>} : memref<16x128xbf16, #tpu.memory_space<vmem>>, vector<16x128xbf16>,
    } else {
    }
    %c0 = arith.constant 0 : index
    %c0_1 = arith.constant 0 : index
    %3 = vector.load %arg8[%c0, %c0_1] : memref<16x128xbf16, #tpu.memory_space<vmem>>, vector<16x128xbf16>
    %c0_2 = arith.constant 0 : index
    %c0_3 = arith.constant 0 : index
    %4 = vector.load %arg5[%c0_2, %c0_3] : memref<128x256xbf16, #tpu.memory_space<vmem>>, vector<128x256xbf16>
    %cst = arith.constant dense<0.000000e+00> : vector<16x256xf32>
    %5 = tpu.matmul %3, %4, %cst {dimension_numbers = #tpu.dot_dimension_numbers<[1], [0], [0], [1], [0, 0, 1, 1], [], []>} : vector<16x128xbf16>, vector<128x256xbf16>, vector<16x256xf32> -> vector<16x256xf32>
    %c0_4 = arith.constant 0 : index
    %c0_5 = arith.constant 0 : index
    %6 = vector.load %arg6[%c0_4, %c0_5] : memref<1x256xf32, #tpu.memory_space<vmem>>, vector<1x256xf32>
    %7 = vector.broadcast %6 : vector<1x256xf32> to vector<16x256xf32>
    %8 = arith.addf %5, %7 : vector<16x256xf32>
    %9 = arith.truncf %8 : vector<16x256xf32> to vector<16x256xbf16>
    %c0_6 = arith.constant 0 : index
    %c0_7 = arith.constant 0 : index
    %10 = vector.load %arg7[%c0_6, %c0_7] : memref<16x256xbf16, #tpu.memory_space<vmem>>, vector<16x256xbf16>
    tpu.vector_store %arg7[%c0_6, %c0_7], %9 {strides = array<i32>} : memref<16x256xbf16, #tpu.memory_space<vmem>>, vector<16x256xbf16>,
    return
  }
  func.func @transform_0(%arg0: i32, %arg1: i32) -> (i32, i32) {
    %c0_i32 = arith.constant 0 : i32
    %c0_i32_0 = arith.constant 0 : i32
    return %arg0, %c0_i32 : i32, i32
  }
  func.func @transform_1(%arg0: i32, %arg1: i32) -> (i32, i32) {
    %c0_i32 = arith.constant 0 : i32
    %c0_i32_0 = arith.constant 0 : i32
    %c0_i32_1 = arith.constant 0 : i32
    return %c0_i32, %c0_i32_0 : i32, i32
  }
  func.func @transform_2(%arg0: i32, %arg1: i32) -> (i32, i32) {
    %c0_i32 = arith.constant 0 : i32
    %c0_i32_0 = arith.constant 0 : i32
    %c0_i32_1 = arith.constant 0 : i32
    return %c0_i32, %c0_i32_0 : i32, i32
  }
  func.func @transform_3(%arg0: i32, %arg1: i32) -> (i32, i32) {
    %c0_i32 = arith.constant 0 : i32
    %c0_i32_0 = arith.constant 0 : i32
    return %c0_i32, %arg1 : i32, i32
  }
  func.func @transform_4(%arg0: i32, %arg1: i32) -> (i32, i32) {
    %c0_i32 = arith.constant 0 : i32
    %c0_i32_0 = arith.constant 0 : i32
    return %c0_i32, %arg1 : i32, i32
  }
  func.func @transform_5(%arg0: i32, %arg1: i32) -> (i32, i32) {
    %c0_i32 = arith.constant 0 : i32
    return %arg0, %arg1 : i32, i32
  }
}

module attributes {stable_mosaic.version = 11 : i64} {
  func.func @_bigru_kernel(%arg0: i32, %arg1: i32, %arg2: i32, %arg3: memref<8x2x384xbf16, #tpu.memory_space<vmem>>, %arg4: memref<1x128x384xbf16, #tpu.memory_space<vmem>>, %arg5: memref<1x1x384xf32, #tpu.memory_space<vmem>>, %arg6: memref<8x2x128xbf16, #tpu.memory_space<vmem>>, %arg7: memref<2x128xf32, #tpu.memory_space<vmem>>) attributes {dimension_semantics = [#tpu.dimension_semantics<parallel>, #tpu.dimension_semantics<parallel>, #tpu.dimension_semantics<arbitrary>], iteration_bounds = array<i64: 2, 1, 1>, scalar_prefetch = 0 : i64, scratch_operands = 1 : i64, tpu.core_type = #tpu.core_type<tc>, window_params = [{transform_indices = @transform_0, window_bounds = array<i64: 8, 2, 384>}, {transform_indices = @transform_1, window_bounds = array<i64: 1, 128, 384>}, {transform_indices = @transform_2, window_bounds = array<i64: 1, 1, 384>}, {transform_indices = @transform_3, window_bounds = array<i64: 8, 2, 128>}]} {
    %c0_i32 = arith.constant 0 : i32
    %0 = arith.cmpi eq, %arg2, %c0_i32 : i32
    %1 = arith.extui %0 : i1 to i32
    %c0_i32_0 = arith.constant 0 : i32
    %2 = arith.cmpi ne, %1, %c0_i32_0 : i32
    scf.if %2 {
      %cst = arith.constant 0.000000e+00 : f32
      %16 = vector.broadcast %cst : f32 to vector<2x128xf32>
      %c0_14 = arith.constant 0 : index
      %c0_15 = arith.constant 0 : index
      %17 = vector.load %arg7[%c0_14, %c0_15] : memref<2x128xf32, #tpu.memory_space<vmem>>, vector<2x128xf32>
      tpu.vector_store %arg7[%c0_14, %c0_15], %16 {strides = array<i32>} : memref<2x128xf32, #tpu.memory_space<vmem>>, vector<2x128xf32>,
    } else {
    }
    %c0 = arith.constant 0 : index
    %c0_1 = arith.constant 0 : index
    %c0_2 = arith.constant 0 : index
    %3 = vector.load %arg4[%c0, %c0_1, %c0_2] : memref<1x128x384xbf16, #tpu.memory_space<vmem>>, vector<1x128x384xbf16>
    %4 = vector.shape_cast %3 : vector<1x128x384xbf16> to vector<128x384xbf16>
    %c0_3 = arith.constant 0 : index
    %c0_4 = arith.constant 0 : index
    %c0_5 = arith.constant 0 : index
    %5 = vector.load %arg5[%c0_3, %c0_4, %c0_5] : memref<1x1x384xf32, #tpu.memory_space<vmem>>, vector<1x1x384xf32>
    %6 = vector.shape_cast %5 : vector<1x1x384xf32> to vector<1x384xf32>
    %c2_i32 = arith.constant 2 : i32
    %7 = arith.muli %c2_i32, %arg2 : i32
    %c0_i32_6 = arith.constant 0 : i32
    %8 = arith.subi %c0_i32_6, %7 : i32
    %9 = arith.muli %arg0, %8 : i32
    %10 = arith.addi %arg2, %9 : i32
    %c8_i32 = arith.constant 8 : i32
    %11 = arith.muli %10, %c8_i32 : i32
    %c0_7 = arith.constant 0 : index
    %c0_8 = arith.constant 0 : index
    %12 = vector.load %arg7[%c0_7, %c0_8] : memref<2x128xf32, #tpu.memory_space<vmem>>, vector<2x128xf32>
    %c0_i32_9 = arith.constant 0 : i32
    %c8_i32_10 = arith.constant 8 : i32
    %13 = arith.addi %c0_i32_9, %c8_i32_10 : i32
    %c1_i32 = arith.constant 1 : i32
    %14 = scf.for %arg8 = %c0_i32_9 to %13 step %c1_i32 iter_args(%arg9 = %12) -> (vector<2x128xf32>)  : i32 {
      %c0_i32_14 = arith.constant 0 : i32
      %16 = arith.cmpi eq, %arg0, %c0_i32_14 : i32
      %c7_i32 = arith.constant 7 : i32
      %17 = arith.subi %c7_i32, %arg8 : i32
      %18 = arith.select %16, %arg8, %17 : i32
      %19 = arith.addi %11, %18 : i32
      %20 = arith.index_cast %18 : i32 to index
      %c0_15 = arith.constant 0 : index
      %c0_16 = arith.constant 0 : index
      %21 = vector.load %arg3[%20, %c0_15, %c0_16] : memref<8x2x384xbf16, #tpu.memory_space<vmem>>, vector<1x2x384xbf16>
      %22 = vector.shape_cast %21 : vector<1x2x384xbf16> to vector<2x384xbf16>
      %23 = arith.extf %22 : vector<2x384xbf16> to vector<2x384xf32>
      %24 = arith.truncf %arg9 : vector<2x128xf32> to vector<2x128xbf16>
      %cst = arith.constant dense<0.000000e+00> : vector<2x384xf32>
      %25 = tpu.matmul %24, %4, %cst {dimension_numbers = #tpu.dot_dimension_numbers<[1], [0], [0], [1], [0, 0, 1, 1], [], []>} : vector<2x128xbf16>, vector<128x384xbf16>, vector<2x384xf32> -> vector<2x384xf32>
      %26 = vector.broadcast %6 : vector<1x384xf32> to vector<2x384xf32>
      %27 = arith.addf %25, %26 : vector<2x384xf32>
      %28 = vector.extract_strided_slice %23 {offsets = [0, 0], sizes = [2, 128], strides = [1, 1]} : vector<2x384xf32> to vector<2x128xf32>
      %29 = vector.extract_strided_slice %27 {offsets = [0, 0], sizes = [2, 128], strides = [1, 1]} : vector<2x384xf32> to vector<2x128xf32>
      %30 = arith.addf %28, %29 : vector<2x128xf32>
      %31 = arith.negf %30 : vector<2x128xf32>
      %32 = math.exp %31 : vector<2x128xf32>
      %cst_17 = arith.constant 1.000000e+00 : f32
      %33 = vector.broadcast %cst_17 : f32 to vector<2x128xf32>
      %34 = arith.addf %33, %32 : vector<2x128xf32>
      %35 = arith.divf %33, %34 : vector<2x128xf32>
      %36 = vector.extract_strided_slice %23 {offsets = [0, 128], sizes = [2, 128], strides = [1, 1]} : vector<2x384xf32> to vector<2x128xf32>
      %37 = vector.extract_strided_slice %27 {offsets = [0, 128], sizes = [2, 128], strides = [1, 1]} : vector<2x384xf32> to vector<2x128xf32>
      %38 = arith.addf %36, %37 : vector<2x128xf32>
      %39 = arith.negf %38 : vector<2x128xf32>
      %40 = math.exp %39 : vector<2x128xf32>
      %cst_18 = arith.constant 1.000000e+00 : f32
      %41 = vector.broadcast %cst_18 : f32 to vector<2x128xf32>
      %42 = arith.addf %41, %40 : vector<2x128xf32>
      %43 = arith.divf %41, %42 : vector<2x128xf32>
      %44 = vector.extract_strided_slice %23 {offsets = [0, 256], sizes = [2, 128], strides = [1, 1]} : vector<2x384xf32> to vector<2x128xf32>
      %45 = vector.extract_strided_slice %27 {offsets = [0, 256], sizes = [2, 128], strides = [1, 1]} : vector<2x384xf32> to vector<2x128xf32>
      %46 = arith.mulf %35, %45 : vector<2x128xf32>
      %47 = arith.addf %44, %46 : vector<2x128xf32>
      %48 = math.tanh %47 : vector<2x128xf32>
      %cst_19 = arith.constant 1.000000e+00 : f32
      %49 = vector.broadcast %cst_19 : f32 to vector<2x128xf32>
      %50 = arith.subf %49, %43 : vector<2x128xf32>
      %51 = arith.mulf %50, %48 : vector<2x128xf32>
      %52 = arith.mulf %43, %arg9 : vector<2x128xf32>
      %53 = arith.addf %51, %52 : vector<2x128xf32>
      %c8_i32_20 = arith.constant 8 : i32
      %54 = arith.cmpi slt, %19, %c8_i32_20 : i32
      %55 = arith.select %54, %53, %arg9 : vector<2x128xf32>
      %56 = arith.truncf %55 : vector<2x128xf32> to vector<2x128xbf16>
      %57 = arith.index_cast %18 : i32 to index
      %c0_21 = arith.constant 0 : index
      %c0_22 = arith.constant 0 : index
      %58 = vector.load %arg6[%57, %c0_21, %c0_22] : memref<8x2x128xbf16, #tpu.memory_space<vmem>>, vector<1x2x128xbf16>
      %59 = vector.shape_cast %58 : vector<1x2x128xbf16> to vector<2x128xbf16>
      %60 = vector.shape_cast %56 : vector<2x128xbf16> to vector<1x2x128xbf16>
      tpu.vector_store %arg6[%57, %c0_21, %c0_22], %60 {strides = array<i32>} : memref<8x2x128xbf16, #tpu.memory_space<vmem>>, vector<1x2x128xbf16>,
      scf.yield %55 : vector<2x128xf32>
    }
    %c8_i32_11 = arith.constant 8 : i32
    %c0_12 = arith.constant 0 : index
    %c0_13 = arith.constant 0 : index
    %15 = vector.load %arg7[%c0_12, %c0_13] : memref<2x128xf32, #tpu.memory_space<vmem>>, vector<2x128xf32>
    tpu.vector_store %arg7[%c0_12, %c0_13], %14 {strides = array<i32>} : memref<2x128xf32, #tpu.memory_space<vmem>>, vector<2x128xf32>,
    return
  }
  func.func @transform_0(%arg0: i32, %arg1: i32, %arg2: i32) -> (i32, i32, i32) {
    %c2_i32 = arith.constant 2 : i32
    %0 = arith.muli %c2_i32, %arg2 : i32
    %c0_i32 = arith.constant 0 : i32
    %1 = arith.subi %c0_i32, %0 : i32
    %2 = arith.muli %arg0, %1 : i32
    %3 = arith.addi %arg2, %2 : i32
    %c0_i32_0 = arith.constant 0 : i32
    return %3, %arg1, %arg0 : i32, i32, i32
  }
  func.func @transform_1(%arg0: i32, %arg1: i32, %arg2: i32) -> (i32, i32, i32) {
    %c0_i32 = arith.constant 0 : i32
    %c0_i32_0 = arith.constant 0 : i32
    %c0_i32_1 = arith.constant 0 : i32
    return %arg0, %c0_i32, %c0_i32_0 : i32, i32, i32
  }
  func.func @transform_2(%arg0: i32, %arg1: i32, %arg2: i32) -> (i32, i32, i32) {
    %c0_i32 = arith.constant 0 : i32
    %c0_i32_0 = arith.constant 0 : i32
    %c0_i32_1 = arith.constant 0 : i32
    return %arg0, %c0_i32, %c0_i32_0 : i32, i32, i32
  }
  func.func @transform_3(%arg0: i32, %arg1: i32, %arg2: i32) -> (i32, i32, i32) {
    %c2_i32 = arith.constant 2 : i32
    %0 = arith.muli %c2_i32, %arg2 : i32
    %c0_i32 = arith.constant 0 : i32
    %1 = arith.subi %c0_i32, %0 : i32
    %2 = arith.muli %arg0, %1 : i32
    %3 = arith.addi %arg2, %2 : i32
    %c0_i32_0 = arith.constant 0 : i32
    return %3, %arg1, %arg0 : i32, i32, i32
  }
}

module attributes {stable_mosaic.version = 11 : i64} {
  func.func @_ln_matmul_kernel(%arg0: i32, %arg1: i32, %arg2: memref<16x256xbf16, #tpu.memory_space<vmem>>, %arg3: memref<1x256xf32, #tpu.memory_space<vmem>>, %arg4: memref<1x256xf32, #tpu.memory_space<vmem>>, %arg5: memref<256x256xbf16, #tpu.memory_space<vmem>>, %arg6: memref<1x256xf32, #tpu.memory_space<vmem>>, %arg7: memref<16x256xbf16, #tpu.memory_space<vmem>>, %arg8: memref<16x256xbf16, #tpu.memory_space<vmem>>) attributes {dimension_semantics = [#tpu.dimension_semantics<parallel>, #tpu.dimension_semantics<arbitrary>], iteration_bounds = array<i64: 1, 3>, scalar_prefetch = 0 : i64, scratch_operands = 1 : i64, tpu.core_type = #tpu.core_type<tc>, window_params = [{transform_indices = @transform_0, window_bounds = array<i64: 16, 256>}, {pipeline_mode = #tpu.pipeline_mode<synchronous>, transform_indices = @transform_1, window_bounds = array<i64: 1, 256>}, {pipeline_mode = #tpu.pipeline_mode<synchronous>, transform_indices = @transform_2, window_bounds = array<i64: 1, 256>}, {transform_indices = @transform_3, window_bounds = array<i64: 256, 256>}, {transform_indices = @transform_4, window_bounds = array<i64: 1, 256>}, {transform_indices = @transform_5, window_bounds = array<i64: 16, 256>}]} {
    %c0_i32 = arith.constant 0 : i32
    %0 = arith.cmpi eq, %arg1, %c0_i32 : i32
    %1 = arith.extui %0 : i1 to i32
    %c0_i32_0 = arith.constant 0 : i32
    %2 = arith.cmpi ne, %1, %c0_i32_0 : i32
    scf.if %2 {
      %c0_8 = arith.constant 0 : index
      %c0_9 = arith.constant 0 : index
      %11 = vector.load %arg2[%c0_8, %c0_9] : memref<16x256xbf16, #tpu.memory_space<vmem>>, vector<16x256xbf16>
      %12 = arith.extf %11 : vector<16x256xbf16> to vector<16x256xf32>
      %cst_10 = arith.constant dense<0.000000e+00> : vector<16xf32>
      %13 = vector.multi_reduction <add>, %12, %cst_10 [1] : vector<16x256xf32> to vector<16xf32>
      %14 = vector.shape_cast %13 : vector<16xf32> to vector<16x1xf32>
      %15 = arith.mulf %12, %12 : vector<16x256xf32>
      %cst_11 = arith.constant dense<0.000000e+00> : vector<16xf32>
      %16 = vector.multi_reduction <add>, %15, %cst_11 [1] : vector<16x256xf32> to vector<16xf32>
      %17 = vector.shape_cast %16 : vector<16xf32> to vector<16x1xf32>
      %cst_12 = arith.constant 1.562500e-02 : f32
      %18 = vector.broadcast %cst_12 : f32 to vector<16x1xf32>
      %19 = arith.mulf %14, %18 : vector<16x1xf32>
      %cst_13 = arith.constant 1.562500e-02 : f32
      %20 = vector.broadcast %cst_13 : f32 to vector<16x1xf32>
      %21 = arith.mulf %17, %20 : vector<16x1xf32>
      %22 = arith.mulf %19, %19 : vector<16x1xf32>
      %23 = arith.subf %21, %22 : vector<16x1xf32>
      %cst_14 = arith.constant 0.000000e+00 : f32
      %24 = vector.broadcast %cst_14 : f32 to vector<16x1xf32>
      %25 = arith.maximumf %23, %24 : vector<16x1xf32>
      %cst_15 = arith.constant 9.99999974E-6 : f32
      %26 = vector.broadcast %cst_15 : f32 to vector<16x1xf32>
      %27 = arith.addf %25, %26 : vector<16x1xf32>
      %28 = math.rsqrt %27 : vector<16x1xf32>
      %29 = vector.broadcast %19 : vector<16x1xf32> to vector<16x256xf32>
      %30 = arith.subf %12, %29 : vector<16x256xf32>
      %31 = vector.broadcast %28 : vector<16x1xf32> to vector<16x256xf32>
      %32 = arith.mulf %30, %31 : vector<16x256xf32>
      %c0_16 = arith.constant 0 : index
      %c0_17 = arith.constant 0 : index
      %33 = vector.load %arg3[%c0_16, %c0_17] : memref<1x256xf32, #tpu.memory_space<vmem>>, vector<1x256xf32>
      %34 = vector.broadcast %33 : vector<1x256xf32> to vector<16x256xf32>
      %35 = arith.mulf %32, %34 : vector<16x256xf32>
      %c0_18 = arith.constant 0 : index
      %c0_19 = arith.constant 0 : index
      %36 = vector.load %arg4[%c0_18, %c0_19] : memref<1x256xf32, #tpu.memory_space<vmem>>, vector<1x256xf32>
      %37 = vector.broadcast %36 : vector<1x256xf32> to vector<16x256xf32>
      %38 = arith.addf %35, %37 : vector<16x256xf32>
      %cst_20 = arith.constant 0.000000e+00 : f32
      %39 = vector.broadcast %cst_20 : f32 to vector<16x256xf32>
      %40 = arith.maximumf %38, %39 : vector<16x256xf32>
      %41 = arith.truncf %40 : vector<16x256xf32> to vector<16x256xbf16>
      %c0_21 = arith.constant 0 : index
      %c0_22 = arith.constant 0 : index
      %42 = vector.load %arg8[%c0_21, %c0_22] : memref<16x256xbf16, #tpu.memory_space<vmem>>, vector<16x256xbf16>
      tpu.vector_store %arg8[%c0_21, %c0_22], %41 {strides = array<i32>} : memref<16x256xbf16, #tpu.memory_space<vmem>>, vector<16x256xbf16>,
    } else {
    }
    %c0 = arith.constant 0 : index
    %c0_1 = arith.constant 0 : index
    %3 = vector.load %arg8[%c0, %c0_1] : memref<16x256xbf16, #tpu.memory_space<vmem>>, vector<16x256xbf16>
    %c0_2 = arith.constant 0 : index
    %c0_3 = arith.constant 0 : index
    %4 = vector.load %arg5[%c0_2, %c0_3] : memref<256x256xbf16, #tpu.memory_space<vmem>>, vector<256x256xbf16>
    %cst = arith.constant dense<0.000000e+00> : vector<16x256xf32>
    %5 = tpu.matmul %3, %4, %cst {dimension_numbers = #tpu.dot_dimension_numbers<[1], [0], [0], [1], [0, 0, 1, 1], [], []>} : vector<16x256xbf16>, vector<256x256xbf16>, vector<16x256xf32> -> vector<16x256xf32>
    %c0_4 = arith.constant 0 : index
    %c0_5 = arith.constant 0 : index
    %6 = vector.load %arg6[%c0_4, %c0_5] : memref<1x256xf32, #tpu.memory_space<vmem>>, vector<1x256xf32>
    %7 = vector.broadcast %6 : vector<1x256xf32> to vector<16x256xf32>
    %8 = arith.addf %5, %7 : vector<16x256xf32>
    %9 = arith.truncf %8 : vector<16x256xf32> to vector<16x256xbf16>
    %c0_6 = arith.constant 0 : index
    %c0_7 = arith.constant 0 : index
    %10 = vector.load %arg7[%c0_6, %c0_7] : memref<16x256xbf16, #tpu.memory_space<vmem>>, vector<16x256xbf16>
    tpu.vector_store %arg7[%c0_6, %c0_7], %9 {strides = array<i32>} : memref<16x256xbf16, #tpu.memory_space<vmem>>, vector<16x256xbf16>,
    return
  }
  func.func @transform_0(%arg0: i32, %arg1: i32) -> (i32, i32) {
    %c0_i32 = arith.constant 0 : i32
    %c0_i32_0 = arith.constant 0 : i32
    return %arg0, %c0_i32 : i32, i32
  }
  func.func @transform_1(%arg0: i32, %arg1: i32) -> (i32, i32) {
    %c0_i32 = arith.constant 0 : i32
    %c0_i32_0 = arith.constant 0 : i32
    %c0_i32_1 = arith.constant 0 : i32
    return %c0_i32, %c0_i32_0 : i32, i32
  }
  func.func @transform_2(%arg0: i32, %arg1: i32) -> (i32, i32) {
    %c0_i32 = arith.constant 0 : i32
    %c0_i32_0 = arith.constant 0 : i32
    %c0_i32_1 = arith.constant 0 : i32
    return %c0_i32, %c0_i32_0 : i32, i32
  }
  func.func @transform_3(%arg0: i32, %arg1: i32) -> (i32, i32) {
    %c0_i32 = arith.constant 0 : i32
    %c0_i32_0 = arith.constant 0 : i32
    return %c0_i32, %arg1 : i32, i32
  }
  func.func @transform_4(%arg0: i32, %arg1: i32) -> (i32, i32) {
    %c0_i32 = arith.constant 0 : i32
    %c0_i32_0 = arith.constant 0 : i32
    return %c0_i32, %arg1 : i32, i32
  }
  func.func @transform_5(%arg0: i32, %arg1: i32) -> (i32, i32) {
    %c0_i32 = arith.constant 0 : i32
    return %arg0, %arg1 : i32, i32
  }
}

module attributes {stable_mosaic.version = 11 : i64} {
  func.func @_bigru_kernel(%arg0: i32, %arg1: i32, %arg2: i32, %arg3: memref<2x8x384xbf16, #tpu.memory_space<vmem>>, %arg4: memref<1x128x384xbf16, #tpu.memory_space<vmem>>, %arg5: memref<1x1x384xf32, #tpu.memory_space<vmem>>, %arg6: memref<2x8x128xbf16, #tpu.memory_space<vmem>>, %arg7: memref<8x128xf32, #tpu.memory_space<vmem>>) attributes {dimension_semantics = [#tpu.dimension_semantics<parallel>, #tpu.dimension_semantics<parallel>, #tpu.dimension_semantics<arbitrary>], iteration_bounds = array<i64: 2, 1, 1>, scalar_prefetch = 0 : i64, scratch_operands = 1 : i64, tpu.core_type = #tpu.core_type<tc>, window_params = [{transform_indices = @transform_0, window_bounds = array<i64: 2, 8, 384>}, {transform_indices = @transform_1, window_bounds = array<i64: 1, 128, 384>}, {transform_indices = @transform_2, window_bounds = array<i64: 1, 1, 384>}, {transform_indices = @transform_3, window_bounds = array<i64: 2, 8, 128>}]} {
    %c0_i32 = arith.constant 0 : i32
    %0 = arith.cmpi eq, %arg2, %c0_i32 : i32
    %1 = arith.extui %0 : i1 to i32
    %c0_i32_0 = arith.constant 0 : i32
    %2 = arith.cmpi ne, %1, %c0_i32_0 : i32
    scf.if %2 {
      %cst = arith.constant 0.000000e+00 : f32
      %16 = vector.broadcast %cst : f32 to vector<8x128xf32>
      %c0_15 = arith.constant 0 : index
      %c0_16 = arith.constant 0 : index
      %17 = vector.load %arg7[%c0_15, %c0_16] : memref<8x128xf32, #tpu.memory_space<vmem>>, vector<8x128xf32>
      tpu.vector_store %arg7[%c0_15, %c0_16], %16 {strides = array<i32>} : memref<8x128xf32, #tpu.memory_space<vmem>>, vector<8x128xf32>,
    } else {
    }
    %c0 = arith.constant 0 : index
    %c0_1 = arith.constant 0 : index
    %c0_2 = arith.constant 0 : index
    %3 = vector.load %arg4[%c0, %c0_1, %c0_2] : memref<1x128x384xbf16, #tpu.memory_space<vmem>>, vector<1x128x384xbf16>
    %4 = vector.shape_cast %3 : vector<1x128x384xbf16> to vector<128x384xbf16>
    %c0_3 = arith.constant 0 : index
    %c0_4 = arith.constant 0 : index
    %c0_5 = arith.constant 0 : index
    %5 = vector.load %arg5[%c0_3, %c0_4, %c0_5] : memref<1x1x384xf32, #tpu.memory_space<vmem>>, vector<1x1x384xf32>
    %6 = vector.shape_cast %5 : vector<1x1x384xf32> to vector<1x384xf32>
    %c2_i32 = arith.constant 2 : i32
    %7 = arith.muli %c2_i32, %arg2 : i32
    %c0_i32_6 = arith.constant 0 : i32
    %8 = arith.subi %c0_i32_6, %7 : i32
    %9 = arith.muli %arg0, %8 : i32
    %10 = arith.addi %arg2, %9 : i32
    %c2_i32_7 = arith.constant 2 : i32
    %11 = arith.muli %10, %c2_i32_7 : i32
    %c0_8 = arith.constant 0 : index
    %c0_9 = arith.constant 0 : index
    %12 = vector.load %arg7[%c0_8, %c0_9] : memref<8x128xf32, #tpu.memory_space<vmem>>, vector<8x128xf32>
    %c0_i32_10 = arith.constant 0 : i32
    %c2_i32_11 = arith.constant 2 : i32
    %13 = arith.addi %c0_i32_10, %c2_i32_11 : i32
    %c1_i32 = arith.constant 1 : i32
    %14 = scf.for %arg8 = %c0_i32_10 to %13 step %c1_i32 iter_args(%arg9 = %12) -> (vector<8x128xf32>)  : i32 {
      %c0_i32_15 = arith.constant 0 : i32
      %16 = arith.cmpi eq, %arg0, %c0_i32_15 : i32
      %c1_i32_16 = arith.constant 1 : i32
      %17 = arith.subi %c1_i32_16, %arg8 : i32
      %18 = arith.select %16, %arg8, %17 : i32
      %19 = arith.addi %11, %18 : i32
      %20 = arith.index_cast %18 : i32 to index
      %c0_17 = arith.constant 0 : index
      %c0_18 = arith.constant 0 : index
      %21 = vector.load %arg3[%20, %c0_17, %c0_18] : memref<2x8x384xbf16, #tpu.memory_space<vmem>>, vector<1x8x384xbf16>
      %22 = vector.shape_cast %21 : vector<1x8x384xbf16> to vector<8x384xbf16>
      %23 = arith.extf %22 : vector<8x384xbf16> to vector<8x384xf32>
      %24 = arith.truncf %arg9 : vector<8x128xf32> to vector<8x128xbf16>
      %cst = arith.constant dense<0.000000e+00> : vector<8x384xf32>
      %25 = tpu.matmul %24, %4, %cst {dimension_numbers = #tpu.dot_dimension_numbers<[1], [0], [0], [1], [0, 0, 1, 1], [], []>} : vector<8x128xbf16>, vector<128x384xbf16>, vector<8x384xf32> -> vector<8x384xf32>
      %26 = vector.broadcast %6 : vector<1x384xf32> to vector<8x384xf32>
      %27 = arith.addf %25, %26 : vector<8x384xf32>
      %28 = vector.extract_strided_slice %23 {offsets = [0, 0], sizes = [8, 128], strides = [1, 1]} : vector<8x384xf32> to vector<8x128xf32>
      %29 = vector.extract_strided_slice %27 {offsets = [0, 0], sizes = [8, 128], strides = [1, 1]} : vector<8x384xf32> to vector<8x128xf32>
      %30 = arith.addf %28, %29 : vector<8x128xf32>
      %31 = arith.negf %30 : vector<8x128xf32>
      %32 = math.exp %31 : vector<8x128xf32>
      %cst_19 = arith.constant 1.000000e+00 : f32
      %33 = vector.broadcast %cst_19 : f32 to vector<8x128xf32>
      %34 = arith.addf %33, %32 : vector<8x128xf32>
      %35 = arith.divf %33, %34 : vector<8x128xf32>
      %36 = vector.extract_strided_slice %23 {offsets = [0, 128], sizes = [8, 128], strides = [1, 1]} : vector<8x384xf32> to vector<8x128xf32>
      %37 = vector.extract_strided_slice %27 {offsets = [0, 128], sizes = [8, 128], strides = [1, 1]} : vector<8x384xf32> to vector<8x128xf32>
      %38 = arith.addf %36, %37 : vector<8x128xf32>
      %39 = arith.negf %38 : vector<8x128xf32>
      %40 = math.exp %39 : vector<8x128xf32>
      %cst_20 = arith.constant 1.000000e+00 : f32
      %41 = vector.broadcast %cst_20 : f32 to vector<8x128xf32>
      %42 = arith.addf %41, %40 : vector<8x128xf32>
      %43 = arith.divf %41, %42 : vector<8x128xf32>
      %44 = vector.extract_strided_slice %23 {offsets = [0, 256], sizes = [8, 128], strides = [1, 1]} : vector<8x384xf32> to vector<8x128xf32>
      %45 = vector.extract_strided_slice %27 {offsets = [0, 256], sizes = [8, 128], strides = [1, 1]} : vector<8x384xf32> to vector<8x128xf32>
      %46 = arith.mulf %35, %45 : vector<8x128xf32>
      %47 = arith.addf %44, %46 : vector<8x128xf32>
      %48 = math.tanh %47 : vector<8x128xf32>
      %cst_21 = arith.constant 1.000000e+00 : f32
      %49 = vector.broadcast %cst_21 : f32 to vector<8x128xf32>
      %50 = arith.subf %49, %43 : vector<8x128xf32>
      %51 = arith.mulf %50, %48 : vector<8x128xf32>
      %52 = arith.mulf %43, %arg9 : vector<8x128xf32>
      %53 = arith.addf %51, %52 : vector<8x128xf32>
      %c2_i32_22 = arith.constant 2 : i32
      %54 = arith.cmpi slt, %19, %c2_i32_22 : i32
      %55 = arith.select %54, %53, %arg9 : vector<8x128xf32>
      %56 = arith.truncf %55 : vector<8x128xf32> to vector<8x128xbf16>
      %57 = arith.index_cast %18 : i32 to index
      %c0_23 = arith.constant 0 : index
      %c0_24 = arith.constant 0 : index
      %58 = vector.load %arg6[%57, %c0_23, %c0_24] : memref<2x8x128xbf16, #tpu.memory_space<vmem>>, vector<1x8x128xbf16>
      %59 = vector.shape_cast %58 : vector<1x8x128xbf16> to vector<8x128xbf16>
      %60 = vector.shape_cast %56 : vector<8x128xbf16> to vector<1x8x128xbf16>
      tpu.vector_store %arg6[%57, %c0_23, %c0_24], %60 {strides = array<i32>} : memref<2x8x128xbf16, #tpu.memory_space<vmem>>, vector<1x8x128xbf16>,
      scf.yield %55 : vector<8x128xf32>
    }
    %c2_i32_12 = arith.constant 2 : i32
    %c0_13 = arith.constant 0 : index
    %c0_14 = arith.constant 0 : index
    %15 = vector.load %arg7[%c0_13, %c0_14] : memref<8x128xf32, #tpu.memory_space<vmem>>, vector<8x128xf32>
    tpu.vector_store %arg7[%c0_13, %c0_14], %14 {strides = array<i32>} : memref<8x128xf32, #tpu.memory_space<vmem>>, vector<8x128xf32>,
    return
  }
  func.func @transform_0(%arg0: i32, %arg1: i32, %arg2: i32) -> (i32, i32, i32) {
    %c2_i32 = arith.constant 2 : i32
    %0 = arith.muli %c2_i32, %arg2 : i32
    %c0_i32 = arith.constant 0 : i32
    %1 = arith.subi %c0_i32, %0 : i32
    %2 = arith.muli %arg0, %1 : i32
    %3 = arith.addi %arg2, %2 : i32
    %c0_i32_0 = arith.constant 0 : i32
    return %3, %arg1, %arg0 : i32, i32, i32
  }
  func.func @transform_1(%arg0: i32, %arg1: i32, %arg2: i32) -> (i32, i32, i32) {
    %c0_i32 = arith.constant 0 : i32
    %c0_i32_0 = arith.constant 0 : i32
    %c0_i32_1 = arith.constant 0 : i32
    return %arg0, %c0_i32, %c0_i32_0 : i32, i32, i32
  }
  func.func @transform_2(%arg0: i32, %arg1: i32, %arg2: i32) -> (i32, i32, i32) {
    %c0_i32 = arith.constant 0 : i32
    %c0_i32_0 = arith.constant 0 : i32
    %c0_i32_1 = arith.constant 0 : i32
    return %arg0, %c0_i32, %c0_i32_0 : i32, i32, i32
  }
  func.func @transform_3(%arg0: i32, %arg1: i32, %arg2: i32) -> (i32, i32, i32) {
    %c2_i32 = arith.constant 2 : i32
    %0 = arith.muli %c2_i32, %arg2 : i32
    %c0_i32 = arith.constant 0 : i32
    %1 = arith.subi %c0_i32, %0 : i32
    %2 = arith.muli %arg0, %1 : i32
    %3 = arith.addi %arg2, %2 : i32
    %c0_i32_0 = arith.constant 0 : i32
    return %3, %arg1, %arg0 : i32, i32, i32
  }
}

module attributes {stable_mosaic.version = 11 : i64} {
  func.func @_matmul_kernel(%arg0: i32, %arg1: i32, %arg2: i32, %arg3: memref<16x128xbf16, #tpu.memory_space<vmem>>, %arg4: memref<128x10xbf16, #tpu.memory_space<vmem>>, %arg5: memref<1x10xf32, #tpu.memory_space<vmem>>, %arg6: memref<16x10xf32, #tpu.memory_space<vmem>>) attributes {dimension_semantics = [#tpu.dimension_semantics<parallel>, #tpu.dimension_semantics<parallel>, #tpu.dimension_semantics<arbitrary>], iteration_bounds = array<i64: 1, 1, 1>, scalar_prefetch = 0 : i64, scratch_operands = 0 : i64, tpu.core_type = #tpu.core_type<tc>, window_params = [{transform_indices = @transform_0, window_bounds = array<i64: 16, 128>}, {transform_indices = @transform_1, window_bounds = array<i64: 128, 10>}, {transform_indices = @transform_2, window_bounds = array<i64: 1, 10>}, {transform_indices = @transform_3, window_bounds = array<i64: 16, 10>}]} {
    %c0 = arith.constant 0 : index
    %c0_0 = arith.constant 0 : index
    %0 = vector.load %arg3[%c0, %c0_0] : memref<16x128xbf16, #tpu.memory_space<vmem>>, vector<16x128xbf16>
    %cst = arith.constant 0.000000e+00 : bf16
    %1 = vector.broadcast %cst : bf16 to vector<16x128xbf16>
    %2 = arith.maximumf %0, %1 : vector<16x128xbf16>
    %c0_1 = arith.constant 0 : index
    %c0_2 = arith.constant 0 : index
    %3 = vector.load %arg4[%c0_1, %c0_2] : memref<128x10xbf16, #tpu.memory_space<vmem>>, vector<128x10xbf16>
    %cst_3 = arith.constant dense<0.000000e+00> : vector<16x10xf32>
    %4 = tpu.matmul %2, %3, %cst_3 {dimension_numbers = #tpu.dot_dimension_numbers<[1], [0], [0], [1], [0, 0, 1, 1], [], []>} : vector<16x128xbf16>, vector<128x10xbf16>, vector<16x10xf32> -> vector<16x10xf32>
    %c0_4 = arith.constant 0 : index
    %c0_5 = arith.constant 0 : index
    %5 = vector.load %arg5[%c0_4, %c0_5] : memref<1x10xf32, #tpu.memory_space<vmem>>, vector<1x10xf32>
    %6 = vector.broadcast %5 : vector<1x10xf32> to vector<16x10xf32>
    %7 = arith.addf %4, %6 : vector<16x10xf32>
    %c0_6 = arith.constant 0 : index
    %c0_7 = arith.constant 0 : index
    %8 = vector.load %arg6[%c0_6, %c0_7] : memref<16x10xf32, #tpu.memory_space<vmem>>, vector<16x10xf32>
    tpu.vector_store %arg6[%c0_6, %c0_7], %7 {strides = array<i32>} : memref<16x10xf32, #tpu.memory_space<vmem>>, vector<16x10xf32>,
    return
  }
  func.func @transform_0(%arg0: i32, %arg1: i32, %arg2: i32) -> (i32, i32) {
    %c0_i32 = arith.constant 0 : i32
    return %arg0, %arg2 : i32, i32
  }
  func.func @transform_1(%arg0: i32, %arg1: i32, %arg2: i32) -> (i32, i32) {
    %c0_i32 = arith.constant 0 : i32
    return %arg2, %arg1 : i32, i32
  }
  func.func @transform_2(%arg0: i32, %arg1: i32, %arg2: i32) -> (i32, i32) {
    %c0_i32 = arith.constant 0 : i32
    %c0_i32_0 = arith.constant 0 : i32
    return %c0_i32, %arg1 : i32, i32
  }
  func.func @transform_3(%arg0: i32, %arg1: i32, %arg2: i32) -> (i32, i32) {
    %c0_i32 = arith.constant 0 : i32
    return %arg0, %arg1 : i32, i32
  }
}

</mosaic_0001>

<bundles_post_ra>
// kernel: forward.12
= control target key start
LH: loop header
LB: loop body
LE: loop exit
PB: predicated region body
PF: predicated region fallthrough
CT: control target
= control target key end

     0   :  { %vm107_vm0 = vcmask 1043456   ;;  %vm108_vm1 = vcmask 1044480   ;;  %v258_v2 = vmov 65535   ;;  %vm82_vm2 = vcmask 72704   ;;  %s384_s1 = inlined_call_operand.vmem [shape: bf16[9,32], index: 1, kind: input, shape index: {}]   ;;  %s385_s0 = inlined_call_operand.vmem [shape: bf16[128,9], index: 0, kind: input, shape index: {}]   ;;  %s386_s2 = inlined_call_operand.vmem [shape: f32[1,32], index: 2, kind: input, shape index: {}]   ;;  %s387_s3 = inlined_call_operand.vmem [shape: bf16[128,32], index: 3, kind: output, shape index: {}]  }
   0x1   :  { %v234_v0 = vld [vmem:[%s384_s1] sm:$0xf]  ;;  %v252_v1 = vld [vmem:[%s384_s1] sm:$0x10]  ;;  %v109_v3 = vsel %vm107_vm0, 4294967295, %v258_v2  ;;  %v246_v8 = vld [vmem:[%s385_s0 + $0x10] sm:$0xff] }
   0x2   :  { %v235_v4 = vor.u32 %v252_v1, %v234_v0  ;;  %v110_v5 = vsel %vm108_vm1, %v109_v3, 0  ;;  %v244_v7 = vld [vmem:[%s385_s0] sm:$0xff]  ;;  %v250_v10 = vld [vmem:[%s385_s0 + $0x30] sm:$0xff]  ;;  %v245_v11 = vld [vmem:[%s385_s0 + $0x8] sm:$0xff]  ;;  %vm179_vm3 = vcmask 257024  }
   0x3   :  { %v248_v9 = vld [vmem:[%s385_s0 + $0x20] sm:$0xff]  ;;  %v247_v12 = vld [vmem:[%s385_s0 + $0x18] sm:$0xff]  ;;  %v249_v13 = vld [vmem:[%s385_s0 + $0x28] sm:$0xff] }
   0x4   :  { %v112_v6 = vand.u32 %v235_v4, %v110_v5  ;;  %v251_v14 = vld [vmem:[%s385_s0 + $0x38] sm:$0xff]  ;;  %v257_v15 = vld [vmem:[%s386_s2] ss:$0 sm:$0xff] }
   0x6   :  { %121 = vmatpush.bf16.msra.mxu0 %v112_v6  ;;  %253 = vmatpush.bf16.msra.mxu1 %v112_v6 }
   0x7   :  { %254 = vmatpush.bf16.msra.mxu2 %v112_v6  ;;  %255 = vmatpush.bf16.msra.mxu3 %v112_v6 }
   0x9   :  { %236 = vmatmul.msk.bf16.vlgmr.msra.gmra.mxu0 %vm82_vm2, %v244_v7  ;;  %238 = vmatmul.msk.bf16.vlgmr.msra.gmra.mxu1 %vm82_vm2, %v246_v8 }
   0xa   :  { %240 = vmatmul.msk.bf16.vlgmr.msra.gmra.mxu2 %vm82_vm2, %v248_v9  ;;  %242 = vmatmul.msk.bf16.vlgmr.msra.gmra.mxu3 %vm82_vm2, %v250_v10 }
  0x19   :  { %237 = vmatmul.msk.bf16.gmra.mxu0 %vm82_vm2, %v245_v11  ;;  %239 = vmatmul.msk.bf16.gmra.mxu1 %vm82_vm2, %v247_v12 }
  0x1a   :  { %241 = vmatmul.msk.bf16.gmra.mxu2 %vm82_vm2, %v249_v13  ;;  %243 = vmatmul.msk.bf16.gmra.mxu3 %vm82_vm2, %v251_v14 }
  0x86   :  { %v123_v16 = vpop.f32.mrf.mxu0  ;;  %v133_v17 = vpop.f32.mrf.mxu1 }
  0x87   :  { %v124_v18 = vadd.f32 %v257_v15, %v123_v16  ;;  %v134_v19 = vadd.f32 %v257_v15, %v133_v17 }
  0x89   :  { %v163_v20 = vpack.c.bf16 %v124_v18, %v124_v18  ;;  %v167_v21 = vpack.c.bf16 %v134_v19, %v134_v19 }
  0x8b   :  { %180 = vst.msk [vmem:[%s387_s3] sm:$0xf] %vm179_vm3, %v163_v20 }
  0x8c   :  { %184 = vst.msk [vmem:[%s387_s3 + $0x10] sm:$0xf] %vm179_vm3, %v167_v21 }
  0x8d   :  { %v143_v22 = vpop.f32.mrf.mxu2  ;;  %v153_v23 = vpop.f32.mrf.mxu3 }
  0x8e   :  { %v144_v24 = vadd.f32 %v257_v15, %v143_v22  ;;  %v154_v25 = vadd.f32 %v257_v15, %v153_v23  ;;  %v125_v26 = vpop.f32.mrf.mxu0  ;;  %v135_v27 = vpop.f32.mrf.mxu1 }
  0x8f   :  { %v126_v28 = vadd.f32 %v257_v15, %v125_v26  ;;  %v136_v29 = vadd.f32 %v257_v15, %v135_v27 }
  0x90   :  { %v171_v30 = vpack.c.bf16 %v144_v24, %v144_v24  ;;  %v175_v31 = vpack.c.bf16 %v154_v25, %v154_v25 }
  0x91   :  { %v164_v32 = vpack.c.bf16 %v126_v28, %v126_v28  ;;  %v168_v33 = vpack.c.bf16 %v136_v29, %v136_v29 }
  0x92   :  { %188 = vst.msk [vmem:[%s387_s3 + $0x20] sm:$0xf] %vm179_vm3, %v171_v30 }
  0x93   :  { %192 = vst.msk [vmem:[%s387_s3 + $0x30] sm:$0xf] %vm179_vm3, %v175_v31 }
  0x94   :  { %181 = vst.msk [vmem:[%s387_s3 + $0x4] sm:$0xf] %vm179_vm3, %v164_v32 }
  0x95   :  { %185 = vst.msk [vmem:[%s387_s3 + $0x14] sm:$0xf] %vm179_vm3, %v168_v33  ;;  %v145_v34 = vpop.f32.mrf.mxu2  ;;  %v155_v35 = vpop.f32.mrf.mxu3 }
  0x96   :  { %v146_v36 = vadd.f32 %v257_v15, %v145_v34  ;;  %v156_v37 = vadd.f32 %v257_v15, %v155_v35  ;;  %v128_v38 = vpop.f32.mrf.mxu0  ;;  %v138_v39 = vpop.f32.mrf.mxu1 }
  0x97   :  { %v129_v40 = vadd.f32 %v257_v15, %v128_v38  ;;  %v139_v41 = vadd.f32 %v257_v15, %v138_v39 }
  0x98   :  { %v172_v42 = vpack.c.bf16 %v146_v36, %v146_v36  ;;  %v176_v43 = vpack.c.bf16 %v156_v37, %v156_v37 }
  0x99   :  { %v165_v44 = vpack.c.bf16 %v129_v40, %v129_v40  ;;  %v169_v45 = vpack.c.bf16 %v139_v41, %v139_v41 }
  0x9a   :  { %189 = vst.msk [vmem:[%s387_s3 + $0x24] sm:$0xf] %vm179_vm3, %v172_v42 }
  0x9b   :  { %193 = vst.msk [vmem:[%s387_s3 + $0x34] sm:$0xf] %vm179_vm3, %v176_v43 }
  0x9c   :  { %182 = vst.msk [vmem:[%s387_s3 + $0x8] sm:$0xf] %vm179_vm3, %v165_v44 }
  0x9d   :  { %186 = vst.msk [vmem:[%s387_s3 + $0x18] sm:$0xf] %vm179_vm3, %v169_v45  ;;  %v148_v46 = vpop.f32.mrf.mxu2  ;;  %v158_v47 = vpop.f32.mrf.mxu3 }
  0x9e   :  { %v149_v48 = vadd.f32 %v257_v15, %v148_v46  ;;  %v159_v49 = vadd.f32 %v257_v15, %v158_v47  ;;  %v130_v50 = vpop.f32.mrf.mxu0  ;;  %v140_v51 = vpop.f32.mrf.mxu1 }
  0x9f   :  { %v131_v52 = vadd.f32 %v257_v15, %v130_v50  ;;  %v141_v53 = vadd.f32 %v257_v15, %v140_v51 }
  0xa0   :  { %v173_v54 = vpack.c.bf16 %v149_v48, %v149_v48  ;;  %v177_v55 = vpack.c.bf16 %v159_v49, %v159_v49 }
  0xa1   :  { %v166_v56 = vpack.c.bf16 %v131_v52, %v131_v52  ;;  %v170_v57 = vpack.c.bf16 %v141_v53, %v141_v53 }
  0xa2   :  { %190 = vst.msk [vmem:[%s387_s3 + $0x28] sm:$0xf] %vm179_vm3, %v173_v54 }
  0xa3   :  { %194 = vst.msk [vmem:[%s387_s3 + $0x38] sm:$0xf] %vm179_vm3, %v177_v55 }
  0xa4   :  { %183 = vst.msk [vmem:[%s387_s3 + $0xc] sm:$0xf] %vm179_vm3, %v166_v56 }
  0xa5   :  { %187 = vst.msk [vmem:[%s387_s3 + $0x1c] sm:$0xf] %vm179_vm3, %v170_v57  ;;  %v150_v58 = vpop.f32.mrf.mxu2  ;;  %v160_v59 = vpop.f32.mrf.mxu3 }
  0xa6   :  { %v151_v60 = vadd.f32 %v257_v15, %v150_v58  ;;  %v161_v61 = vadd.f32 %v257_v15, %v160_v59 }
  0xa8   :  { %v174_v62 = vpack.c.bf16 %v151_v60, %v151_v60  ;;  %v178_v63 = vpack.c.bf16 %v161_v61, %v161_v61 }
  0xaa   :  { %191 = vst.msk [vmem:[%s387_s3 + $0x2c] sm:$0xf] %vm179_vm3, %v174_v62 }
  0xab   :  { %195 = vst.msk [vmem:[%s387_s3 + $0x3c] sm:$0xf] %vm179_vm3, %v178_v63 }

// kernel: forward.13
= control target key start
LH: loop header
LB: loop body
LE: loop exit
PB: predicated region body
PF: predicated region fallthrough
CT: control target
= control target key end

     0   :  { %v1214_v2 = vmov 0   ;;  %s1215_s16 = smov 96   ;;  %s1216_s17 = smov 64   ;;  %v1218_v12 = vmov 8.0   ;;  %v1219_v17 = vmov 1983009808   ;;  %s2137_s0 = inlined_call_operand.vmem [shape: bf16[16,256], index: 0, kind: input, shape index: {}]   ;;  %s2138_s1 = inlined_call_operand.vmem [shape: f32[1,8,1], index: 1, kind: input, shape index: {}]   ;;  %s2139_s2 = inlined_call_operand.vmem [shape: f32[1,8,1], index: 2, kind: input, shape index: {}]   ;;  %s2140_s3 = inlined_call_operand.vmem [shape: bf16[16,256], index: 3, kind: output, shape index: {}]  }
   0x1   :  { %v14_v0 = vld [vmem:[%s2137_s0] sm:$0xff]  ;;  %v15_v1 = vld [vmem:[%s2137_s0 + $0x8] sm:$0xff]  ;;  %1148 = vset.pattern.permute.xlu0 %v1214_v2  ;;  %1149 = vset.pattern.permute.xlu1 %v1214_v2  ;;  %s1217_s0 = smov 32   ;;  %1180 = vrcp.f32 %v1218_v12  ;;  %v66_v18 = vunpack.c.l.s4 %v1219_v17  ;;  %vm2148_vm0 = vcmask 1047556   ;;  %v1220_v39 = vmov 1934713408  }
   0x2   :  { %v17_v3 = vunpack.c.h.bf16 %v14_v0  ;;  %v19_v4 = vunpack.c.h.bf16 %v15_v1  ;;  %v1247_v5 = vunpack.c.l.bf16 %v14_v0  ;;  %v1249_v6 = vunpack.c.l.bf16 %v15_v1  ;;  %v773_v9 = vld [vmem:[%s2138_s1] sm:$0xff] }
   0x3   :  { %v795_v10 = vld [vmem:[%s2139_s2] sm:$0xff]  ;;  %v1265_v24 = vunpack.c.0.s8 %v66_v18  ;;  %v114_v40 = vunpack.c.l.s4 %v1220_v39  ;;  %vm2147_vm2 = vcmask 261120  }
   0x4   :  { %v1128_v7 = vpack.i.bf16 %v19_v4, %v17_v3  ;;  %v1118_v8 = vpack.i.bf16 %v1249_v6, %v1247_v5  ;;  %v199_v25 = vrot.slane %v19_v4, 4  ;;  %v87_v27 = vrot.slane %v17_v3, 4 }
   0x5   :  { %2149 = vst [vmem:[#allocation2_spill] sm:$0xff] %v1265_v24  ;;  %v175_v48 = vrot.slane %v1249_v6, 4  ;;  %v1280_v55 = vunpack.c.0.s8 %v114_v40  ;;  %v63_v59 = vrot.slane %v1247_v5, 4 }
   0x6   :  { %1129 = vrot.lane.b32.xlu1 %v1128_v7, %s1215_s16  ;;  %1119 = vrot.lane.b32.xlu0 %v1118_v8, %s1216_s17 }
   0x7   :  { %1139 = vrot.lane.b32.xlu2 %v1128_v7, %s1216_s17  ;;  %v1181_v15 = vpop.eup %1180  ;;  %2150 = vst [vmem:[#allocation3_spill] sm:$0xff] %v1280_v55 }
   0x8   :  { %v399_v22 = vmul.f32 8.0, %v1181_v15  ;;  %vm403_vm1 = vweird.f32 %v1181_v15 }
   0xa   :  { %v400_v31 = vsub.f32 1.0, %v399_v22 }
   0xc   :  { %v401_v46 = vmul.f32 %v1181_v15, %v400_v31 }
   0xe   :  { %1134 = vrot.lane.b32.xlu1 %v1118_v8, %s1215_s16  ;;  %1124 = vrot.lane.b32.xlu0 %v1118_v8, %s1217_s0  ;;  %v402_v60 = vadd.f32 %v1181_v15, %v401_v46 }
   0xf   :  { %1144 = vrot.lane.b32.xlu2 %v1128_v7, %s1217_s0 }
  0x10   :  { %v1293_v12 = vsel %vm403_vm1, %v1181_v15, %v402_v60 }
  0x16   :  { %776 = vperm.xlu0 %1148, %v773_v9   ;;  %798 = vperm.xlu1 %1149, %v795_v10  }
  0x61   :  { %v1140_v11 = vpop.permute.xlu2 %1139 }
  0x62   :  { %v1142_v13 = vunpack.i.h.bf16 %v1140_v11  ;;  %v1141_v16 = vunpack.i.l.bf16 %v1140_v11 }
  0x64   :  { %v197_v19 = vrot.slane %v1142_v13, 4  ;;  %v85_v23 = vrot.slane %v1141_v16, 4  ;;  %v200_v34 = vsel %vm2148_vm0, %v1142_v13, %v199_v25  ;;  %v88_v38 = vsel %vm2148_vm0, %v1141_v16, %v87_v27 }
  0x65   :  { %v208_v47 = vperm.slane %v200_v34, %v1265_v24  ;;  %v96_v54 = vperm.slane %v88_v38, %v1265_v24 }
  0x66   :  { %v198_v26 = vsel %vm2148_vm0, %v197_v19, %v19_v4  ;;  %v86_v32 = vsel %vm2148_vm0, %v85_v23, %v17_v3 }
  0x67   :  { %v204_v35 = vperm.slane %v198_v26, %v1265_v24  ;;  %v92_v43 = vperm.slane %v86_v32, %v1265_v24  ;;  %v259_v0 = vrot.slane %v208_v47, 4  ;;  %v147_v4 = vrot.slane %v96_v54, 4 }
  0x69   :  { %v1145_v14 = vpop.permute.xlu2 %1144  ;;  %v247_v50 = vrot.slane %v204_v35, 4  ;;  %v135_v57 = vrot.slane %v92_v43, 4 }
  0x6a   :  { %v1147_v20 = vunpack.i.h.bf16 %v1145_v14  ;;  %v1146_v21 = vunpack.i.l.bf16 %v1145_v14 }
  0x6c   :  { %v209_v28 = vrot.slane %v1147_v20, 4  ;;  %v97_v29 = vrot.slane %v1146_v21, 4 }
  0x78   :  { %v1130_v30 = vpop.permute.xlu1 %1129  ;;  %v1120_v37 = vpop.permute.xlu0 %1119 }
  0x79   :  { %v1132_v33 = vunpack.i.h.bf16 %v1130_v30  ;;  %v1131_v36 = vunpack.i.l.bf16 %v1130_v30  ;;  %v1122_v49 = vunpack.i.h.bf16 %v1120_v37  ;;  %v1121_v53 = vunpack.i.l.bf16 %v1120_v37 }
  0x7b   :  { %v210_v41 = vsel %vm2148_vm0, %v209_v28, %v1132_v33  ;;  %v211_v42 = vrot.slane %v1132_v33, 4  ;;  %v98_v45 = vsel %vm2148_vm0, %v97_v29, %v1131_v36  ;;  %v99_v52 = vrot.slane %v1131_v36, 4 }
  0x7c   :  { %v216_v44 = vperm.slane %v210_v41, %v1265_v24  ;;  %v104_v56 = vperm.slane %v98_v45, %v1265_v24  ;;  %v173_v62 = vrot.slane %v1122_v49, 4  ;;  %v176_v63 = vsel %vm2148_vm0, %v1122_v49, %v175_v48 }
  0x7d   :  { %v212_v51 = vsel %vm2148_vm0, %v1147_v20, %v211_v42  ;;  %v100_v2 = vsel %vm2148_vm0, %v1146_v21, %v99_v52  ;;  %v60_v3 = vrot.slane %v1121_v53, 4  ;;  %v1291_v11 = vperm.slane %v176_v63, %v1265_v24 }
  0x7e   :  { %v245_v58 = vrot.slane %v216_v44, 4  ;;  %v220_v61 = vperm.slane %v212_v51, %v1265_v24  ;;  %v248_v1 = vsel %vm2148_vm0, %v216_v44, %v247_v50  ;;  %v133_v7 = vrot.slane %v104_v56, 4 }
  0x7f   :  { %v136_v10 = vsel %vm2148_vm0, %v104_v56, %v135_v57  ;;  %v1296_v13 = vperm.slane %v248_v1, %v1280_v55  ;;  %v108_v16 = vperm.slane %v100_v2, %v1265_v24  ;;  %v174_v17 = vsel %vm2148_vm0, %v173_v62, %v1249_v6 }
  0x80   :  { %v1135_v8 = vpop.permute.xlu1 %1134  ;;  %v246_v9 = vsel %vm2148_vm0, %v245_v58, %v204_v35  ;;  %v257_v14 = vrot.slane %v220_v61, 4  ;;  %v1125_v18 = vpop.permute.xlu0 %1124  ;;  %v260_v19 = vsel %vm2148_vm0, %v220_v61, %v259_v0  ;;  %v62_v20 = vsel %vm2148_vm0, %v60_v3, %v1247_v5 }
  0x81   :  { %v64_v21 = vsel %vm2148_vm0, %v1121_v53, %v63_v59  ;;  %v1137_v22 = vunpack.i.h.bf16 %v1135_v8  ;;  %v1306_v15 = vperm.slane %v246_v9, %v1280_v55  ;;  %v134_v23 = vsel %vm2148_vm0, %v133_v7, %v92_v43 }
  0x82   :  { %v1310_v25 = vperm.slane %v136_v10, %v1280_v55  ;;  %v1136_v26 = vunpack.i.l.bf16 %v1135_v8  ;;  %v72_v6 = vperm.slane %v64_v21, %v1265_v24  ;;  %v1127_v28 = vunpack.i.h.bf16 %v1125_v18 }
  0x83   :  { %v187_v27 = vrot.slane %v1137_v22, 4  ;;  %v1126_v29 = vunpack.i.l.bf16 %v1125_v18  ;;  %v1314_v30 = vperm.slane %v260_v19, %v1280_v55  ;;  %v145_v5 = vrot.slane %v108_v16, 4 }
  0x84   :  { %v68_v31 = vperm.slane %v62_v20, %v1265_v24  ;;  %v75_v32 = vrot.slane %v1136_v26, 4  ;;  %v258_v33 = vsel %vm2148_vm0, %v257_v14, %v208_v47  ;;  %v273_v34 = vrot.slane %v1296_v13, 4 }
  0x85   :  { %v185_v35 = vrot.slane %v1127_v28, 4  ;;  %v73_v36 = vrot.slane %v1126_v29, 4  ;;  %v140_v37 = vperm.slane %v134_v23, %v1280_v55  ;;  %v148_v38 = vsel %vm2148_vm0, %v108_v16, %v147_v4 }
  0x86   :  { %v188_v39 = vsel %vm2148_vm0, %v1127_v28, %v187_v27  ;;  %v76_v40 = vsel %vm2148_vm0, %v1126_v29, %v75_v32  ;;  %v123_v41 = vrot.slane %v72_v6, 4  ;;  %v146_v45 = vsel %vm2148_vm0, %v145_v5, %v96_v54 }
  0x87   :  { %v186_v42 = vsel %vm2148_vm0, %v185_v35, %v1137_v22  ;;  %v74_v43 = vsel %vm2148_vm0, %v73_v36, %v1136_v26  ;;  %v84_v44 = vperm.slane %v76_v40, %v1265_v24  ;;  %v111_v46 = vrot.slane %v68_v31, 4 }
  0x88   :  { %v192_v47 = vperm.slane %v186_v42, %v1265_v24  ;;  %v80_v48 = vperm.slane %v74_v43, %v1265_v24  ;;  %v1330_v49 = vperm.slane %v258_v33, %v1280_v55  ;;  %v196_v50 = vperm.slane %v188_v39, %v1265_v24 }
  0x89   :  { %v121_v51 = vrot.slane %v84_v44, 4  ;;  %v124_v52 = vsel %vm2148_vm0, %v84_v44, %v123_v41  ;;  %v156_v53 = vperm.slane %v148_v38, %v1280_v55  ;;  %v152_v58 = vperm.slane %v146_v45, %v1280_v55 }
  0x8a   :  { %v109_v56 = vrot.slane %v80_v48, 4  ;;  %v112_v57 = vsel %vm2148_vm0, %v80_v48, %v111_v46  ;;  %v132_v54 = vperm.slane %v124_v52, %v1280_v55  ;;  %v180_v59 = vperm.slane %v174_v17, %v1265_v24 }
  0x8b   :  { %v120_v60 = vperm.slane %v112_v57, %v1280_v55  ;;  %v122_v61 = vsel %vm2148_vm0, %v121_v51, %v72_v6  ;;  %v269_v62 = vrot.slane %v1306_v15, 4  ;;  %v221_v63 = vrot.slane %v192_v47, 4 }
  0x8c   :  { %v110_v0 = vsel %vm2148_vm0, %v109_v56, %v68_v31  ;;  %v128_v1 = vperm.slane %v122_v61, %v1280_v55  ;;  %v157_v2 = vrot.slane %v140_v37, 4  ;;  %v161_v3 = vrot.slane %v1310_v25, 4 }
  0x8d   :  { %v233_v4 = vrot.slane %v196_v50, 4  ;;  %v116_v7 = vperm.slane %v110_v0, %v1280_v55  ;;  %v235_v8 = vrot.slane %v1291_v11, 4  ;;  %v163_v9 = vrot.slane %v120_v60, 4 }
  0x8e   :  { %v167_v10 = vrot.slane %v128_v1, 4  ;;  %v171_v14 = vrot.slane %v132_v54, 4  ;;  %v165_v16 = vrot.slane %v152_v58, 4  ;;  %v169_v17 = vrot.slane %v156_v53, 4 }
  0x8f   :  { %v223_v18 = vrot.slane %v180_v59, 4  ;;  %v159_v19 = vrot.slane %v116_v7, 4  ;;  %v1348_v20 = vsel %vm2148_vm0, %v157_v2, %v116_v7  ;;  %v1351_v21 = vsel %vm2148_vm0, %v161_v3, %v120_v60 }
  0x90   :  { %v222_v22 = vsel %vm2148_vm0, %v221_v63, %v180_v59  ;;  %v236_v23 = vsel %vm2148_vm0, %v196_v50, %v235_v8  ;;  %v1359_v6 = vsel %vm2148_vm0, %v169_v17, %v132_v54  ;;  %v234_v28 = vsel %vm2148_vm0, %v233_v4, %v1291_v11 }
  0x91   :  { %v1356_v26 = vsel %vm2148_vm0, %v140_v37, %v159_v19  ;;  %v224_v27 = vsel %vm2148_vm0, %v192_v47, %v223_v18  ;;  %v1366_v29 = vsel %vm2148_vm0, %v1310_v25, %v163_v9  ;;  %v1369_v5 = vsel %vm2148_vm0, %v165_v16, %v128_v1 }
  0x92   :  { %v1372_v31 = vsel %vm2148_vm0, %v152_v58, %v167_v10  ;;  %v1375_v32 = vsel %vm2148_vm0, %v156_v53, %v171_v14  ;;  %v228_v33 = vperm.slane %v222_v22, %v1280_v55  ;;  %v286_v35 = vsel %vm2147_vm2, %v1348_v20, 0.0 }
  0x93   :  { %v293_v11 = vsel %vm2147_vm2, %v1356_v26, 0.0  ;;  %v300_v25 = vsel %vm2147_vm2, %v1351_v21, 0.0  ;;  %v232_v36 = vperm.slane %v224_v27, %v1280_v55  ;;  %v240_v37 = vperm.slane %v234_v28, %v1280_v55 }
  0x94   :  { %v287_v38 = vrot.slane %v286_v35, 4  ;;  %v294_v39 = vrot.slane %v293_v11, 4  ;;  %v301_v40 = vrot.slane %v300_v25, 4  ;;  %v307_v41 = vsel %vm2147_vm2, %v1366_v29, 0.0 }
  0x95   :  { %v314_v42 = vsel %vm2147_vm2, %v1369_v5, 0.0  ;;  %v321_v43 = vsel %vm2147_vm2, %v1372_v31, 0.0  ;;  %v308_v46 = vrot.slane %v307_v41, 4  ;;  %v244_v48 = vperm.slane %v236_v23, %v1280_v55 }
  0x96   :  { %v288_v44 = vadd.f32 %v287_v38, %v286_v35  ;;  %v295_v45 = vadd.f32 %v294_v39, %v293_v11  ;;  %v315_v47 = vrot.slane %v314_v42, 4  ;;  %v302_v50 = vadd.f32 %v301_v40, %v300_v25 }
  0x97   :  { %v322_v51 = vrot.slane %v321_v43, 4  ;;  %v328_v52 = vsel %vm2147_vm2, %v1359_v6, 0.0  ;;  %v309_v57 = vadd.f32 %v308_v46, %v307_v41  ;;  %v335_v54 = vsel %vm2147_vm2, %v1375_v32, 0.0 }
  0x98   :  { %v289_v53 = vrot.slane %v288_v44, 2  ;;  %v296_v56 = vrot.slane %v295_v45, 2  ;;  %v271_v58 = vrot.slane %v228_v33, 4  ;;  %v303_v59 = vrot.slane %v302_v50, 2 }
  0x99   :  { %v316_v60 = vadd.f32 %v315_v47, %v314_v42  ;;  %v329_v61 = vrot.slane %v328_v52, 4  ;;  %v277_v63 = vrot.slane %v1330_v49, 4  ;;  %v281_v0 = vrot.slane %v1314_v30, 4 }
  0x9a   :  { %v275_v1 = vrot.slane %v232_v36, 4  ;;  %v279_v2 = vrot.slane %v240_v37, 4  ;;  %v283_v3 = vrot.slane %v244_v48, 4  ;;  %v290_v4 = vadd.f32 %v289_v53, %v288_v44 }
  0x9b   :  { %v323_v7 = vadd.f32 %v322_v51, %v321_v43  ;;  %v336_v8 = vrot.slane %v335_v54, 4  ;;  %v1402_v9 = vsel %vm2148_vm0, %v269_v62, %v228_v33  ;;  %v1407_v10 = vsel %vm2148_vm0, %v273_v34, %v232_v36 }
  0x9c   :  { %v297_v14 = vadd.f32 %v296_v56, %v295_v45  ;;  %v310_v16 = vrot.slane %v309_v57, 2  ;;  %v1411_v17 = vsel %vm2148_vm0, %v1306_v15, %v271_v58  ;;  %v304_v18 = vadd.f32 %v303_v59, %v302_v50 }
  0x9d   :  { %v317_v19 = vrot.slane %v316_v60, 2  ;;  %v330_v22 = vadd.f32 %v329_v61, %v328_v52  ;;  %v1415_v23 = vsel %vm2148_vm0, %v1296_v13, %v275_v1  ;;  %v1418_v62 = vsel %vm2148_vm0, %v277_v63, %v240_v37 }
  0x9e   :  { %v1422_v34 = vsel %vm2148_vm0, %v1330_v49, %v279_v2  ;;  %v1425_v27 = vsel %vm2148_vm0, %v281_v0, %v244_v48  ;;  %v1429_v15 = vsel %vm2148_vm0, %v1314_v30, %v283_v3  ;;  %v291_v28 = vrot.slane %v290_v4, 1 }
  0x9f   :  { %2151 = vst [vmem:[#allocation4_spill] sm:$0xff] %v1425_v27  ;;  %v324_v33 = vrot.slane %v323_v7, 2  ;;  %v337_v35 = vadd.f32 %v336_v8, %v335_v54  ;;  %v298_v11 = vrot.slane %v297_v14, 1  ;;  %v311_v13 = vadd.f32 %v310_v16, %v309_v57 }
  0xa0   :  { %2152 = vst [vmem:[#allocation5_spill] sm:$0xff] %v1429_v15  ;;  %v342_v25 = vsel %vm2147_vm2, %v1402_v9, 0.0  ;;  %v349_v36 = vsel %vm2147_vm2, %v1411_v17, 0.0  ;;  %v305_v49 = vrot.slane %v304_v18, 1  ;;  %v318_v37 = vadd.f32 %v317_v19, %v316_v60 }
  0xa1   :  { %v331_v38 = vrot.slane %v330_v22, 2  ;;  %v343_v39 = vrot.slane %v342_v25, 4  ;;  %v350_v40 = vrot.slane %v349_v36, 4  ;;  %v356_v30 = vsel %vm2147_vm2, %v1407_v10, 0.0 }
  0xa2   :  { %v363_v41 = vsel %vm2147_vm2, %v1415_v23, 0.0  ;;  %v370_v42 = vsel %vm2147_vm2, %v1418_v62, 0.0  ;;  %v325_v43 = vadd.f32 %v324_v33, %v323_v7  ;;  %v338_v44 = vrot.slane %v337_v35, 2 }
  0xa3   :  { %v344_v45 = vadd.f32 %v343_v39, %v342_v25  ;;  %v357_v46 = vrot.slane %v356_v30, 4  ;;  %v351_v47 = vadd.f32 %v350_v40, %v349_v36  ;;  %v364_v48 = vrot.slane %v363_v41, 4 }
  0xa4   :  { %v371_v50 = vrot.slane %v370_v42, 4  ;;  %v377_v51 = vsel %vm2147_vm2, %v1422_v34, 0.0  ;;  %v292_v52 = vadd.f32 %v291_v28, %v290_v4  ;;  %v384_v57 = vsel %vm2147_vm2, %v1425_v27, 0.0 }
  0xa5   :  { %v358_v53 = vadd.f32 %v357_v46, %v356_v30  ;;  %v378_v56 = vrot.slane %v377_v51, 4  ;;  %v332_v54 = vadd.f32 %v331_v38, %v330_v22  ;;  %v365_v58 = vadd.f32 %v364_v48, %v363_v41 }
  0xa6   :  { %v372_v59 = vadd.f32 %v371_v50, %v370_v42  ;;  %v385_v60 = vrot.slane %v384_v57, 4  ;;  %v339_v61 = vadd.f32 %v338_v44, %v337_v35  ;;  %v345_v63 = vrot.slane %v344_v45, 2 }
  0xa7   :  { %v379_v0 = vadd.f32 %v378_v56, %v377_v51  ;;  %v391_v1 = vsel %vm2147_vm2, %v1429_v15, 0.0  ;;  %v312_v2 = vrot.slane %v311_v13, 1  ;;  %v319_v3 = vrot.slane %v318_v37, 1 }
  0xa8   :  { %v352_v7 = vrot.slane %v351_v47, 2  ;;  %v386_v8 = vadd.f32 %v385_v60, %v384_v57  ;;  %v359_v4 = vrot.slane %v358_v53, 2  ;;  %v366_v16 = vrot.slane %v365_v58, 2 }
  0xa9   :  { %v373_v19 = vrot.slane %v372_v59, 2  ;;  %v392_v28 = vrot.slane %v391_v1, 4  ;;  %v326_v33 = vrot.slane %v325_v43, 1  ;;  %v333_v25 = vrot.slane %v332_v54, 1 }
  0xaa   :  { %v380_v22 = vrot.slane %v379_v0, 2  ;;  %v387_v36 = vrot.slane %v386_v8, 2  ;;  %v299_v38 = vadd.f32 %v298_v11, %v297_v14  ;;  %v340_v39 = vrot.slane %v339_v61, 1 }
  0xab   :  { %v346_v35 = vadd.f32 %v345_v63, %v344_v45  ;;  %v393_v40 = vadd.f32 %v392_v28, %v391_v1  ;;  %v306_v30 = vadd.f32 %v305_v49, %v304_v18  ;;  %v313_v41 = vadd.f32 %v312_v2, %v311_v13 }
  0xac   :  { %v320_v42 = vadd.f32 %v319_v3, %v318_v37  ;;  %v353_v44 = vadd.f32 %v352_v7, %v351_v47  ;;  %v360_v46 = vadd.f32 %v359_v4, %v358_v53  ;;  %v367_v48 = vadd.f32 %v366_v16, %v365_v58 }
  0xad   :  { %v374_v50 = vadd.f32 %v373_v19, %v372_v59  ;;  %v394_v51 = vrot.slane %v393_v40, 2  ;;  %v327_v56 = vadd.f32 %v326_v33, %v325_v43  ;;  %v334_v57 = vadd.f32 %v333_v25, %v332_v54 }
  0xae   :  { %v381_v60 = vadd.f32 %v380_v22, %v379_v0  ;;  %v388_v55 = vadd.f32 %v387_v36, %v386_v8  ;;  %v341_v24 = vadd.f32 %v340_v39, %v339_v61  ;;  %v347_v15 = vrot.slane %v346_v35, 1 }
  0xaf   :  { %v395_v27 = vadd.f32 %v394_v51, %v393_v40  ;;  %v405_v14 = vmul.f32 %v1293_v12, %v292_v52  ;;  %v354_v11 = vrot.slane %v353_v44, 1  ;;  %v406_v45 = vmul.f32 %v1293_v12, %v299_v38 }
  0xb0   :  { %v407_v18 = vmul.f32 %v1293_v12, %v306_v30  ;;  %v408_v13 = vmul.f32 %v1293_v12, %v313_v41  ;;  %v361_v49 = vrot.slane %v360_v46, 1  ;;  %v368_v37 = vrot.slane %v367_v48, 1 }
  0xb1   :  { %v375_v47 = vrot.slane %v374_v50, 1  ;;  %v409_v43 = vmul.f32 %v1293_v12, %v320_v42  ;;  %v382_v53 = vrot.slane %v381_v60, 1  ;;  %v389_v54 = vrot.slane %v388_v55, 1 }
  0xb2   :  { %v410_v58 = vmul.f32 %v1293_v12, %v327_v56  ;;  %v411_v59 = vmul.f32 %v1293_v12, %v334_v57  ;;  %v348_v61 = vadd.f32 %v347_v15, %v346_v35  ;;  %v396_v52 = vrot.slane %v395_v27, 1 }
  0xb3   :  { %v412_v63 = vmul.f32 %v1293_v12, %v341_v24  ;;  %v1456_v0 = vsub.f32 %v1348_v20, %v405_v14  ;;  %v355_v1 = vadd.f32 %v354_v11, %v353_v44  ;;  %v1459_v2 = vsub.f32 %v1356_v26, %v406_v45 }
  0xb4   :  { %v1462_v3 = vsub.f32 %v1351_v21, %v407_v18  ;;  %v1465_v7 = vsub.f32 %v1366_v29, %v408_v13  ;;  %v362_v8 = vadd.f32 %v361_v49, %v360_v46  ;;  %v369_v4 = vadd.f32 %v368_v37, %v367_v48 }
  0xb5   :  { %v376_v16 = vadd.f32 %v375_v47, %v374_v50  ;;  %v1468_v15 = vsub.f32 %v1369_v5, %v409_v43  ;;  %v383_v24 = vadd.f32 %v382_v53, %v381_v60  ;;  %v390_v19 = vadd.f32 %v389_v54, %v388_v55 }
  0xb6   :  { %v1471_v20 = vsub.f32 %v1372_v31, %v410_v58  ;;  %v1474_v26 = vsub.f32 %v1359_v6, %v411_v59  ;;  %v397_v28 = vadd.f32 %v396_v52, %v395_v27  ;;  %v413_v21 = vmul.f32 %v1293_v12, %v348_v61 }
  0xb7   :  { %v1478_v29 = vsub.f32 %v1375_v32, %v412_v63  ;;  %v437_v33 = vmul.f32 %v1456_v0, %v1456_v0  ;;  %v414_v5 = vmul.f32 %v1293_v12, %v355_v1  ;;  %v438_v55 = vmul.f32 %v1459_v2, %v1459_v2 }
  0xb8   :  { %v439_v31 = vmul.f32 %v1462_v3, %v1462_v3  ;;  %v440_v6 = vmul.f32 %v1465_v7, %v1465_v7  ;;  %v415_v27 = vmul.f32 %v1293_v12, %v362_v8  ;;  %v416_v25 = vmul.f32 %v1293_v12, %v369_v4 }
  0xb9   :  { %v417_v32 = vmul.f32 %v1293_v12, %v376_v16  ;;  %v441_v22 = vmul.f32 %v1468_v15, %v1468_v15  ;;  %v418_v36 = vmul.f32 %v1293_v12, %v383_v24  ;;  %v419_v38 = vmul.f32 %v1293_v12, %v390_v19  ;;  %v2153_v16 = vld [vmem:[#allocation4_spill] sm:$0xff] }
  0xba   :  { %v442_v39 = vmul.f32 %v1471_v20, %v1471_v20  ;;  %v443_v35 = vmul.f32 %v1474_v26, %v1474_v26  ;;  %v420_v40 = vmul.f32 %v1293_v12, %v397_v28  ;;  %v1502_v30 = vsub.f32 %v1402_v9, %v413_v21 }
  0xbb   :  { %v444_v41 = vmul.f32 %v1478_v29, %v1478_v29  ;;  %v453_v42 = vsel %vm2147_vm2, %v437_v33, 0.0  ;;  %v460_v46 = vsel %vm2147_vm2, %v438_v55, 0.0  ;;  %v467_v48 = vsel %vm2147_vm2, %v439_v31, 0.0 }
  0xbc   :  { %v454_v44 = vrot.slane %v453_v42, 4  ;;  %v474_v50 = vsel %vm2147_vm2, %v440_v6, 0.0  ;;  %v461_v51 = vrot.slane %v460_v46, 4  ;;  %v468_v56 = vrot.slane %v467_v48, 4 }
  0xbd   :  { %v475_v57 = vrot.slane %v474_v50, 4  ;;  %v481_v60 = vsel %vm2147_vm2, %v441_v22, 0.0  ;;  %v488_v11 = vsel %vm2147_vm2, %v442_v39, 0.0  ;;  %v495_v45 = vsel %vm2147_vm2, %v443_v35, 0.0 }
  0xbe   :  { %v455_v14 = vadd.f32 %v454_v44, %v453_v42  ;;  %v482_v9 = vrot.slane %v481_v60, 4  ;;  %v462_v18 = vadd.f32 %v461_v51, %v460_v46  ;;  %v469_v13 = vadd.f32 %v468_v56, %v467_v48 }
  0xbf   :  { %v476_v49 = vadd.f32 %v475_v57, %v474_v50  ;;  %v489_v37 = vrot.slane %v488_v11, 4  ;;  %v1514_v47 = vsub.f32 %v1411_v17, %v414_v5  ;;  %v496_v54 = vrot.slane %v495_v45, 4 }
  0xc0   :  { %v456_v43 = vrot.slane %v455_v14, 2  ;;  %v483_v53 = vadd.f32 %v482_v9, %v481_v60  ;;  %v1517_v58 = vsub.f32 %v1407_v10, %v415_v27  ;;  %v470_v59 = vrot.slane %v469_v13, 2  ;;  %v2154_v10 = vld [vmem:[#allocation5_spill] sm:$0xff] }
  0xc1   :  { %v477_v61 = vrot.slane %v476_v49, 2  ;;  %v502_v52 = vsel %vm2147_vm2, %v444_v41, 0.0  ;;  %v1521_v63 = vsub.f32 %v1415_v23, %v416_v25  ;;  %v1524_v1 = vsub.f32 %v1418_v62, %v417_v32 }
  0xc2   :  { %v457_v8 = vadd.f32 %v456_v43, %v455_v14  ;;  %v490_v4 = vadd.f32 %v489_v37, %v488_v11  ;;  %v1527_v17 = vsub.f32 %v1422_v34, %v418_v36  ;;  %v1530_v24 = vsub.f32 %v2153_v16, %v419_v38 }
  0xc3   :  { %v1533_v19 = vsub.f32 %v2154_v10, %v420_v40  ;;  %v463_v28 = vrot.slane %v462_v18, 2  ;;  %v445_v21 = vmul.f32 %v1502_v30, %v1502_v30  ;;  %v484_v23 = vrot.slane %v483_v53, 2 }
  0xc4   :  { %v497_v33 = vadd.f32 %v496_v54, %v495_v45  ;;  %v503_v5 = vrot.slane %v502_v52, 4  ;;  %v446_v62 = vmul.f32 %v1514_v47, %v1514_v47  ;;  %v447_v34 = vmul.f32 %v1517_v58, %v1517_v58 }
  0xc5   :  { %v471_v55 = vadd.f32 %v470_v59, %v469_v13  ;;  %v478_v31 = vadd.f32 %v477_v61, %v476_v49  ;;  %v448_v6 = vmul.f32 %v1521_v63, %v1521_v63  ;;  %v449_v27 = vmul.f32 %v1524_v1, %v1524_v1 }
  0xc6   :  { %v458_v25 = vrot.slane %v457_v8, 1  ;;  %v491_v32 = vrot.slane %v490_v4, 2  ;;  %v450_v22 = vmul.f32 %v1527_v17, %v1527_v17  ;;  %v451_v36 = vmul.f32 %v1530_v24, %v1530_v24 }
  0xc7   :  { %v452_v38 = vmul.f32 %v1533_v19, %v1533_v19  ;;  %v1551_v39 = vadd.f32 %v463_v28, %v462_v18  ;;  %v485_v35 = vadd.f32 %v484_v23, %v483_v53  ;;  %v498_v40 = vrot.slane %v497_v33, 2 }
  0xc8   :  { %v504_v41 = vadd.f32 %v503_v5, %v502_v52  ;;  %v509_v42 = vsel %vm2147_vm2, %v445_v21, 0.0  ;;  %v472_v44 = vrot.slane %v471_v55, 1  ;;  %v479_v46 = vrot.slane %v478_v31, 1 }
  0xc9   :  { %v510_v48 = vrot.slane %v509_v42, 4  ;;  %v523_v50 = vsel %vm2147_vm2, %v447_v34, 0.0  ;;  %v459_v51 = vadd.f32 %v458_v25, %v457_v8  ;;  %v492_v56 = vadd.f32 %v491_v32, %v490_v4 }
  0xca   :  { %v516_v57 = vsel %vm2147_vm2, %v446_v62, 0.0  ;;  %v524_v60 = vrot.slane %v523_v50, 4  ;;  %v530_v9 = vsel %vm2147_vm2, %v448_v6, 0.0  ;;  %v537_v11 = vsel %vm2147_vm2, %v449_v27, 0.0 }
  0xcb   :  { %v511_v14 = vadd.f32 %v510_v48, %v509_v42  ;;  %v544_v45 = vsel %vm2147_vm2, %v450_v22, 0.0  ;;  %v499_v18 = vadd.f32 %v498_v40, %v497_v33  ;;  %v505_v13 = vrot.slane %v504_v41, 2 }
  0xcc   :  { %v525_v49 = vadd.f32 %v524_v60, %v523_v50  ;;  %v531_v37 = vrot.slane %v530_v9, 4  ;;  %v538_v53 = vrot.slane %v537_v11, 4  ;;  %v545_v54 = vrot.slane %v544_v45, 4 }
  0xcd   :  { %v512_v43 = vrot.slane %v511_v14, 2  ;;  %v551_v59 = vsel %vm2147_vm2, %v451_v36, 0.0  ;;  %v517_v61 = vrot.slane %v516_v57, 4  ;;  %v486_v16 = vrot.slane %v485_v35, 1 }
  0xce   :  { %v526_v52 = vrot.slane %v525_v49, 2  ;;  %v532_v8 = vadd.f32 %v531_v37, %v530_v9  ;;  %v552_v4 = vrot.slane %v551_v59, 4  ;;  %v539_v10 = vadd.f32 %v538_v53, %v537_v11 }
  0xcf   :  { %v546_v28 = vadd.f32 %v545_v54, %v544_v45  ;;  %v558_v21 = vsel %vm2147_vm2, %v452_v38, 0.0  ;;  %v493_v23 = vrot.slane %v492_v56, 1  ;;  %v506_v5 = vadd.f32 %v505_v13, %v504_v41 }
  0xd0   :  { %v533_v33 = vrot.slane %v532_v8, 2  ;;  %v553_v62 = vadd.f32 %v552_v4, %v551_v59  ;;  %v513_v34 = vadd.f32 %v512_v43, %v511_v14  ;;  %v540_v6 = vrot.slane %v539_v10, 2 }
  0xd1   :  { %v547_v27 = vrot.slane %v546_v28, 2  ;;  %v559_v25 = vrot.slane %v558_v21, 4  ;;  %v500_v32 = vrot.slane %v499_v18, 1  ;;  %v518_v22 = vadd.f32 %v517_v61, %v516_v57 }
  0xd2   :  { %v527_v36 = vadd.f32 %v526_v52, %v525_v49  ;;  %v554_v40 = vrot.slane %v553_v62, 2  ;;  %v473_v42 = vadd.f32 %v472_v44, %v471_v55  ;;  %v534_v48 = vadd.f32 %v533_v33, %v532_v8 }
  0xd3   :  { %v541_v50 = vadd.f32 %v540_v6, %v539_v10  ;;  %v560_v60 = vadd.f32 %v559_v25, %v558_v21  ;;  %v480_v9 = vadd.f32 %v479_v46, %v478_v31  ;;  %v487_v11 = vadd.f32 %v486_v16, %v485_v35 }
  0xd4   :  { %v507_v45 = vrot.slane %v506_v5, 1  ;;  %v548_v38 = vadd.f32 %v547_v27, %v546_v28  ;;  %v494_v37 = vadd.f32 %v493_v23, %v492_v56  ;;  %v514_v41 = vrot.slane %v513_v34, 1 }
  0xd5   :  { %v555_v13 = vadd.f32 %v554_v40, %v553_v62  ;;  %v561_v53 = vrot.slane %v560_v60, 2  ;;  %v501_v14 = vadd.f32 %v500_v32, %v499_v18  ;;  %v519_v43 = vrot.slane %v518_v22, 2 }
  0xd6   :  { %v528_v54 = vrot.slane %v527_v36, 1  ;;  %v565_v59 = vmul.f32 %v459_v51, %v1293_v12  ;;  %v535_v57 = vrot.slane %v534_v48, 1  ;;  %v542_v49 = vrot.slane %v541_v50, 1 }
  0xd7   :  { %v562_v61 = vadd.f32 %v561_v53, %v560_v60  ;;  %v567_v55 = vmul.f32 %v473_v42, %v1293_v12  ;;  %v465_v44 = vrot.slane %v1551_v39, 1  ;;  %v508_v31 = vadd.f32 %v507_v45, %v506_v5 }
  0xd8   :  { %v549_v35 = vrot.slane %v548_v38, 1  ;;  %v568_v46 = vmul.f32 %v480_v9, %v1293_v12  ;;  %v515_v56 = vadd.f32 %v514_v41, %v513_v34  ;;  %v556_v52 = vrot.slane %v555_v13, 1 }
  0xd9   :  { %v563_v8 = vrot.slane %v562_v61, 1  ;;  %v569_v18 = vmul.f32 %v487_v11, %v1293_v12  ;;  %v520_v4 = vadd.f32 %v519_v43, %v518_v22  ;;  %v529_v16 = vadd.f32 %v528_v54, %v527_v36 }
  0xda   :  { %v570_v51 = vmul.f32 %v494_v37, %v1293_v12  ;;  %v1567_v10 = vadd.f32 1e-05, %v565_v59  ;;  %v536_v28 = vadd.f32 %v535_v57, %v534_v48  ;;  %v543_v21 = vadd.f32 %v542_v49, %v541_v50 }
  0xdb   :  { %v571_v23 = vmul.f32 %v501_v14, %v1293_v12  ;;  %v1570_v33 = vadd.f32 1e-05, %v567_v55  ;;  %v550_v5 = vadd.f32 %v549_v35, %v548_v38  ;;  %v572_v62 = vmul.f32 %v508_v31, %v1293_v12 }
  0xdc   :  { %v1573_v34 = vadd.f32 1e-05, %v568_v46  ;;  %1182 = vrsqrt.f32 %v1567_v10  ;;  %v557_v6 = vadd.f32 %v556_v52, %v555_v13  ;;  %v564_v27 = vadd.f32 %v563_v8, %v562_v61 }
  0xdd   :  { %v573_v25 = vmul.f32 %v515_v56, %v1293_v12  ;;  %v1577_v32 = vadd.f32 1e-05, %v569_v18  ;;  %v466_v22 = vadd.f32 %v465_v44, %v1551_v39  ;;  %v521_v36 = vrot.slane %v520_v4, 1 }
  0xde   :  { %v1580_v40 = vadd.f32 1e-05, %v570_v51  ;;  %v575_v42 = vmul.f32 %v529_v16, %v1293_v12  ;;  %v576_v48 = vmul.f32 %v536_v28, %v1293_v12  ;;  %v1584_v50 = vadd.f32 1e-05, %v571_v23 }
  0xdf   :  { %1184 = vrsqrt.f32 %v1570_v33  ;;  %v577_v60 = vmul.f32 %v543_v21, %v1293_v12  ;;  %v578_v9 = vmul.f32 %v550_v5, %v1293_v12  ;;  %v1589_v11 = vadd.f32 1e-05, %v572_v62 }
  0xe0   :  { %1186 = vrsqrt.f32 %v1573_v34  ;;  %v579_v39 = vmul.f32 %v557_v6, %v1293_v12  ;;  %v580_v45 = vmul.f32 %v564_v27, %v1293_v12  ;;  %v1594_v38 = vadd.f32 1e-05, %v573_v25 }
  0xe1   :  { %1188 = vrsqrt.f32 %v1577_v32  ;;  %v522_v41 = vadd.f32 %v521_v36, %v520_v4  ;;  %v1600_v13 = vadd.f32 1e-05, %v575_v42  ;;  %v1602_v53 = vadd.f32 1e-05, %v576_v48 }
  0xe2   :  { %v1597_v37 = vpop.eup %1182  ;;  %1190 = vrsqrt.f32 %v1580_v40  ;;  %v1607_v43 = vadd.f32 1e-05, %v577_v60  ;;  %v1609_v54 = vadd.f32 1e-05, %v578_v9  ;;  %v566_v59 = vmul.f32 %v466_v22, %v1293_v12 }
  0xe3   :  { %v598_v14 = vmul.f32 %v1597_v37, %v1567_v10  ;;  %1192 = vrsqrt.f32 %v1584_v50  ;;  %v1615_v49 = vadd.f32 1e-05, %v579_v39  ;;  %v1617_v61 = vadd.f32 1e-05, %v580_v45 }
  0xe4   :  { %1194 = vrsqrt.f32 %v1589_v11  ;;  %vm603_vm3 = vweird.f32 %v1567_v10  ;;  %vm604_vm4 = vweird.f32 %v1597_v37  ;;  %v1629_v35 = vmul.f32 %v522_v41, %v1293_v12 }
  0xe5   :  { %v1613_v57 = vpop.eup %1184  ;;  %v599_v55 = vmul.f32 %v1597_v37, %v598_v14  ;;  %1196 = vrsqrt.f32 %v1594_v38  ;;  %vm623_vm6 = vweird.f32 %v1570_v33  ;;  %v1637_v8 = vadd.f32 1e-05, %v566_v59  ;;  %vm1686_vm1 = vmor %vm603_vm3, %vm604_vm4 }
  0xe6   :  { %v1621_v44 = vpop.eup %1186  ;;  %v618_v31 = vmul.f32 %v1613_v57, %v1570_v33  ;;  %vm624_vm5 = vweird.f32 %v1613_v57  ;;  %1198 = vrsqrt.f32 %v1600_v13  ;;  %vm633_vm7 = vweird.f32 %v1573_v34 }
  0xe7   :  { %v1631_v46 = vpop.eup %1188  ;;  %v600_v56 = vmul.f32 0.5, %v599_v55  ;;  %v628_v52 = vmul.f32 %v1621_v44, %v1573_v34  ;;  %vm634_vm8 = vweird.f32 %v1621_v44  ;;  %1200 = vrsqrt.f32 %v1602_v53  ;;  %vm1703_vm3 = vmor %vm623_vm6, %vm624_vm5 }
  0xe8   :  { %v1639_v18 = vpop.eup %1190  ;;  %v619_v4 = vmul.f32 %v1613_v57, %v618_v31  ;;  %v638_v12 = vmul.f32 %v1631_v46, %v1577_v32  ;;  %vm643_vm9 = vweird.f32 %v1577_v32  ;;  %vm644_vm10 = vweird.f32 %v1631_v46  ;;  %vm1713_vm4 = vmor %vm633_vm7, %vm634_vm8 }
  0xe9   :  { %v1647_v16 = vpop.eup %1192  ;;  %v601_v51 = vsub.f32 1.5, %v600_v56  ;;  %v629_v28 = vmul.f32 %v1621_v44, %v628_v52  ;;  %v648_v21 = vmul.f32 %v1639_v18, %v1580_v40  ;;  %vm653_vm11 = vweird.f32 %v1580_v40  ;;  %vm1732_vm7 = vmor %vm643_vm9, %vm644_vm10 }
  0xea   :  { %v1654_v23 = vpop.eup %1194  ;;  %v620_v5 = vmul.f32 0.5, %v619_v4  ;;  %v639_v62 = vmul.f32 %v1631_v46, %v638_v12  ;;  %v658_v6 = vmul.f32 %v1647_v16, %v1584_v50  ;;  %1202 = vrsqrt.f32 %v1607_v43 }
  0xeb   :  { %v1661_v27 = vpop.eup %1196  ;;  %v630_v25 = vmul.f32 0.5, %v629_v28  ;;  %v649_v22 = vmul.f32 %v1639_v18, %v648_v21  ;;  %vm654_vm12 = vweird.f32 %v1639_v18  ;;  %vm663_vm13 = vweird.f32 %v1584_v50 }
  0xec   :  { %v668_v36 = vmul.f32 %v1654_v23, %v1589_v11  ;;  %v1669_v42 = vmul.f32 %v1597_v37, %v601_v51  ;;  %v621_v48 = vsub.f32 1.5, %v620_v5  ;;  %v640_v60 = vmul.f32 0.5, %v639_v62  ;;  %v1673_v39 = vpop.eup %1198  ;;  %vm1744_vm8 = vmor %vm653_vm11, %vm654_vm12 }
  0xed   :  { %v659_v9 = vmul.f32 %v1647_v16, %v658_v6  ;;  %vm673_vm14 = vweird.f32 %v1589_v11  ;;  %v631_v45 = vsub.f32 1.5, %v630_v25  ;;  %v650_v41 = vmul.f32 0.5, %v649_v22  ;;  %v1677_v59 = vpop.eup %1200 }
  0xee   :  { %vm664_vm15 = vweird.f32 %v1647_v16  ;;  %v669_v14 = vmul.f32 %v1654_v23, %v668_v36  ;;  %v622_v55 = vmul.f32 %v1613_v57, %v621_v48  ;;  %v641_v31 = vsub.f32 1.5, %v640_v60 }
  0xef   :  { %v660_v56 = vmul.f32 0.5, %v659_v9  ;;  %v678_v52 = vmul.f32 %v1661_v27, %v1594_v38  ;;  %v632_v12 = vmul.f32 %v1621_v44, %v631_v45  ;;  %v651_v51 = vsub.f32 1.5, %v650_v41  ;;  %vm1760_vm10 = vmor %vm663_vm13, %vm664_vm15 }
  0xf0   :  { %v670_v28 = vmul.f32 0.5, %v669_v14  ;;  %vm674_vm2 = vweird.f32 %v1654_v23  ;;  %vm683_vm0 = vweird.f32 %v1594_v38  ;;  %v1693_v21 = vpop.eup %1202  ;;  %v606_v5 = vsel %vm1686_vm1, %v1597_v37, %v1669_v42 }
  0xf1   :  { %v642_v62 = vmul.f32 %v1631_v46, %v641_v31  ;;  %v661_v6 = vsub.f32 1.5, %v660_v56  ;;  %v679_v25 = vmul.f32 %v1661_v27, %v678_v52  ;;  %v652_v37 = vmul.f32 %v1639_v18, %v651_v51  ;;  %vm1775_vm13 = vmor %vm673_vm14, %vm674_vm2 }
  0xf2   :  { %v671_v33 = vsub.f32 1.5, %v670_v28  ;;  %vm684_vm5 = vweird.f32 %v1661_v27  ;;  %v698_v36 = vmul.f32 %v1673_v39, %v1600_v13  ;;  %vm703_vm6 = vweird.f32 %v1600_v13 }
  0xf3   :  { %v626_v42 = vsel %vm1703_vm3, %v1613_v57, %v622_v55  ;;  %v636_v34 = vsel %vm1713_vm4, %v1621_v44, %v632_v12  ;;  %v662_v60 = vmul.f32 %v1647_v16, %v661_v6  ;;  %v680_v9 = vmul.f32 0.5, %v679_v25  ;;  %vm1793_vm14 = vmor %vm683_vm0, %vm684_vm5 }
  0xf4   :  { %v646_v45 = vsel %vm1732_vm7, %v1631_v46, %v642_v62  ;;  %v672_v32 = vmul.f32 %v1654_v23, %v671_v33  ;;  %v699_v44 = vmul.f32 %v1673_v39, %v698_v36  ;;  %v708_v41 = vmul.f32 %v1677_v59, %v1602_v53 }
  0xf5   :  { %vm713_vm9 = vweird.f32 %v1602_v53  ;;  %v656_v46 = vsel %vm1744_vm8, %v1639_v18, %v652_v37  ;;  %v681_v14 = vsub.f32 1.5, %v680_v9  ;;  %vm704_vm11 = vweird.f32 %v1673_v39 }
  0xf6   :  { %v718_v55 = vmul.f32 %v1693_v21, %v1607_v43  ;;  %vm723_vm12 = vweird.f32 %v1607_v43  ;;  %v666_v18 = vsel %vm1760_vm10, %v1647_v16, %v662_v60  ;;  %v700_v31 = vmul.f32 0.5, %v699_v44  ;;  %vm705_vm0 = vmor %vm703_vm6, %vm704_vm11 }
  0xf7   :  { %v709_v56 = vmul.f32 %v1677_v59, %v708_v41  ;;  %vm714_vm15 = vweird.f32 %v1677_v59  ;;  %v676_v52 = vsel %vm1775_vm13, %v1654_v23, %v672_v32  ;;  %v682_v4 = vmul.f32 %v1661_v27, %v681_v14 }
  0xf8   :  { %v719_v16 = vmul.f32 %v1693_v21, %v718_v55  ;;  %1204 = vrsqrt.f32 %v1609_v54  ;;  %v701_v11 = vsub.f32 1.5, %v700_v31  ;;  %vm724_vm2 = vweird.f32 %v1693_v21  ;;  %vm1824_vm1 = vmor %vm713_vm9, %vm714_vm15 }
  0xf9   :  { %v710_v12 = vmul.f32 0.5, %v709_v56  ;;  %1206 = vrsqrt.f32 %v1615_v49  ;;  %v757_v28 = vmul.f32 %v606_v5, %v1456_v0  ;;  %v759_v10 = vmul.f32 %v626_v42, %v1462_v3  ;;  %vm1843_vm3 = vmor %vm723_vm12, %vm724_vm2 }
  0xfa   :  { %v720_v23 = vmul.f32 0.5, %v719_v16  ;;  %1208 = vrsqrt.f32 %v1617_v61  ;;  %v686_v62 = vsel %vm1793_vm14, %v1661_v27, %v682_v4  ;;  %v702_v6 = vmul.f32 %v1673_v39, %v701_v11  ;;  %v1875_v4 = vpop.permute.xlu1 %798 }
  0xfb   :  { %v711_v25 = vsub.f32 1.5, %v710_v12  ;;  %v760_v38 = vmul.f32 %v636_v34, %v1465_v7  ;;  %v761_v37 = vmul.f32 %v646_v45, %v1468_v15  ;;  %v762_v0 = vmul.f32 %v656_v46, %v1471_v20 }
  0xfc   :  { %v721_v22 = vsub.f32 1.5, %v720_v23  ;;  %v763_v3 = vmul.f32 %v666_v18, %v1474_v26  ;;  %v706_v5 = vsel %vm705_vm0, %v1673_v39, %v702_v6  ;;  %v1815_v33 = vadd.f32 1e-05, %v1629_v35  ;;  %v1832_v39 = vpop.permute.xlu0 %776 }
  0xfd   :  { %v712_v27 = vmul.f32 %v1677_v59, %v711_v25  ;;  %1210 = vrsqrt.f32 %v1637_v8  ;;  %v764_v26 = vmul.f32 %v676_v52, %v1478_v29  ;;  %v765_v13 = vmul.f32 %v686_v62, %v1502_v30 }
  0xfe   :  { %v1818_v7 = vpop.eup %1204  ;;  %v722_v20 = vmul.f32 %v1693_v21, %v721_v22  ;;  %v767_v35 = vmul.f32 %v706_v5, %v1517_v58  ;;  %vm733_vm4 = vweird.f32 %v1609_v54  ;;  %1212 = vrsqrt.f32 %v1815_v33 }
  0xff   :  { %v1834_v36 = vpop.eup %1206  ;;  %v716_v53 = vsel %vm1824_vm1, %v1677_v59, %v712_v27  ;;  %v728_v29 = vmul.f32 %v1818_v7, %v1609_v54  ;;  %v779_v30 = vmul.f32 %v1832_v39, %v757_v28  ;;  %vm734_vm5 = vweird.f32 %v1818_v7 }
 0x100   :  { %v1209_v58 = vpop.eup %1208  ;;  %v726_v59 = vsel %vm1843_vm3, %v1693_v21, %v722_v20  ;;  %v738_v43 = vmul.f32 %v1834_v36, %v1615_v49  ;;  %vm743_vm6 = vweird.f32 %v1615_v49  ;;  %vm744_vm7 = vweird.f32 %v1834_v36  ;;  %vm735_vm15 = vmor %vm733_vm4, %vm734_vm5 }
 0x101   :  { %v729_v34 = vmul.f32 %v1818_v7, %v728_v29  ;;  %v748_v48 = vmul.f32 %v1209_v58, %v1617_v61  ;;  %vm753_vm8 = vweird.f32 %v1617_v61  ;;  %vm754_vm9 = vweird.f32 %v1209_v58  ;;  %vm745_vm2 = vmor %vm743_vm6, %vm744_vm7 }
 0x102   :  { %v768_v60 = vmul.f32 %v716_v53, %v1521_v63  ;;  %v739_v21 = vmul.f32 %v1834_v36, %v738_v43  ;;  %v769_v9 = vmul.f32 %v726_v59, %v1524_v1  ;;  %v781_v45 = vmul.f32 %v1832_v39, %v759_v10  ;;  %vm755_vm14 = vmor %vm753_vm8, %vm754_vm9 }
 0x103   :  { %v782_v57 = vmul.f32 %v1832_v39, %v760_v38  ;;  %v1211_v32 = vpop.eup %1210  ;;  %v730_v44 = vmul.f32 0.5, %v729_v34  ;;  %v749_v41 = vmul.f32 %v1209_v58, %v748_v48  ;;  %v783_v46 = vmul.f32 %v1832_v39, %v761_v37 }
 0x104   :  { %v784_v40 = vmul.f32 %v1832_v39, %v762_v0  ;;  %v740_v14 = vmul.f32 0.5, %v739_v21  ;;  %v608_v55 = vmul.f32 %v1211_v32, %v1637_v8  ;;  %vm613_vm10 = vweird.f32 %v1637_v8  ;;  %v1213_v1 = vpop.eup %1212 }
 0x105   :  { %vm614_vm11 = vweird.f32 %v1211_v32  ;;  %v785_v63 = vmul.f32 %v1832_v39, %v763_v3  ;;  %v731_v18 = vsub.f32 1.5, %v730_v44  ;;  %v750_v50 = vmul.f32 0.5, %v749_v41 }
 0x106   :  { %v786_v31 = vmul.f32 %v1832_v39, %v764_v26  ;;  %v787_v56 = vmul.f32 %v1832_v39, %v765_v13  ;;  %v741_v52 = vsub.f32 1.5, %v740_v14  ;;  %v609_v16 = vmul.f32 %v1211_v32, %v608_v55  ;;  %vm615_vm0 = vmor %vm613_vm10, %vm614_vm11  ;;  %v2176_v55 = vld [vmem:[#allocation2_spill] sm:$0xff] }
 0x107   :  { %v688_v11 = vmul.f32 %v1213_v1, %v1815_v33  ;;  %vm693_vm12 = vweird.f32 %v1815_v33  ;;  %vm694_vm13 = vweird.f32 %v1213_v1  ;;  %v732_v12 = vmul.f32 %v1818_v7, %v731_v18 }
 0x108   :  { %v751_v51 = vsub.f32 1.5, %v750_v50  ;;  %v789_v23 = vmul.f32 %v1832_v39, %v767_v35  ;;  %v790_v28 = vmul.f32 %v1832_v39, %v768_v60  ;;  %v742_v10 = vmul.f32 %v1834_v36, %v741_v52  ;;  %vm695_vm1 = vmor %vm693_vm12, %vm694_vm13 }
 0x109   :  { %v610_v62 = vmul.f32 0.5, %v609_v16  ;;  %v689_v6 = vmul.f32 %v1213_v1, %v688_v11  ;;  %v791_v25 = vmul.f32 %v1832_v39, %v769_v9  ;;  %v736_v38 = vsel %vm735_vm15, %v1818_v7, %v732_v12 }
 0x10a   :  { %v752_v22 = vmul.f32 %v1209_v58, %v751_v51  ;;  %v1894_v37 = vadd.f32 %v1875_v4, %v779_v30  ;;  %v1897_v54 = vadd.f32 %v1875_v4, %v781_v45  ;;  %v746_v0 = vsel %vm745_vm2, %v1834_v36, %v742_v10 }
 0x10b   :  { %v770_v3 = vmul.f32 %v736_v38, %v1527_v17  ;;  %v611_v5 = vsub.f32 1.5, %v610_v62  ;;  %v690_v27 = vmul.f32 0.5, %v689_v6  ;;  %v771_v49 = vmul.f32 %v746_v0, %v1530_v24 }
 0x10c   :  { %v756_v7 = vsel %vm755_vm14, %v1209_v58, %v752_v22  ;;  %v1906_v15 = vadd.f32 %v1875_v4, %v782_v57  ;;  %v1909_v20 = vadd.f32 %v1875_v4, %v783_v46  ;;  %v1918_v24 = vadd.f32 %v1875_v4, %v784_v40  ;;  %v2184_v22 = vld [vmem:[#allocation3_spill] sm:$0xff] }
 0x10d   :  { %v772_v26 = vmul.f32 %v756_v7, %v1533_v19  ;;  %v612_v13 = vmul.f32 %v1211_v32, %v611_v5  ;;  %v691_v35 = vsub.f32 1.5, %v690_v27  ;;  %v792_v61 = vmul.f32 %v1832_v39, %v770_v3 }
 0x10e   :  { %v793_v17 = vmul.f32 %v1832_v39, %v771_v49  ;;  %v1921_v36 = vadd.f32 %v1875_v4, %v785_v63  ;;  %v1924_v53 = vadd.f32 %v1875_v4, %v786_v31  ;;  %v1928_v30 = vadd.f32 %v1875_v4, %v787_v56 }
 0x10f   :  { %v616_v19 = vsel %vm615_vm0, %v1211_v32, %v612_v13  ;;  %v692_v42 = vmul.f32 %v1213_v1, %v691_v35  ;;  %v794_v29 = vmul.f32 %v1832_v39, %v772_v26  ;;  %v1935_v58 = vadd.f32 %v1875_v4, %v789_v23 }
 0x110   :  { %v758_v8 = vmul.f32 %v616_v19, %v1459_v2  ;;  %v1938_v59 = vadd.f32 %v1875_v4, %v790_v28  ;;  %v1941_v43 = vadd.f32 %v1875_v4, %v791_v25  ;;  %v1944_v48 = vadd.f32 %v1875_v4, %v792_v61 }
 0x111   :  { %v696_v34 = vsel %vm695_vm1, %v1213_v1, %v692_v42  ;;  %v1947_v60 = vadd.f32 %v1875_v4, %v793_v17  ;;  %v1950_v33 = vadd.f32 %v1875_v4, %v794_v29  ;;  %v817_v9 = vrot.slane %v1897_v54, 4 }
 0x112   :  { %v766_v2 = vmul.f32 %v696_v34, %v1514_v47  ;;  %v780_v21 = vmul.f32 %v1832_v39, %v758_v8  ;;  %v829_v45 = vrot.slane %v1906_v15, 4  ;;  %v841_v57 = vrot.slane %v1921_v36, 4 }
 0x113   :  { %v853_v32 = vrot.slane %v1924_v53, 4  ;;  %v929_v44 = vrot.slane %v1935_v58, 4  ;;  %v941_v41 = vrot.slane %v1938_v59, 4  ;;  %vm2175_vm3 = vcmask 1047556  }
 0x114   :  { %v788_v46 = vmul.f32 %v1832_v39, %v766_v2  ;;  %v802_v40 = vadd.f32 %v1875_v4, %v780_v21  ;;  %v818_v47 = vsel %vm2175_vm3, %v817_v9, %v1894_v37  ;;  %v953_v14 = vrot.slane %v1947_v60, 4  ;;  %vm2177_vm4 = vmmov %vm2175_vm3 }
 0x115   :  { %v1966_v63 = vperm.slane %v818_v47, %v2176_v55  ;;  %v842_v1 = vsel %vm2177_vm4, %v841_v57, %v1909_v20  ;;  %vm2178_vm5 = vmmov %vm2175_vm3  ;;  %v965_v10 = vrot.slane %v1950_v33, 4  ;;  %v819_v38 = vrot.slane %v1894_v37, 4 }
 0x116   :  { %v854_v18 = vsel %vm2178_vm5, %v853_v32, %v1918_v24  ;;  %vm2179_vm6 = vmmov %vm2175_vm3  ;;  %v810_v39 = vadd.f32 %v1875_v4, %v788_v46  ;;  %v1977_v56 = vperm.slane %v842_v1, %v2176_v55  ;;  %v831_v61 = vrot.slane %v802_v40, 4 }
 0x117   :  { %v930_v50 = vsel %vm2179_vm6, %v929_v44, %v1928_v30  ;;  %vm2180_vm7 = vmmov %vm2175_vm3  ;;  %v1980_v52 = vperm.slane %v854_v18, %v2176_v55  ;;  %v867_v11 = vrot.slane %v1966_v63, 4  ;;  %v843_v17 = vrot.slane %v1909_v20, 4 }
 0x118   :  { %v830_v31 = vsel %vm2180_vm7, %v829_v45, %v802_v40  ;;  %v1987_v12 = vperm.slane %v930_v50, %v2176_v55  ;;  %vm2181_vm8 = vmmov %vm2175_vm3  ;;  %v891_v4 = vrot.slane %v1977_v56, 4  ;;  %v855_v29 = vrot.slane %v1918_v24, 4 }
 0x119   :  { %v1983_v16 = vperm.slane %v830_v31, %v2176_v55  ;;  %v954_v51 = vsel %vm2181_vm8, %v953_v14, %v1941_v43  ;;  %vm2182_vm9 = vmmov %vm2175_vm3  ;;  %v931_v8 = vrot.slane %v1928_v30, 4  ;;  %v943_v32 = vrot.slane %v810_v39, 4 }
 0x11a   :  { %v942_v23 = vsel %vm2182_vm9, %v941_v41, %v810_v39  ;;  %v1994_v28 = vperm.slane %v954_v51, %v2176_v55  ;;  %vm2183_vm10 = vmmov %vm2175_vm3  ;;  %v979_v25 = vrot.slane %v1987_v12, 4  ;;  %v955_v46 = vrot.slane %v1941_v43, 4 }
 0x11b   :  { %v868_v62 = vsel %vm2183_vm10, %v1983_v16, %v867_v11  ;;  %v2000_v6 = vperm.slane %v942_v23, %v2176_v55  ;;  %vm2185_vm11 = vmmov %vm2175_vm3  ;;  %v967_v14 = vrot.slane %v1944_v48, 4 }
 0x11c   :  { %v2005_v0 = vperm.slane %v868_v62, %v2184_v22  ;;  %v892_v3 = vsel %vm2185_vm11, %v1980_v52, %v891_v4  ;;  %vm2186_vm12 = vmmov %vm2175_vm3  ;;  %v1003_v27 = vrot.slane %v1994_v28, 4  ;;  %v865_v62 = vrot.slane %v1983_v16, 4 }
 0x11d   :  { %v966_v5 = vsel %vm2186_vm12, %v965_v10, %v1944_v48  ;;  %v2013_v7 = vperm.slane %v892_v3, %v2184_v22  ;;  %vm2187_vm13 = vmmov %vm2175_vm3 }
 0x11e   :  { %v2016_v49 = vperm.slane %v966_v5, %v2176_v55  ;;  %v980_v37 = vsel %vm2187_vm13, %v2000_v6, %v979_v25  ;;  %vm2188_vm15 = vmmov %vm2175_vm3 }
 0x11f   :  { %v820_v26 = vsel %vm2188_vm15, %v1897_v54, %v819_v38  ;;  %v2023_v13 = vperm.slane %v980_v37, %v2184_v22  ;;  %v917_v19 = vrot.slane %v2013_v7, 4  ;;  %vm2189_vm2 = vmmov %vm2175_vm3 }
 0x120   :  { %v828_v35 = vperm.slane %v820_v26, %v2176_v55  ;;  %v1004_v42 = vsel %vm2189_vm2, %v2016_v49, %v1003_v27  ;;  %vm2190_vm14 = vmmov %vm2189_vm2 }
 0x121   :  { %v2033_v34 = vperm.slane %v1004_v42, %v2184_v22  ;;  %v832_v54 = vsel %vm2190_vm14, %v1906_v15, %v831_v61  ;;  %vm2191_vm0 = vmmov %vm2189_vm2 }
 0x122   :  { %v844_v2 = vsel %vm2191_vm0, %v1921_v36, %v843_v17  ;;  %v879_v21 = vrot.slane %v828_v35, 4  ;;  %vm2192_vm1 = vmmov %vm2191_vm0  ;;  %v840_v9 = vperm.slane %v832_v54, %v2176_v55 }
 0x123   :  { %v918_v20 = vsel %vm2192_vm1, %v917_v19, %v2005_v0  ;;  %v852_v45 = vperm.slane %v844_v2, %v2176_v55  ;;  %vm2193_vm3 = vmmov %vm2191_vm0  ;;  %v1029_v30 = vrot.slane %v2033_v34, 4 }
 0x124   :  { %v856_v24 = vsel %vm2193_vm3, %v1924_v53, %v855_v29  ;;  %vm2194_vm4 = vmmov %vm2191_vm0  ;;  %v877_v48 = vrot.slane %v840_v9, 4  ;;  %v889_v29 = vrot.slane %v1980_v52, 4 }
 0x125   :  { %v864_v57 = vperm.slane %v856_v24, %v2176_v55  ;;  %v932_v15 = vsel %vm2194_vm4, %v1935_v58, %v931_v8  ;;  %vm2195_vm5 = vmmov %vm2191_vm0  ;;  %v903_v44 = vrot.slane %v852_v45, 4 }
 0x126   :  { %v880_v36 = vsel %vm2195_vm5, %v840_v9, %v879_v21  ;;  %v940_v41 = vperm.slane %v932_v15, %v2176_v55  ;;  %vm2196_vm6 = vmmov %vm2191_vm0  ;;  %v977_v21 = vrot.slane %v2000_v6, 4 }
 0x127   :  { %v1030_v40 = vsel %vm2196_vm6, %v1029_v30, %v2023_v13  ;;  %v2055_v53 = vperm.slane %v880_v36, %v2184_v22  ;;  %vm2197_vm7 = vmmov %vm2191_vm0  ;;  %v901_v51 = vrot.slane %v864_v57, 4 }
 0x128   :  { %v944_v47 = vsel %vm2197_vm7, %v1938_v59, %v943_v32  ;;  %v1150_v58 = vpack.i.bf16 %v1030_v40, %v918_v20  ;;  %vm2198_vm8 = vmmov %vm2191_vm0  ;;  %v991_v11 = vrot.slane %v940_v41, 4 }
 0x129   :  { %v904_v1 = vsel %vm2198_vm8, %v864_v57, %v903_v44  ;;  %v952_v18 = vperm.slane %v944_v47, %v2176_v55  ;;  %vm2199_vm9 = vmmov %vm2191_vm0  ;;  %v1001_v57 = vrot.slane %v2016_v49, 4  ;;  %v919_v49 = vrot.slane %v2005_v0, 4 }
 0x12a   :  { %v956_v50 = vsel %vm2199_vm9, %v1947_v60, %v955_v46  ;;  %v2065_v43 = vperm.slane %v904_v1, %v2184_v22  ;;  %vm2200_vm10 = vmmov %vm2191_vm0  ;;  %1151 = vrot.lane.b32.xlu2 %v1150_v58, %s1216_s17  ;;  %v1031_v47 = vrot.slane %v2023_v13, 4 }
 0x12b   :  { %v964_v39 = vperm.slane %v956_v50, %v2176_v55  ;;  %v968_v31 = vsel %vm2200_vm10, %v1950_v33, %v967_v14  ;;  %v989_v4 = vrot.slane %v952_v18, 4  ;;  %vm2201_vm11 = vmmov %vm2191_vm0  ;;  %v927_v50 = vrot.slane %v2055_v53, 4 }
 0x12c   :  { %v976_v59 = vperm.slane %v968_v31, %v2176_v55  ;;  %v925_v23 = vrot.slane %v2065_v43, 4  ;;  %v992_v60 = vsel %vm2201_vm11, %v952_v18, %v991_v11  ;;  %vm2202_vm12 = vmmov %vm2191_vm0 }
 0x12d   :  { %v1015_v10 = vrot.slane %v964_v39, 4  ;;  %v1000_v25 = vperm.slane %v992_v60, %v2184_v22  ;;  %v878_v38 = vsel %vm2202_vm12, %v877_v48, %v828_v35  ;;  %vm2203_vm13 = vmmov %vm2191_vm0  ;;  %v866_v35 = vsel %vm2191_vm0, %v865_v62, %v1966_v63 }
 0x12e   :  { %v902_v33 = vsel %vm2203_vm13, %v901_v51, %v852_v45  ;;  %vm2204_vm15 = vmmov %vm2191_vm0  ;;  %v884_v27 = vperm.slane %v878_v38, %v2184_v22  ;;  %v1013_v61 = vrot.slane %v976_v59, 4  ;;  %v872_v42 = vperm.slane %v866_v35, %v2184_v22 }
 0x12f   :  { %v990_v3 = vsel %vm2204_vm15, %v989_v4, %v940_v41  ;;  %vm2205_vm2 = vmmov %vm2191_vm0  ;;  %v908_v37 = vperm.slane %v902_v33, %v2184_v22 }
 0x130   :  { %v926_v55 = vsel %vm2205_vm2, %v925_v23, %v2055_v53  ;;  %vm2206_vm14 = vmmov %vm2191_vm0  ;;  %v996_v16 = vperm.slane %v990_v3, %v2184_v22  ;;  %v923_v17 = vrot.slane %v884_v27, 4  ;;  %v915_v63 = vrot.slane %v872_v42, 4 }
 0x131   :  { %v1016_v5 = vsel %vm2206_vm14, %v976_v59, %v1015_v10  ;;  %v921_v19 = vrot.slane %v908_v37, 4  ;;  %vm2207_vm1 = vmmov %vm2191_vm0  ;;  %v928_v59 = vsel %vm2191_vm0, %v2065_v43, %v927_v50 }
 0x132   :  { %v1024_v26 = vperm.slane %v1016_v5, %v2184_v22  ;;  %v1014_v54 = vsel %vm2207_vm1, %v1013_v61, %v964_v39  ;;  %v1035_v2 = vrot.slane %v996_v16, 4  ;;  %vm2208_vm3 = vmmov %vm2191_vm0  ;;  %v1039_v39 = vrot.slane %v1000_v25, 4 }
 0x133   :  { %v924_v20 = vsel %vm2208_vm3, %v908_v37, %v923_v17  ;;  %v1020_v9 = vperm.slane %v1014_v54, %v2184_v22  ;;  %vm2209_vm4 = vmmov %vm2191_vm0  ;;  %vm2223_vm3 = vcmask 261120  }
 0x134   :  { %v1037_v8 = vrot.slane %v1024_v26, 4  ;;  %v890_v45 = vsel %vm2209_vm4, %v889_v29, %v1977_v56  ;;  %vm2210_vm5 = vmmov %vm2191_vm0 }
 0x135   :  { %v896_v30 = vperm.slane %v890_v45, %v2184_v22  ;;  %vm2211_vm6 = vmmov %vm2191_vm0  ;;  %v1033_v32 = vrot.slane %v1020_v9, 4 }
 0x136   :  { %v1038_v24 = vsel %vm2210_vm5, %v1037_v8, %v1000_v25  ;;  %v978_v52 = vsel %vm2211_vm6, %v977_v21, %v1987_v12  ;;  %vm2212_vm7 = vmmov %vm2191_vm0 }
 0x137   :  { %v1165_v15 = vpack.i.bf16 %v1038_v24, %v926_v55  ;;  %v1036_v6 = vsel %vm2212_vm7, %v1020_v9, %v1035_v2  ;;  %v984_v36 = vperm.slane %v978_v52, %v2184_v22  ;;  %vm2213_vm8 = vmmov %vm2191_vm0  ;;  %v913_v46 = vrot.slane %v896_v30, 4 }
 0x138   :  { %v1160_v44 = vpack.i.bf16 %v1036_v6, %v924_v20  ;;  %v916_v41 = vsel %vm2213_vm8, %v896_v30, %v915_v63  ;;  %vm2214_vm9 = vmmov %vm2191_vm0  ;;  %vm1091_vm7 = vcmask 523264   ;;  %vm1094_vm8 = vcmask 785408  }
 0x139   :  { %v1002_v56 = vsel %vm2214_vm9, %v1001_v57, %v1994_v28  ;;  %1166 = vrot.lane.b32.xlu0 %v1165_v15, %s1216_s17  ;;  %v1027_v12 = vrot.slane %v984_v36, 4  ;;  %vm2215_vm10 = vmmov %vm2191_vm0 }
 0x13a   :  { %v1008_v40 = vperm.slane %v1002_v56, %v2184_v22  ;;  %1161 = vrot.lane.b32.xlu1 %v1160_v44, %s1217_s0  ;;  %v914_v14 = vsel %vm2215_vm10, %v913_v46, %v872_v42  ;;  %vm2216_vm11 = vmmov %vm2191_vm0 }
 0x13b   :  { %v1034_v58 = vsel %vm2216_vm11, %v1033_v32, %v996_v16  ;;  %vm2217_vm12 = vmmov %vm2191_vm0 }
 0x13c   :  { %v1025_v1 = vrot.slane %v1008_v40, 4  ;;  %v1028_v18 = vsel %vm2217_vm12, %v1008_v40, %v1027_v12  ;;  %vm2218_vm13 = vmmov %vm2191_vm0 }
 0x13d   :  { %v1155_v28 = vpack.i.bf16 %v1028_v18, %v916_v41  ;;  %v920_v22 = vsel %vm2218_vm13, %v2013_v7, %v919_v49  ;;  %vm2219_vm15 = vmmov %vm2191_vm0 }
 0x13e   :  { %v1032_v0 = vsel %vm2219_vm15, %v2033_v34, %v1031_v47  ;;  %vm2220_vm2 = vmmov %vm2191_vm0 }
 0x13f   :  { %v1026_v13 = vsel %vm2220_vm2, %v1025_v1, %v984_v36  ;;  %vm2221_vm14 = vmmov %vm2191_vm0  ;;  %1156 = vrot.lane.b32.xlu2 %v1155_v28, %s1217_s0  ;;  %v1170_v11 = vpack.i.bf16 %v1032_v0, %v920_v22 }
 0x140   :  { %v922_v31 = vsel %vm2221_vm14, %v921_v19, %v884_v27  ;;  %vm2222_vm1 = vmmov %vm2191_vm0 }
 0x141   :  { %v1040_v48 = vsel %vm2222_vm1, %v1024_v26, %v1039_v39  ;;  %vm2224_vm4 = vmmov %vm2223_vm3 }
 0x142   :  { %1171 = vrot.lane.b32.xlu1 %v1170_v11, %s1215_s16  ;;  %v1175_v53 = vpack.i.bf16 %v1040_v48, %v928_v59  ;;  %vm2225_vm5 = vmmov %vm2223_vm3 }
 0x143   :  { %vm2226_vm6 = vmmov %vm2223_vm3 }
 0x147   :  { %1176 = vrot.lane.b32.xlu2 %v1175_v53, %s1215_s16 }
 0x184   :  { %v1152_v7 = vpop.permute.xlu2 %1151 }
 0x185   :  { %v1154_v55 = vunpack.i.h.bf16 %v1152_v7  ;;  %v1153_v37 = vunpack.i.l.bf16 %v1152_v7 }
 0x199   :  { %v1157_v51 = vpop.permute.xlu2 %1156 }
 0x19a   :  { %v1159_v60 = vunpack.i.h.bf16 %v1157_v51  ;;  %v1158_v10 = vunpack.i.l.bf16 %v1157_v51 }
 0x19c   :  { %v1090_v5 = vsel %vm2225_vm5, %v1026_v13, %v1159_v60  ;;  %v1089_v27 = vsel %vm2226_vm6, %v914_v14, %v1158_v10 }
 0x19d   :  { %v1092_v29 = vsel %vm1091_vm7, %v1089_v27, %v1153_v37  ;;  %v1093_v8 = vsel %vm1091_vm7, %v1090_v5, %v1154_v55 }
 0x1a1   :  { %v1177_v43 = vpop.permute.xlu2 %1176 }
 0x1a2   :  { %v1179_v35 = vunpack.i.h.bf16 %v1177_v43  ;;  %v1178_v17 = vunpack.i.l.bf16 %v1177_v43 }
 0x1ab   :  { %v1167_v62 = vpop.permute.xlu0 %1166 }
 0x1ac   :  { %v1162_v34 = vpop.permute.xlu1 %1161  ;;  %v1169_v33 = vunpack.i.h.bf16 %v1167_v62  ;;  %v1168_v3 = vunpack.i.l.bf16 %v1167_v62 }
 0x1ad   :  { %v1164_v4 = vunpack.i.h.bf16 %v1162_v34  ;;  %v1163_v23 = vunpack.i.l.bf16 %v1162_v34 }
 0x1af   :  { %v1098_v25 = vsel %vm2223_vm3, %v1034_v58, %v1164_v4  ;;  %v1097_v38 = vsel %vm2224_vm4, %v922_v31, %v1163_v23 }
 0x1b0   :  { %v1100_v26 = vsel %vm1091_vm7, %v1098_v25, %v1169_v33  ;;  %v1099_v16 = vsel %vm1091_vm7, %v1097_v38, %v1168_v3 }
 0x1b1   :  { %v1101_v21 = vsel %vm1094_vm8, %v1099_v16, %v1178_v17  ;;  %v1102_v20 = vsel %vm1094_vm8, %v1100_v26, %v1179_v35 }
 0x1b4   :  { %v1172_v61 = vpop.permute.xlu1 %1171 }
 0x1b5   :  { %v1174_v19 = vunpack.i.h.bf16 %v1172_v61  ;;  %v1173_v42 = vunpack.i.l.bf16 %v1172_v61 }
 0x1b7   :  { %v1095_v54 = vsel %vm1094_vm8, %v1092_v29, %v1173_v42  ;;  %v1096_v2 = vsel %vm1094_vm8, %v1093_v8, %v1174_v19 }
 0x1b8   :  { %v1103_v9 = vpack.c.bf16 %v1101_v21, %v1095_v54  ;;  %v1104_v45 = vpack.c.bf16 %v1102_v20, %v1096_v2 }
 0x1ba   :  { %1105 = vst [vmem:[%s2140_s3] sm:$0xff] %v1103_v9 }
 0x1bb   :  { %1106 = vst [vmem:[%s2140_s3 + $0x8] sm:$0xff] %v1104_v45 }

// kernel: forward.17
= control target key start
LH: loop header
LB: loop body
LE: loop exit
PB: predicated region body
PF: predicated region fallthrough
CT: control target
= control target key end

     0   :  { %s376_s1 = inlined_call_operand.vmem [shape: bf16[256,128], index: 1, kind: input, shape index: {}]   ;;  %s377_s2 = inlined_call_operand.vmem [shape: f32[1,128], index: 2, kind: input, shape index: {}]   ;;  %s378_s0 = inlined_call_operand.vmem [shape: bf16[16,256], index: 0, kind: input, shape index: {}]   ;;  %s379_s3 = inlined_call_operand.vmem [shape: bf16[16,128], index: 3, kind: output, shape index: {}]  }
   0x1   :  { %v275_v0 = vld [vmem:[%s376_s1 + $0x38] sm:$0xff]  ;;  %v274_v2 = vld [vmem:[%s376_s1 + $0x30] sm:$0xff]  ;;  %v273_v4 = vld [vmem:[%s376_s1 + $0x28] sm:$0xff] }
   0x2   :  { %v283_v1 = vld [vmem:[%s376_s1 + $0x78] sm:$0xff]  ;;  %158 = vmatpush.bf16.msra.mxu0 %v275_v0  ;;  %v282_v3 = vld [vmem:[%s376_s1 + $0x70] sm:$0xff]  ;;  %v281_v5 = vld [vmem:[%s376_s1 + $0x68] sm:$0xff] }
   0x3   :  { %172 = vmatpush.bf16.msra.mxu1 %v283_v1  ;;  %v272_v6 = vld [vmem:[%s376_s1 + $0x20] sm:$0xff]  ;;  %v271_v8 = vld [vmem:[%s376_s1 + $0x18] sm:$0xff]  ;;  %v270_v10 = vld [vmem:[%s376_s1 + $0x10] sm:$0xff] }
   0x4   :  { %v280_v7 = vld [vmem:[%s376_s1 + $0x60] sm:$0xff]  ;;  %v279_v9 = vld [vmem:[%s376_s1 + $0x58] sm:$0xff]  ;;  %v278_v11 = vld [vmem:[%s376_s1 + $0x50] sm:$0xff] }
   0x5   :  { %v269_v12 = vld [vmem:[%s376_s1 + $0x8] sm:$0xff]  ;;  %v268_v14 = vld [vmem:[%s376_s1] sm:$0xff] }
   0x6   :  { %159 = vmatpush.bf16.msra.mxu0 %v274_v2  ;;  %v277_v13 = vld [vmem:[%s376_s1 + $0x48] sm:$0xff]  ;;  %v276_v15 = vld [vmem:[%s376_s1 + $0x40] sm:$0xff] }
   0x7   :  { %173 = vmatpush.bf16.msra.mxu1 %v282_v3  ;;  %v196_v16 = vld [vmem:[%s378_s0] sm:$0xf]  ;;  %v267_v17 = vld [vmem:[%s378_s0 + $0x4] sm:$0xf0]  ;;  %v266_v18 = vld [vmem:[%s378_s0 + $0x4] sm:$0xf] }
   0x8   :  { %v198_v19 = vld [vmem:[%s378_s0 + $0x8] sm:$0xf0]  ;;  %v197_v20 = vor.u32 %v267_v17, %v196_v16  ;;  %v289_v24 = vld [vmem:[%s377_s2] ss:$0 sm:$0xff] }
   0x9   :  { %v201_v21 = vor.u32 %v266_v18, %v198_v19 }
   0xa   :  { %160 = vmatpush.bf16.msra.mxu0 %v273_v4 }
   0xb   :  { %174 = vmatpush.bf16.msra.mxu1 %v281_v5 }
   0xe   :  { %161 = vmatpush.bf16.msra.mxu0 %v272_v6 }
   0xf   :  { %175 = vmatpush.bf16.msra.mxu1 %v280_v7 }
  0x12   :  { %162 = vmatpush.bf16.msra.mxu0 %v271_v8 }
  0x13   :  { %176 = vmatpush.bf16.msra.mxu1 %v279_v9 }
  0x16   :  { %163 = vmatpush.bf16.msra.mxu0 %v270_v10 }
  0x17   :  { %177 = vmatpush.bf16.msra.mxu1 %v278_v11 }
  0x1a   :  { %164 = vmatpush.bf16.msra.mxu0 %v269_v12 }
  0x1b   :  { %178 = vmatpush.bf16.msra.mxu1 %v277_v13 }
  0x1e   :  { %165 = vmatpush.bf16.msra.mxu0 %v268_v14 }
  0x1f   :  { %179 = vmatpush.bf16.msra.mxu1 %v276_v15 }
  0x21   :  { %166 = vmatmul.bf16.vlgmr.msra.gmra.mxu0 %v197_v20 }
  0x22   :  { %180 = vmatmul.bf16.vlgmr.msra.gmra.mxu1 %v201_v21 }
  0x9e   :  { %v167_v22 = vpop.f32.mrf.mxu0 }
  0x9f   :  { %v181_v23 = vpop.f32.mrf.mxu1  ;;  %v168_v25 = vadd.f32 %v289_v24, %v167_v22 }
  0xa1   :  { %v182_v29 = vadd.f32 %v181_v23, %v168_v25 }
  0xa6   :  { %v169_v26 = vpop.f32.mrf.mxu0 }
  0xa7   :  { %v170_v27 = vadd.f32 %v289_v24, %v169_v26  ;;  %v183_v28 = vpop.f32.mrf.mxu1 }
  0xa9   :  { %v184_v30 = vadd.f32 %v183_v28, %v170_v27 }
  0xab   :  { %v287_v31 = vpack.c.bf16 %v184_v30, %v182_v29 }
  0xad   :  { %288 = vst [vmem:[%s379_s3] sm:$0xff] %v287_v31  }

// kernel: forward.14
= control target key start
LH: loop header
LB: loop body
LE: loop exit
PB: predicated region body
PF: predicated region fallthrough
CT: control target
= control target key end

     0   :  { %vm318_vm0 = vcmask 261120   ;;  %vm554_vm1 = vcmask 257024   ;;  %s1081_s1 = inlined_call_operand.vmem [shape: bf16[288,32], index: 1, kind: input, shape index: {}]   ;;  %s1082_s0 = inlined_call_operand.vmem [shape: bf16[128,288], index: 0, kind: input, shape index: {}]   ;;  %s1083_s2 = inlined_call_operand.vmem [shape: f32[1,32], index: 2, kind: input, shape index: {}]   ;;  %s1084_s3 = inlined_call_operand.vmem [shape: bf16[128,32], index: 3, kind: input, shape index: {}]   ;;  %s1085_s4 = inlined_call_operand.vmem [shape: bf16[128,32], index: 4, kind: output, shape index: {}]  }
   0x1   :  { %v662_v0 = vld [vmem:[%s1081_s1 + $0x38] sm:$0xff]  ;;  %v672_v1 = vld [vmem:[%s1081_s1 + $0x88] sm:$0xff]  ;;  %v661_v3 = vld [vmem:[%s1081_s1 + $0x30] sm:$0xff] }
   0x2   :  { %v763_v2 = vld [vmem:[%s1081_s1 + $0x78] sm:$0xff]  ;;  %343 = vmatpush.bf16.msra.mxu0 %v662_v0  ;;  %712 = vmatpush.bf16.msra.mxu3 %v662_v0  ;;  %v19_v4 = vld [vmem:[%s1082_s0 + $0x8] sm:$0xf]  ;;  %v21_v5 = vld [vmem:[%s1082_s0 + $0x14] sm:$0xf] }
   0x3   :  { %447 = vmatpush.bf16.msra.mxu2 %v672_v1  ;;  %392 = vmatpush.bf16.msra.mxu1 %v763_v2  ;;  %v671_v6 = vld [vmem:[%s1081_s1 + $0x80] sm:$0xff]  ;;  %v781_v7 = vld [vmem:[%s1081_s1 + $0x70] sm:$0xff]  ;;  %v52_v8 = vunpack.c.l.bf16 %v19_v4  ;;  %v55_v9 = vunpack.c.l.bf16 %v21_v5  ;;  %v660_v12 = vld [vmem:[%s1081_s1 + $0x28] sm:$0xff] }
   0x4   :  { %v790_v14 = vld [vmem:[%s1081_s1 + $0x68] sm:$0xff]  ;;  %v659_v15 = vld [vmem:[%s1081_s1 + $0x20] sm:$0xff]  ;;  %v658_v19 = vld [vmem:[%s1081_s1 + $0x18] sm:$0xff] }
   0x5   :  { %v100_v10 = vmax.f32 %v52_v8, 0.0  ;;  %v103_v11 = vmax.f32 %v55_v9, 0.0  ;;  %v800_v16 = vld [vmem:[%s1081_s1 + $0x60] sm:$0xff]  ;;  %v25_v18 = vld [vmem:[%s1082_s0 + $0x2c] sm:$0xf]  ;;  %v815_v22 = vld [vmem:[%s1081_s1 + $0x58] sm:$0xff] }
   0x6   :  { %344 = vmatpush.bf16.msra.mxu0 %v661_v3  ;;  %713 = vmatpush.bf16.msra.mxu3 %v661_v3  ;;  %v23_v17 = vld [vmem:[%s1082_s0 + $0x20] sm:$0xf]  ;;  %v61_v21 = vunpack.c.l.bf16 %v25_v18  ;;  %v657_v23 = vld [vmem:[%s1081_s1 + $0x10] sm:$0xff]  ;;  %v656_v35 = vld [vmem:[%s1081_s1 + $0x8] sm:$0xff] }
   0x7   :  { %448 = vmatpush.bf16.msra.mxu2 %v671_v6  ;;  %393 = vmatpush.bf16.msra.mxu1 %v781_v7  ;;  %v148_v13 = vpack.c.bf16 %v103_v11, %v100_v10  ;;  %v58_v20 = vunpack.c.l.bf16 %v23_v17  ;;  %v18_v26 = vld [vmem:[%s1082_s0] sm:$0xff]  ;;  %v20_v27 = vld [vmem:[%s1082_s0 + $0xc] sm:$0xff]  ;;  %v27_v48 = vld [vmem:[%s1082_s0 + $0x38] sm:$0xf] }
   0x8   :  { %v109_v25 = vmax.f32 %v61_v21, 0.0  ;;  %v830_v28 = vld [vmem:[%s1081_s1 + $0x50] sm:$0xff]  ;;  %v840_v30 = vld [vmem:[%s1082_s0 + $0x9c] sm:$0xff]  ;;  %v50_v31 = vunpack.c.l.bf16 %v18_v26  ;;  %v53_v32 = vunpack.c.l.bf16 %v20_v27  ;;  %v51_v33 = vunpack.c.h.bf16 %v18_v26  ;;  %v851_v39 = vld [vmem:[%s1081_s1 + $0x48] sm:$0xff] }
   0x9   :  { %v106_v24 = vmax.f32 %v58_v20, 0.0  ;;  %v835_v29 = vld [vmem:[%s1082_s0 + $0x90] sm:$0xff]  ;;  %v89_v37 = vunpack.c.l.bf16 %v840_v30  ;;  %v54_v38 = vunpack.c.h.bf16 %v20_v27  ;;  %v655_v42 = vld [vmem:[%s1081_s1] sm:$0xff]  ;;  %v64_v53 = vunpack.c.l.bf16 %v27_v48  ;;  %v22_v57 = vld [vmem:[%s1082_s0 + $0x18] sm:$0xff] }
   0xa   :  { %647 = vmatmul.msk.bf16.vlgmr.msra.gmra.mxu2 %vm318_vm0, %v148_v13  ;;  %345 = vmatpush.bf16.msra.mxu0 %v660_v12  ;;  %v86_v36 = vunpack.c.l.bf16 %v835_v29  ;;  %v98_v40 = vmax.f32 %v50_v31, 0.0  ;;  %v101_v41 = vmax.f32 %v53_v32, 0.0  ;;  %v99_v45 = vmax.f32 %v51_v33, 0.0  ;;  %v861_v47 = vld [vmem:[%s1081_s1 + $0x40] sm:$0xff]  ;;  %v880_v59 = vld [vmem:[%s1082_s0 + $0xa8] sm:$0xff]  ;;  %v885_v60 = vld [vmem:[%s1082_s0 + $0xb4] sm:$0xff] }
   0xb   :  { %714 = vmatpush.bf16.msra.mxu3 %v660_v12  ;;  %394 = vmatpush.bf16.msra.mxu1 %v790_v14  ;;  %v151_v34 = vpack.c.bf16 %v109_v25, %v106_v24  ;;  %v137_v44 = vmax.f32 %v89_v37, 0.0  ;;  %v102_v46 = vmax.f32 %v54_v38, 0.0  ;;  %v29_v49 = vld [vmem:[%s1082_s0 + $0x44] sm:$0xf]  ;;  %v112_v55 = vmax.f32 %v64_v53, 0.0  ;;  %v26_v20 = vld [vmem:[%s1082_s0 + $0x30] sm:$0xff] }
   0xc   :  { %v134_v43 = vmax.f32 %v86_v36, 0.0  ;;  %v146_v50 = vpack.c.bf16 %v101_v41, %v98_v40  ;;  %v67_v54 = vunpack.c.l.bf16 %v29_v49  ;;  %v24_v58 = vld [vmem:[%s1082_s0 + $0x24] sm:$0xff]  ;;  %v56_v61 = vunpack.c.l.bf16 %v22_v57  ;;  %v33_v11 = vld [vmem:[%s1082_s0 + $0x5c] sm:$0xf] }
   0xd   :  { %v147_v52 = vpack.c.bf16 %v102_v46, %v99_v45  ;;  %v59_v62 = vunpack.c.l.bf16 %v24_v58  ;;  %v92_v63 = vunpack.c.l.bf16 %v880_v59  ;;  %v95_v1 = vunpack.c.l.bf16 %v885_v60 }
   0xe   :  { %346 = vmatpush.bf16.msra.mxu0 %v659_v15  ;;  %v164_v51 = vpack.c.bf16 %v137_v44, %v134_v43  ;;  %v115_v56 = vmax.f32 %v67_v54, 0.0  ;;  %v60_v3 = vunpack.c.h.bf16 %v24_v58  ;;  %v104_v4 = vmax.f32 %v56_v61, 0.0  ;;  %v30_v43 = vld [vmem:[%s1082_s0 + $0x48] sm:$0xff]  ;;  %v32_v44 = vld [vmem:[%s1082_s0 + $0x54] sm:$0xff]  ;;  %v39_v58 = vld [vmem:[%s1082_s0 + $0x80] sm:$0xf] }
   0xf   :  { %715 = vmatpush.bf16.msra.mxu3 %v659_v15  ;;  %395 = vmatpush.bf16.msra.mxu1 %v800_v16  ;;  %v107_v5 = vmax.f32 %v59_v62, 0.0  ;;  %v140_v6 = vmax.f32 %v92_v63, 0.0  ;;  %v143_v8 = vmax.f32 %v95_v1, 0.0  ;;  %v73_v17 = vunpack.c.l.bf16 %v33_v11 }
  0x10   :  { %v154_v0 = vpack.c.bf16 %v115_v56, %v112_v55  ;;  %v108_v10 = vmax.f32 %v60_v3, 0.0  ;;  %v87_v21 = vunpack.c.h.bf16 %v835_v29  ;;  %v63_v26 = vunpack.c.h.bf16 %v26_v20  ;;  %v37_v29 = vld [vmem:[%s1082_s0 + $0x74] sm:$0xf]  ;;  %v34_v3 = vld [vmem:[%s1082_s0 + $0x60] sm:$0xff] }
  0x11   :  { %v149_v12 = vpack.c.bf16 %v107_v5, %v104_v4  ;;  %v167_v13 = vpack.c.bf16 %v143_v8, %v140_v6  ;;  %v79_v38 = vunpack.c.l.bf16 %v37_v29  ;;  %v68_v46 = vunpack.c.l.bf16 %v30_v43  ;;  %v36_v4 = vld [vmem:[%s1082_s0 + $0x6c] sm:$0xff] }
  0x12   :  { %347 = vmatpush.bf16.msra.mxu0 %v658_v19  ;;  %v135_v33 = vmax.f32 %v87_v21, 0.0  ;;  %v93_v48 = vunpack.c.h.bf16 %v880_v59  ;;  %v96_v49 = vunpack.c.h.bf16 %v885_v60  ;;  %v41_v59 = vld [vmem:[%s1082_s0 + $0x8c] sm:$0xf]  ;;  %v82_v63 = vunpack.c.l.bf16 %v39_v58 }
  0x13   :  { %716 = vmatpush.bf16.msra.mxu3 %v658_v19  ;;  %396 = vmatpush.bf16.msra.mxu1 %v815_v22  ;;  %v121_v19 = vmax.f32 %v73_v17, 0.0  ;;  %v74_v5 = vunpack.c.l.bf16 %v34_v3  ;;  %v77_v6 = vunpack.c.l.bf16 %v36_v4 }
  0x14   :  { %v141_v54 = vmax.f32 %v93_v48, 0.0  ;;  %v144_v55 = vmax.f32 %v96_v49, 0.0  ;;  %v130_v1 = vmax.f32 %v82_v63, 0.0 }
  0x15   :  { %v125_v11 = vmax.f32 %v77_v6, 0.0 }
  0x16   :  { %348 = vmatpush.bf16.msra.mxu0 %v657_v23  ;;  %v168_v60 = vpack.c.bf16 %v144_v55, %v141_v54 }
  0x17   :  { %717 = vmatpush.bf16.msra.mxu3 %v657_v23  ;;  %397 = vmatpush.bf16.msra.mxu1 %v830_v28  ;;  %v90_v23 = vunpack.c.h.bf16 %v840_v30 }
  0x1a   :  { %648 = vmatmul.msk.bf16.gmra.mxu2 %vm318_vm0, %v151_v34  ;;  %349 = vmatpush.bf16.msra.mxu0 %v656_v35  ;;  %v138_v34 = vmax.f32 %v90_v23, 0.0  ;;  %v38_v23 = vld [vmem:[%s1082_s0 + $0x78] sm:$0xff] }
  0x1b   :  { %718 = vmatpush.bf16.msra.mxu3 %v656_v35  ;;  %398 = vmatpush.bf16.msra.mxu1 %v851_v39  ;;  %v111_v35 = vmax.f32 %v63_v26, 0.0 }
  0x1e   :  { %350 = vmatpush.bf16.msra.mxu0 %v655_v42 }
  0x1f   :  { %719 = vmatpush.bf16.msra.mxu3 %v655_v42  ;;  %399 = vmatpush.bf16.msra.mxu1 %v861_v47  ;;  %v127_v42 = vmax.f32 %v79_v38, 0.0 }
  0x21   :  { %351 = vmatmul.bf16.vlgmr.msra.gmra.mxu0 %v146_v50  ;;  %v69_v50 = vunpack.c.h.bf16 %v30_v43 }
  0x22   :  { %381 = vmatmul.bf16.vlgmr.msra.gmra.mxu3 %v164_v51  ;;  %400 = vmatmul.bf16.vlgmr.msra.gmra.mxu1 %v147_v52  ;;  %v72_v51 = vunpack.c.h.bf16 %v32_v44  ;;  %v116_v52 = vmax.f32 %v68_v46, 0.0 }
  0x23   :  { %720 = vmatpush.bf16.msrb.mxu3 %v763_v2  ;;  %v57_v2 = vunpack.c.h.bf16 %v22_v57  ;;  %v117_v56 = vmax.f32 %v69_v50, 0.0 }
  0x24   :  { %v120_v57 = vmax.f32 %v72_v51, 0.0 }
  0x25   :  { %v105_v9 = vmax.f32 %v57_v2, 0.0 }
  0x26   :  { %v156_v62 = vpack.c.bf16 %v120_v57, %v117_v56 }
  0x27   :  { %721 = vmatpush.bf16.msrb.mxu3 %v781_v7  ;;  %v31_v7 = vld [vmem:[%s1082_s0 + $0x50] sm:$0xf] }
  0x28   :  { %v70_v15 = vunpack.c.l.bf16 %v31_v7  ;;  %v122_v7 = vmax.f32 %v74_v5, 0.0 }
  0x2a   :  { %649 = vmatmul.msk.bf16.gmra.mxu2 %vm318_vm0, %v154_v0  ;;  %v118_v18 = vmax.f32 %v70_v15, 0.0  ;;  %v85_v0 = vunpack.c.l.bf16 %v41_v59  ;;  %v45_v15 = vld [vmem:[%s1082_s0 + $0xa4] sm:$0xf]  ;;  %v158_v17 = vpack.c.bf16 %v125_v11, %v122_v7 }
  0x2b   :  { %722 = vmatpush.bf16.msrb.mxu3 %v790_v14  ;;  %v150_v14 = vpack.c.bf16 %v108_v10, %v105_v9  ;;  %v75_v9 = vunpack.c.h.bf16 %v34_v3  ;;  %v78_v10 = vunpack.c.h.bf16 %v36_v4 }
  0x2c   :  { %v157_v25 = vpack.c.bf16 %v121_v19, %v118_v18  ;;  %v133_v2 = vmax.f32 %v85_v0, 0.0 }
  0x2e   :  { %v163_v8 = vpack.c.bf16 %v133_v2, %v130_v1  ;;  %v705_v1 = vld [vmem:[%s1084_s3 + $0x8] sm:$0xff]  }
  0x2f   :  { %723 = vmatpush.bf16.msrb.mxu3 %v800_v16  ;;  %v28_v16 = vld [vmem:[%s1082_s0 + $0x3c] sm:$0xff]  ;;  %v679_v6 = vunpack.c.l.bf16 %v705_v1 }
  0x30   :  { %v65_v24 = vunpack.c.l.bf16 %v28_v16  ;;  %v66_v27 = vunpack.c.h.bf16 %v28_v16 }
  0x31   :  { %356 = vmatmul.bf16.gmra.mxu0 %v149_v12  ;;  %v123_v12 = vmax.f32 %v75_v9, 0.0 }
  0x32   :  { %386 = vmatmul.bf16.gmra.mxu3 %v167_v13  ;;  %405 = vmatmul.bf16.gmra.mxu1 %v150_v14  ;;  %v113_v32 = vmax.f32 %v65_v24, 0.0  ;;  %v114_v36 = vmax.f32 %v66_v27, 0.0  ;;  %v126_v13 = vmax.f32 %v78_v10, 0.0  ;;  %v43_v14 = vld [vmem:[%s1082_s0 + $0x98] sm:$0xf]  ;;  %v80_v24 = vunpack.c.l.bf16 %v38_v23 }
  0x33   :  { %724 = vmatpush.bf16.msrb.mxu3 %v815_v22  ;;  %v62_v22 = vunpack.c.l.bf16 %v26_v20  ;;  %v88_v19 = vunpack.c.l.bf16 %v43_v14  ;;  %v91_v20 = vunpack.c.l.bf16 %v45_v15  ;;  %v81_v27 = vunpack.c.h.bf16 %v38_v23 }
  0x34   :  { %v153_v40 = vpack.c.bf16 %v114_v36, %v111_v35  ;;  %v159_v18 = vpack.c.bf16 %v126_v13, %v123_v12  ;;  %v47_v36 = vld [vmem:[%s1082_s0 + $0xb0] sm:$0xf]  ;;  %v680_v15 = vunpack.c.h.bf16 %v705_v1 }
  0x35   :  { %v110_v31 = vmax.f32 %v62_v22, 0.0  ;;  %v136_v16 = vmax.f32 %v88_v19, 0.0  ;;  %v139_v21 = vmax.f32 %v91_v20, 0.0  ;;  %v40_v22 = vld [vmem:[%s1082_s0 + $0x84] sm:$0xff] }
  0x37   :  { %725 = vmatpush.bf16.msrb.mxu3 %v830_v28  ;;  %v35_v28 = vld [vmem:[%s1082_s0 + $0x68] sm:$0xf]  ;;  %v152_v30 = vpack.c.bf16 %v113_v32, %v110_v31  ;;  %v166_v26 = vpack.c.bf16 %v139_v21, %v136_v16  ;;  %v84_v31 = vunpack.c.h.bf16 %v40_v22  ;;  %v128_v32 = vmax.f32 %v80_v24, 0.0  ;;  %v706_v21 = vld [vmem:[%s1084_s3 + $0x10] sm:$0xff]  }
  0x38   :  { %v76_v37 = vunpack.c.l.bf16 %v35_v28  ;;  %v49_v28 = vld [vmem:[%s1082_s0 + $0xbc] sm:$0xf] }
  0x39   :  { %v132_v35 = vmax.f32 %v84_v31, 0.0  ;;  %v97_v38 = vunpack.c.l.bf16 %v49_v28 }
  0x3a   :  { %650 = vmatmul.msk.bf16.gmra.mxu2 %vm318_vm0, %v157_v25  ;;  %v124_v41 = vmax.f32 %v76_v37, 0.0  ;;  %v83_v25 = vunpack.c.l.bf16 %v40_v22  ;;  %v94_v37 = vunpack.c.l.bf16 %v47_v36 }
  0x3b   :  { %726 = vmatpush.bf16.msrb.mxu3 %v851_v39  ;;  %v165_v39 = vpack.c.bf16 %v138_v34, %v135_v33  ;;  %v129_v34 = vmax.f32 %v81_v27, 0.0 }
  0x3c   :  { %v160_v45 = vpack.c.bf16 %v127_v42, %v124_v41  ;;  %v131_v33 = vmax.f32 %v83_v25, 0.0 }
  0x3e   :  { %v161_v29 = vpack.c.bf16 %v131_v33, %v128_v32 }
  0x3f   :  { %727 = vmatpush.bf16.msrb.mxu3 %v861_v47  ;;  %v71_v47 = vunpack.c.l.bf16 %v32_v44  ;;  %v963_v44 = vld [vmem:[%s1083_s2] ss:$0 sm:$0xff] }
  0x41   :  { %361 = vmatmul.bf16.gmra.mxu0 %v152_v30  ;;  %v119_v53 = vmax.f32 %v71_v47, 0.0  ;;  %v162_v30 = vpack.c.bf16 %v132_v35, %v129_v34  ;;  %v674_v47 = vld [vmem:[%s1084_s3] sm:$0xff]  }
  0x42   :  { %430 = vmatmul.bf16.vlgmr.msrb.gmra.mxu3 %v165_v39  ;;  %410 = vmatmul.bf16.gmra.mxu1 %v153_v40  ;;  %v142_v39 = vmax.f32 %v94_v37, 0.0  ;;  %v145_v40 = vmax.f32 %v97_v38, 0.0  ;;  %v675_v51 = vunpack.c.l.bf16 %v674_v47 }
  0x43   :  { %v155_v61 = vpack.c.bf16 %v119_v53, %v116_v52 }
  0x44   :  { %v169_v41 = vpack.c.bf16 %v145_v40, %v142_v39 }
  0x4a   :  { %651 = vmatmul.msk.bf16.gmra.mxu2 %vm318_vm0, %v160_v45 }
  0x51   :  { %366 = vmatmul.bf16.gmra.mxu0 %v155_v61  ;;  %v676_v61 = vunpack.c.h.bf16 %v674_v47 }
  0x52   :  { %435 = vmatmul.bf16.gmra.mxu3 %v168_v60  ;;  %415 = vmatmul.bf16.gmra.mxu1 %v156_v62 }
  0x5a   :  { %652 = vmatmul.msk.bf16.gmra.mxu2 %vm318_vm0, %v163_v8 }
  0x61   :  { %371 = vmatmul.bf16.gmra.mxu0 %v158_v17 }
  0x62   :  { %420 = vmatmul.bf16.gmra.mxu1 %v159_v18 }
  0x6a   :  { %653 = vmatmul.msk.bf16.gmra.mxu2 %vm318_vm0, %v166_v26  ;;  %v683_v26 = vunpack.c.l.bf16 %v706_v21 }
  0x71   :  { %376 = vmatmul.bf16.gmra.mxu0 %v161_v29 }
  0x72   :  { %425 = vmatmul.bf16.gmra.mxu1 %v162_v30  ;;  %v684_v30 = vunpack.c.h.bf16 %v706_v21 }
  0x7a   :  { %654 = vmatmul.msk.bf16.gmra.mxu2 %vm318_vm0, %v169_v41  ;;  %v707_v41 = vld [vmem:[%s1084_s3 + $0x18] sm:$0xff]  }
  0x8d   :  { %v450_v42 = vpop.f32.mrf.mxu2 }
  0x95   :  { %v452_v43 = vpop.f32.mrf.mxu2 }
  0x9d   :  { %v455_v45 = vpop.f32.mrf.mxu2 }
  0x9e   :  { %v352_v46 = vpop.f32.mrf.mxu0 }
  0x9f   :  { %v353_v48 = vadd.f32 %v963_v44, %v352_v46  ;;  %v401_v49 = vpop.f32.mrf.mxu1 }
  0xa1   :  { %v402_v50 = vadd.f32 %v401_v49, %v353_v48  ;;  %v687_v48 = vunpack.c.l.bf16 %v707_v41 }
  0xa3   :  { %v451_v52 = vadd.f32 %v450_v42, %v402_v50 }
  0xa5   :  { %v522_v53 = vadd.f32 %v675_v51, %v451_v52  ;;  %v457_v54 = vpop.f32.mrf.mxu2  ;;  %v987_v17 = vpop.f32.mrf.mxu3 }
  0xa6   :  { %v354_v55 = vpop.f32.mrf.mxu0 }
  0xa7   :  { %v538_v56 = vpack.c.bf16 %v522_v53, %v522_v53  ;;  %v355_v57 = vadd.f32 %v963_v44, %v354_v55  ;;  %v403_v58 = vpop.f32.mrf.mxu1 }
  0xa9   :  { %555 = vst.msk [vmem:[%s1085_s4] sm:$0xf] %vm554_vm1, %v538_v56  ;;  %v404_v59 = vadd.f32 %v403_v58, %v355_v57  ;;  %v688_v58 = vunpack.c.h.bf16 %v707_v41 }
  0xab   :  { %v453_v60 = vadd.f32 %v452_v43, %v404_v59 }
  0xad   :  { %v523_v62 = vadd.f32 %v676_v61, %v453_v60  ;;  %v460_v63 = vpop.f32.mrf.mxu2  ;;  %v997_v31 = vpop.f32.mrf.mxu3 }
  0xae   :  { %v357_v0 = vpop.f32.mrf.mxu0 }
  0xaf   :  { %v539_v2 = vpack.c.bf16 %v523_v62, %v523_v62  ;;  %v358_v3 = vadd.f32 %v963_v44, %v357_v0  ;;  %v406_v4 = vpop.f32.mrf.mxu1 }
  0xb1   :  { %556 = vst.msk [vmem:[%s1085_s4 + $0x4] sm:$0xf] %vm554_vm1, %v539_v2  ;;  %v407_v5 = vadd.f32 %v406_v4, %v358_v3 }
  0xb3   :  { %v456_v8 = vadd.f32 %v455_v45, %v407_v5 }
  0xb5   :  { %v524_v9 = vadd.f32 %v679_v6, %v456_v8  ;;  %v462_v10 = vpop.f32.mrf.mxu2  ;;  %v1007_v42 = vpop.f32.mrf.mxu3 }
  0xb6   :  { %v359_v7 = vpop.f32.mrf.mxu0 }
  0xb7   :  { %v540_v11 = vpack.c.bf16 %v524_v9, %v524_v9  ;;  %v360_v12 = vadd.f32 %v963_v44, %v359_v7  ;;  %v408_v13 = vpop.f32.mrf.mxu1 }
  0xb9   :  { %557 = vst.msk [vmem:[%s1085_s4 + $0x8] sm:$0xf] %vm554_vm1, %v540_v11  ;;  %v409_v14 = vadd.f32 %v408_v13, %v360_v12  ;;  %v383_v13 = vadd.f32 %v963_v44, %v987_v17  ;;  %v709_v17 = vld [vmem:[%s1084_s3 + $0x28] sm:$0xff]  }
  0xbb   :  { %v458_v18 = vadd.f32 %v457_v54, %v409_v14 }
  0xbd   :  { %v525_v19 = vadd.f32 %v680_v15, %v458_v18  ;;  %v465_v20 = vpop.f32.mrf.mxu2  ;;  %v1015_v56 = vpop.f32.mrf.mxu3  ;;  %v710_v18 = vld [vmem:[%s1084_s3 + $0x30] sm:$0xff]  }
  0xbe   :  { %v362_v16 = vpop.f32.mrf.mxu0 }
  0xbf   :  { %v541_v23 = vpack.c.bf16 %v525_v19, %v525_v19  ;;  %v363_v22 = vadd.f32 %v963_v44, %v362_v16  ;;  %v411_v24 = vpop.f32.mrf.mxu1  ;;  %v699_v16 = vunpack.c.l.bf16 %v710_v18 }
  0xc1   :  { %558 = vst.msk [vmem:[%s1085_s4 + $0xc] sm:$0xf] %vm554_vm1, %v541_v23  ;;  %v412_v25 = vadd.f32 %v411_v24, %v363_v22 }
  0xc3   :  { %v461_v27 = vadd.f32 %v460_v63, %v412_v25  ;;  %v708_v63 = vld [vmem:[%s1084_s3 + $0x20] sm:$0xff]  }
  0xc4   :  { %v691_v4 = vunpack.c.l.bf16 %v708_v63  ;;  %v692_v15 = vunpack.c.h.bf16 %v708_v63 }
  0xc5   :  { %v526_v32 = vadd.f32 %v683_v26, %v461_v27  ;;  %v467_v33 = vpop.f32.mrf.mxu2  ;;  %v431_v5 = vpop.f32.mrf.mxu3 }
  0xc6   :  { %v364_v34 = vpop.f32.mrf.mxu0 }
  0xc7   :  { %v542_v35 = vpack.c.bf16 %v526_v32, %v526_v32  ;;  %v365_v36 = vadd.f32 %v963_v44, %v364_v34  ;;  %v413_v28 = vpop.f32.mrf.mxu1 }
  0xc9   :  { %559 = vst.msk [vmem:[%s1085_s4 + $0x10] sm:$0xf] %vm554_vm1, %v542_v35  ;;  %v414_v29 = vadd.f32 %v413_v28, %v365_v36  ;;  %v695_v36 = vunpack.c.l.bf16 %v709_v17 }
  0xcb   :  { %v463_v37 = vadd.f32 %v462_v10, %v414_v29 }
  0xcd   :  { %v527_v38 = vadd.f32 %v684_v30, %v463_v37  ;;  %v470_v39 = vpop.f32.mrf.mxu2  ;;  %v433_v21 = vpop.f32.mrf.mxu3  ;;  %v700_v37 = vunpack.c.h.bf16 %v710_v18 }
  0xce   :  { %v367_v40 = vpop.f32.mrf.mxu0 }
  0xcf   :  { %v543_v43 = vpack.c.bf16 %v527_v38, %v527_v38  ;;  %v368_v45 = vadd.f32 %v963_v44, %v367_v40  ;;  %v416_v46 = vpop.f32.mrf.mxu1 }
  0xd1   :  { %560 = vst.msk [vmem:[%s1085_s4 + $0x14] sm:$0xf] %vm554_vm1, %v543_v43  ;;  %v417_v47 = vadd.f32 %v416_v46, %v368_v45 }
  0xd3   :  { %v466_v49 = vadd.f32 %v465_v20, %v417_v47  ;;  %v432_v20 = vadd.f32 %v431_v5, %v383_v13  ;;  %v388_v47 = vadd.f32 %v963_v44, %v1007_v42 }
  0xd5   :  { %v528_v50 = vadd.f32 %v687_v48, %v466_v49  ;;  %v472_v51 = vpop.f32.mrf.mxu2  ;;  %v436_v41 = vpop.f32.mrf.mxu3 }
  0xd6   :  { %v369_v52 = vpop.f32.mrf.mxu0 }
  0xd7   :  { %v544_v53 = vpack.c.bf16 %v528_v50, %v528_v50  ;;  %v370_v54 = vadd.f32 %v963_v44, %v369_v52  ;;  %v418_v55 = vpop.f32.mrf.mxu1  ;;  %v696_v50 = vunpack.c.h.bf16 %v709_v17 }
  0xd9   :  { %561 = vst.msk [vmem:[%s1085_s4 + $0x18] sm:$0xf] %vm554_vm1, %v544_v53  ;;  %v419_v57 = vadd.f32 %v418_v55, %v370_v54  ;;  %v437_v54 = vadd.f32 %v436_v41, %v388_v47 }
  0xdb   :  { %v468_v59 = vadd.f32 %v467_v33, %v419_v57  ;;  %v385_v33 = vadd.f32 %v963_v44, %v997_v31 }
  0xdd   :  { %v529_v61 = vadd.f32 %v688_v58, %v468_v59  ;;  %v475_v60 = vpop.f32.mrf.mxu2  ;;  %v434_v30 = vadd.f32 %v433_v21, %v385_v33 }
  0xde   :  { %v372_v62 = vpop.f32.mrf.mxu0 }
  0xdf   :  { %v545_v0 = vpack.c.bf16 %v529_v61, %v529_v61  ;;  %v373_v1 = vadd.f32 %v963_v44, %v372_v62  ;;  %v421_v2 = vpop.f32.mrf.mxu1  ;;  %v390_v61 = vadd.f32 %v963_v44, %v1015_v56  ;;  %v438_v62 = vpop.f32.mrf.mxu3 }
  0xe1   :  { %562 = vst.msk [vmem:[%s1085_s4 + $0x1c] sm:$0xf] %vm554_vm1, %v545_v0  ;;  %v422_v3 = vadd.f32 %v421_v2, %v373_v1  ;;  %v439_v0 = vadd.f32 %v438_v62, %v390_v61 }
  0xe3   :  { %v471_v6 = vadd.f32 %v470_v39, %v422_v3 }
  0xe5   :  { %v530_v8 = vadd.f32 %v691_v4, %v471_v6  ;;  %v477_v9 = vpop.f32.mrf.mxu2 }
  0xe6   :  { %v374_v10 = vpop.f32.mrf.mxu0 }
  0xe7   :  { %v546_v7 = vpack.c.bf16 %v530_v8, %v530_v8  ;;  %v375_v11 = vadd.f32 %v963_v44, %v374_v10  ;;  %v423_v12 = vpop.f32.mrf.mxu1 }
  0xe9   :  { %563 = vst.msk [vmem:[%s1085_s4 + $0x20] sm:$0xf] %vm554_vm1, %v546_v7  ;;  %v424_v14 = vadd.f32 %v423_v12, %v375_v11 }
  0xeb   :  { %v473_v19 = vadd.f32 %v472_v51, %v424_v14  ;;  %v711_v51 = vld [vmem:[%s1084_s3 + $0x38] sm:$0xff]  }
  0xec   :  { %v703_v42 = vunpack.c.l.bf16 %v711_v51  ;;  %v704_v1 = vunpack.c.h.bf16 %v711_v51 }
  0xed   :  { %v531_v23 = vadd.f32 %v692_v15, %v473_v19  ;;  %v480_v22 = vpop.f32.mrf.mxu2 }
  0xee   :  { %v481_v24 = vadd.f32 %v480_v22, %v432_v20  ;;  %v377_v25 = vpop.f32.mrf.mxu0 }
  0xef   :  { %v547_v26 = vpack.c.bf16 %v531_v23, %v531_v23  ;;  %v378_v27 = vadd.f32 %v963_v44, %v377_v25  ;;  %v426_v32 = vpop.f32.mrf.mxu1 }
  0xf0   :  { %v534_v34 = vadd.f32 %v699_v16, %v481_v24 }
  0xf1   :  { %564 = vst.msk [vmem:[%s1085_s4 + $0x24] sm:$0xf] %vm554_vm1, %v547_v26  ;;  %v427_v35 = vadd.f32 %v426_v32, %v378_v27 }
  0xf2   :  { %v550_v28 = vpack.c.bf16 %v534_v34, %v534_v34 }
  0xf3   :  { %v476_v29 = vadd.f32 %v475_v60, %v427_v35 }
  0xf4   :  { %567 = vst.msk [vmem:[%s1085_s4 + $0x30] sm:$0xf] %vm554_vm1, %v550_v28 }
  0xf5   :  { %v532_v38 = vadd.f32 %v695_v36, %v476_v29  ;;  %v482_v39 = vpop.f32.mrf.mxu2 }
  0xf6   :  { %v483_v31 = vadd.f32 %v482_v39, %v434_v30  ;;  %v379_v40 = vpop.f32.mrf.mxu0 }
  0xf7   :  { %v548_v43 = vpack.c.bf16 %v532_v38, %v532_v38  ;;  %v380_v45 = vadd.f32 %v963_v44, %v379_v40  ;;  %v428_v46 = vpop.f32.mrf.mxu1 }
  0xf8   :  { %v535_v48 = vadd.f32 %v700_v37, %v483_v31 }
  0xf9   :  { %565 = vst.msk [vmem:[%s1085_s4 + $0x28] sm:$0xf] %vm554_vm1, %v548_v43  ;;  %v429_v49 = vadd.f32 %v428_v46, %v380_v45 }
  0xfa   :  { %v551_v52 = vpack.c.bf16 %v535_v48, %v535_v48 }
  0xfb   :  { %v478_v53 = vadd.f32 %v477_v9, %v429_v49 }
  0xfc   :  { %568 = vst.msk [vmem:[%s1085_s4 + $0x34] sm:$0xf] %vm554_vm1, %v551_v52 }
  0xfd   :  { %v533_v55 = vadd.f32 %v696_v50, %v478_v53  ;;  %v485_v57 = vpop.f32.mrf.mxu2 }
  0xfe   :  { %v486_v58 = vadd.f32 %v485_v57, %v437_v54 }
  0xff   :  { %v549_v59 = vpack.c.bf16 %v533_v55, %v533_v55 }
 0x100   :  { %v536_v60 = vadd.f32 %v703_v42, %v486_v58 }
 0x101   :  { %566 = vst.msk [vmem:[%s1085_s4 + $0x2c] sm:$0xf] %vm554_vm1, %v549_v59 }
 0x102   :  { %v552_v63 = vpack.c.bf16 %v536_v60, %v536_v60 }
 0x104   :  { %569 = vst.msk [vmem:[%s1085_s4 + $0x38] sm:$0xf] %vm554_vm1, %v552_v63 }
 0x105   :  { %v487_v2 = vpop.f32.mrf.mxu2 }
 0x106   :  { %v488_v3 = vadd.f32 %v487_v2, %v439_v0 }
 0x108   :  { %v537_v4 = vadd.f32 %v704_v1, %v488_v3 }
 0x10a   :  { %v553_v5 = vpack.c.bf16 %v537_v4, %v537_v4 }
 0x10c   :  { %570 = vst.msk [vmem:[%s1085_s4 + $0x3c] sm:$0xf] %vm554_vm1, %v553_v5 }

// kernel: forward.18
= control target key start
LH: loop header
LB: loop body
LE: loop exit
PB: predicated region body
PF: predicated region fallthrough
CT: control target
= control target key end

     0   :  { %s959_s18 = smov 0   ;;  %s961_s19 = smov 0   ;;  %s1111_s0 = inlined_call_operand.vmem [shape: bf16[16,128], index: 0, kind: input, shape index: {}]   ;;  %s1112_s1 = inlined_call_operand.vmem [shape: f32[1,128], index: 1, kind: input, shape index: {}]   ;;  %s1113_s2 = inlined_call_operand.vmem [shape: f32[1,128], index: 2, kind: input, shape index: {}]   ;;  %s1114_s3 = inlined_call_operand.vmem [shape: bf16[128,768], index: 3, kind: input, shape index: {}]   ;;  %s1115_s4 = inlined_call_operand.vmem [shape: f32[1,768], index: 4, kind: input, shape index: {}]   ;;  %s1116_s5 = inlined_call_operand.vmem [shape: bf16[16,768], index: 5, kind: output, shape index: {}]  }
   0x1   :  { %s963_s20 = smov 0   ;;  %s965_s21 = smov 0  }
   0x2   :  { %s967_s22 = smov 0  }
   0x3 LB: > { %s24_s23 = sadd.s32 1, %s923_s21  ;;  %s729_s24 = sadd.s32 4294967295, %s927_s22   ;;  %s927_s22 = sphi %s967_s22, %s15_s22   ;;  %s923_s21 = sphi %s965_s21, %s1121_s21   ;;  %s919_s20 = sphi %s963_s20, %s1120_s20   ;;  %s915_s19 = sphi %s961_s19, %s1119_s19   ;;  %s911_s18 = sphi %s959_s18, %s1118_s18  }
   0x4   : > { %p25_p0 = scmp.ge.s32.totalorder %s24_s23, 3  ;;  %p109_p1 = scmp.ne.s32.totalorder %s915_s19, %s911_s18 }
   0x5   : > { %p110_p2 = scmp.eq.s32.totalorder %s927_s22, 0  ;;  %p167_p4 = scmp.eq.s32.totalorder %s729_s24, 2 }
   0x6   : > { %s1123_s23 = smov (%p25_p0, %s24_s23), 0  ;;  %s102_s26 = sadd.s32 1, %s915_s19 }
   0x7   : > { %p111_p3 = por %p110_p2, %p109_p1  ;;  %s99_s25 = ssub.s32 %s923_s21, %s1123_s23 }
   0x8   : > { %p100_p5 = scmp.eq.s32.totalorder %s99_s25, 0  ;;  %p994_p6 = por %p167_p4, %p109_p1 }
   0x9   : > { %p733_p7 = scmp.ge.s32.totalorder %s927_s22, 3 }
   0xa   : > { %s999_s28 = scalar_select %p100_p5, %s915_s19, %s102_s26  }
   0xb   : > { %204 = sbr.rel (%p733_p7) target bundleno = 36 (0x24), region = 28 }
  0x10   : > { %207 = sbr.rel (!%p111_p3) target bundleno = 36 (0x24), region = 32  ;;  %s209_s29 = sand.u32 (%p111_p3), 1, %s915_s19  }
  0x11   : > { %s815_s30 = sshll.u32 (%p111_p3), %s923_s21, 3  ;;  %s734_s6 = sshll.u32 (%p111_p3), %s209_s29, 7 }
  0x12   : > { %s1007_s9 = scalar_lea.vmem (%p111_p3), %s1114_s3, %s815_s30  ;;  %s211_s10 = scalar_lea.vmem (%p111_p3), [#allocation3], %s734_s6 }
  0x13   : > { %v273_v0 = vld [vmem:[%s1007_s9] sm:$0xff] (%p111_p3)  ;;  %v275_v1 = vld [vmem:[%s1007_s9 + $0x18] sm:$0xff] (%p111_p3)  ;;  %v277_v2 = vld [vmem:[%s1007_s9 + $0x30] sm:$0xff] (%p111_p3) }
  0x14   : > { %274 = vst [vmem:[%s211_s10] sm:$0xff] (%p111_p3), %v273_v0  ;;  %v279_v3 = vld [vmem:[%s1007_s9 + $0x48] sm:$0xff] (%p111_p3)  ;;  %v281_v4 = vld [vmem:[%s1007_s9 + $0x60] sm:$0xff] (%p111_p3)  ;;  %v283_v5 = vld [vmem:[%s1007_s9 + $0x78] sm:$0xff] (%p111_p3) }
  0x15   : > { %276 = vst [vmem:[%s211_s10 + $0x8] sm:$0xff] %v275_v1  ;;  %v285_v6 = vld [vmem:[%s1007_s9 + $0x90] sm:$0xff]  ;;  %v287_v7 = vld [vmem:[%s1007_s9 + $0xa8] sm:$0xff]  ;;  %v289_v8 = vld [vmem:[%s1007_s9 + $0xc0] sm:$0xff] }
  0x16   : > { %278 = vst [vmem:[%s211_s10 + $0x10] sm:$0xff] %v277_v2  ;;  %v291_v9 = vld [vmem:[%s1007_s9 + $0xd8] sm:$0xff]  ;;  %v293_v10 = vld [vmem:[%s1007_s9 + $0xf0] sm:$0xff]  ;;  %v295_v11 = vld [vmem:[%s1007_s9 + $0x108] sm:$0xff] }
  0x17   : > { %280 = vst [vmem:[%s211_s10 + $0x18] sm:$0xff] %v279_v3  ;;  %v297_v12 = vld [vmem:[%s1007_s9 + $0x120] sm:$0xff]  ;;  %v299_v13 = vld [vmem:[%s1007_s9 + $0x138] sm:$0xff]  ;;  %v301_v14 = vld [vmem:[%s1007_s9 + $0x150] sm:$0xff] }
  0x18   : > { %282 = vst [vmem:[%s211_s10 + $0x20] sm:$0xff] %v281_v4  ;;  %v303_v15 = vld [vmem:[%s1007_s9 + $0x168] sm:$0xff] }
  0x19   : > { %284 = vst [vmem:[%s211_s10 + $0x28] sm:$0xff] %v283_v5 }
  0x1a   : > { %286 = vst [vmem:[%s211_s10 + $0x30] sm:$0xff] %v285_v6 }
  0x1b   : > { %288 = vst [vmem:[%s211_s10 + $0x38] sm:$0xff] %v287_v7 }
  0x1c   : > { %290 = vst [vmem:[%s211_s10 + $0x40] sm:$0xff] %v289_v8 }
  0x1d   : > { %292 = vst [vmem:[%s211_s10 + $0x48] sm:$0xff] %v291_v9 }
  0x1e   : > { %294 = vst [vmem:[%s211_s10 + $0x50] sm:$0xff] %v293_v10 }
  0x1f   : > { %296 = vst [vmem:[%s211_s10 + $0x58] sm:$0xff] %v295_v11 }
  0x20   : > { %298 = vst [vmem:[%s211_s10 + $0x60] sm:$0xff] %v297_v12 }
  0x21   : > { %300 = vst [vmem:[%s211_s10 + $0x68] sm:$0xff] %v299_v13 }
  0x22   : > { %302 = vst [vmem:[%s211_s10 + $0x70] sm:$0xff] %v301_v14 }
  0x23   : > { %304 = vst [vmem:[%s211_s10 + $0x78] sm:$0xff] %v303_v15 }
  0x24 PF: > { %p737_p8 = scmp.ge.s32.totalorder %s927_s22, 1  ;;  %p317_p9 = scmp.lt.s32.totalorder %s927_s22, 4 }
  0x26   : > { %p318_p10 = pnand %p737_p8, %p317_p9 }
  0x27   : > { %s324_s11 = sand.u32 (!%p318_p10), 1, %s911_s18   ;;  %s740_s12 = sshll.u32 (!%p318_p10), %s919_s20, 1 }
  0x28   : > { %321 = sbr.rel (%p318_p10) target bundleno = 398 (0x18e), region = 74  ;;  %s738_s13 = sshll.u32 (!%p318_p10), %s324_s11, 7 }
  0x29   : > { %s739_s14 = sshll.u32 (!%p318_p10), %s324_s11, 4  ;;  %p367_p11 = scmp.lt.s32.totalorder (!%p318_p10), %s740_s12, 5 }
  0x2a   : > { %s1035_s24 = scalar_lea.vmem (!%p318_p10), [#allocation3], %s738_s13  ;;  %s1037_s25 = scalar_lea.vmem (!%p318_p10), [#allocation4], %s739_s14 }
  0x2b   : > { %p741_p12 = scmp.ne.s32.totalorder (!%p318_p10), %s919_s20, 0 }
  0x2d   : > { %s1125_s12 = smov (!%p367_p11, %s740_s12), 5  ;;  %376 = sbr.rel (%p741_p12) target bundleno = 216 (0xd8), region = 82 }
  0x2e   : > { %s369_s17 = scalar_lea.vmem %s1115_s4, %s1125_s12 }
  0x32   : > { %v835_v16 = vld [vmem:[%s1111_s0] sm:$0xff]  }
  0x33   : > { %v836_v17 = vunpack.c.l.bf16 %v835_v16  ;;  %v837_v19 = vunpack.c.h.bf16 %v835_v16  ;;  %v883_v49 = vld [vmem:[%s1112_s1] ss:$0 sm:$0xff] }
  0x34   : > { %v884_v53 = vld [vmem:[%s1113_s2] ss:$0 sm:$0xff] }
  0x35   : > { %381 = vadd.xlane.f32.xlu0 %v836_v17  ;;  %v385_v18 = vmul.f32 %v836_v17, %v836_v17  ;;  %v386_v20 = vmul.f32 %v837_v19, %v837_v19 }
  0x37   : > { %387 = vadd.xlane.f32.xlu1 %v385_v18 }
  0x3d   : > { %383 = vadd.xlane.f32.xlu0 %v837_v19 }
  0x3f   : > { %389 = vadd.xlane.f32.xlu1 %v386_v20 }
  0xa8   : > { %v382_v21 = vpop.xlane.xlu0 %381 }
  0xa9   : > { %v391_v22 = vmul.f32 0.03125, %v382_v21 }
  0xaa   : > { %v388_v23 = vpop.xlane.xlu1 %387 }
  0xab   : > { %v395_v24 = vmul.f32 %v391_v22, %v391_v22  ;;  %v393_v25 = vmul.f32 0.03125, %v388_v23  ;;  %v423_v47 = vsub.f32 %v836_v17, %v391_v22 }
  0xad   : > { %v397_v26 = vsub.f32 %v393_v25, %v395_v24 }
  0xaf   : > { %v399_v27 = vmax.f32 %v397_v26, 0.0 }
  0xb0   : > { %v384_v28 = vpop.xlane.xlu0 %383 }
  0xb1   : > { %v401_v29 = vadd.f32 1e-05, %v399_v27  ;;  %v392_v30 = vmul.f32 0.03125, %v384_v28 }
  0xb2   : > { %v390_v31 = vpop.xlane.xlu1 %389 }
  0xb3   : > { %885 = vrsqrt.f32 %v401_v29  ;;  %v396_v32 = vmul.f32 %v392_v30, %v392_v30  ;;  %v394_v33 = vmul.f32 0.03125, %v390_v31  ;;  %vm409_vm1 = vweird.f32 %v401_v29 }
  0xb4   : > { %v424_v55 = vsub.f32 %v837_v19, %v392_v30 }
  0xb5   : > { %v398_v34 = vsub.f32 %v394_v33, %v396_v32 }
  0xb7   : > { %v400_v35 = vmax.f32 %v398_v34, 0.0 }
  0xb9   : > { %v886_v36 = vpop.eup %885  ;;  %v402_v38 = vadd.f32 1e-05, %v400_v35 }
  0xba   : > { %v404_v37 = vmul.f32 %v886_v36, %v401_v29  ;;  %vm410_vm0 = vweird.f32 %v886_v36 }
  0xbb   : > { %887 = vrsqrt.f32 %v402_v38  ;;  %vm411_vm2 = vmor %vm409_vm1, %vm410_vm0  ;;  %vm419_vm4 = vweird.f32 %v402_v38 }
  0xbc   : > { %v405_v39 = vmul.f32 %v886_v36, %v404_v37 }
  0xbe   : > { %v406_v40 = vmul.f32 0.5, %v405_v39 }
  0xc0   : > { %v407_v41 = vsub.f32 1.5, %v406_v40 }
  0xc1   : > { %v888_v42 = vpop.eup %887 }
  0xc2   : > { %v408_v43 = vmul.f32 %v886_v36, %v407_v41  ;;  %v414_v44 = vmul.f32 %v888_v42, %v402_v38  ;;  %vm420_vm3 = vweird.f32 %v888_v42 }
  0xc3   : > { %vm421_vm5 = vmor %vm419_vm4, %vm420_vm3 }
  0xc4   : > { %v412_v45 = vsel %vm411_vm2, %v886_v36, %v408_v43  ;;  %v415_v46 = vmul.f32 %v888_v42, %v414_v44 }
  0xc5   : > { %v425_v50 = vmul.f32 %v423_v47, %v412_v45 }
  0xc6   : > { %v416_v48 = vmul.f32 0.5, %v415_v46 }
  0xc7   : > { %v431_v54 = vmul.f32 %v883_v49, %v425_v50 }
  0xc8   : > { %v417_v51 = vsub.f32 1.5, %v416_v48 }
  0xc9   : > { %v437_v58 = vadd.f32 %v884_v53, %v431_v54 }
  0xca   : > { %v418_v52 = vmul.f32 %v888_v42, %v417_v51 }
  0xcb   : > { %v439_v61 = vmax.f32 %v437_v58, 0.0 }
  0xcc   : > { %v422_v56 = vsel %vm421_vm5, %v888_v42, %v418_v52 }
  0xcd   : > { %v426_v57 = vmul.f32 %v424_v55, %v422_v56 }
  0xcf   : > { %v432_v59 = vmul.f32 %v883_v49, %v426_v57 }
  0xd1   : > { %v438_v60 = vadd.f32 %v884_v53, %v432_v59 }
  0xd3   : > { %v440_v62 = vmax.f32 %v438_v60, 0.0 }
  0xd5   : > { %v841_v63 = vpack.c.bf16 %v440_v62, %v439_v61 }
  0xd7   : > { %842 = vst [vmem:[#allocation2] sm:$0xff] %v841_v63  }
  0xd8 PF: > { %v804_v0 = vld [vmem:[%s1035_s24 + $0x70] sm:$0xf]  ;;  %v832_v1 = vld [vmem:[%s1035_s24 + $0x74] sm:$0xf0]  ;;  %v831_v2 = vld [vmem:[%s1035_s24 + $0x74] sm:$0xf] }
  0xd9   : > { %v805_v3 = vor.u32 %v832_v1, %v804_v0  ;;  %v806_v4 = vld [vmem:[%s1035_s24 + $0x78] sm:$0xf0]  ;;  %v796_v5 = vld [vmem:[%s1035_s24 + $0x60] sm:$0xf]  ;;  %v830_v6 = vld [vmem:[%s1035_s24 + $0x64] sm:$0xf0] }
  0xda   : > { %v809_v7 = vor.u32 %v831_v2, %v806_v4  ;;  %v829_v8 = vld [vmem:[%s1035_s24 + $0x64] sm:$0xf]  ;;  %v798_v9 = vld [vmem:[%s1035_s24 + $0x68] sm:$0xf0]  ;;  %v797_v10 = vor.u32 %v830_v6, %v796_v5  ;;  %v788_v12 = vld [vmem:[%s1035_s24 + $0x50] sm:$0xf] }
  0xdb   : > { %555 = vmatpush.bf16.msra.mxu0 %v805_v3  ;;  %v801_v11 = vor.u32 %v829_v8, %v798_v9  ;;  %v828_v13 = vld [vmem:[%s1035_s24 + $0x54] sm:$0xf0]  ;;  %v827_v14 = vld [vmem:[%s1035_s24 + $0x54] sm:$0xf]  ;;  %v790_v15 = vld [vmem:[%s1035_s24 + $0x58] sm:$0xf0] }
  0xdc   : > { %569 = vmatpush.bf16.msra.mxu1 %v809_v7  ;;  %v789_v16 = vor.u32 %v828_v13, %v788_v12  ;;  %v793_v17 = vor.u32 %v827_v14, %v790_v15  ;;  %v780_v18 = vld [vmem:[%s1035_s24 + $0x40] sm:$0xf]  ;;  %v826_v19 = vld [vmem:[%s1035_s24 + $0x44] sm:$0xf0]  ;;  %v825_v20 = vld [vmem:[%s1035_s24 + $0x44] sm:$0xf] }
  0xdd   : > { %v782_v21 = vld [vmem:[%s1035_s24 + $0x48] sm:$0xf0]  ;;  %v781_v22 = vor.u32 %v826_v19, %v780_v18  ;;  %v772_v24 = vld [vmem:[%s1035_s24 + $0x30] sm:$0xf]  ;;  %v824_v25 = vld [vmem:[%s1035_s24 + $0x34] sm:$0xf0] }
  0xde   : > { %v785_v23 = vor.u32 %v825_v20, %v782_v21  ;;  %v823_v26 = vld [vmem:[%s1035_s24 + $0x34] sm:$0xf]  ;;  %v774_v27 = vld [vmem:[%s1035_s24 + $0x38] sm:$0xf0]  ;;  %v773_v28 = vor.u32 %v824_v25, %v772_v24  ;;  %v764_v30 = vld [vmem:[%s1035_s24 + $0x20] sm:$0xf] }
  0xdf   : > { %556 = vmatpush.bf16.msra.mxu0 %v797_v10  ;;  %v777_v29 = vor.u32 %v823_v26, %v774_v27  ;;  %v822_v31 = vld [vmem:[%s1035_s24 + $0x24] sm:$0xf0]  ;;  %v821_v32 = vld [vmem:[%s1035_s24 + $0x24] sm:$0xf]  ;;  %v766_v33 = vld [vmem:[%s1035_s24 + $0x28] sm:$0xf0] }
  0xe0   : > { %570 = vmatpush.bf16.msra.mxu1 %v801_v11  ;;  %v765_v34 = vor.u32 %v822_v31, %v764_v30  ;;  %v769_v35 = vor.u32 %v821_v32, %v766_v33  ;;  %v756_v36 = vld [vmem:[%s1035_s24 + $0x10] sm:$0xf]  ;;  %v820_v37 = vld [vmem:[%s1035_s24 + $0x14] sm:$0xf0]  ;;  %v819_v38 = vld [vmem:[%s1035_s24 + $0x14] sm:$0xf] }
  0xe1   : > { %v758_v39 = vld [vmem:[%s1035_s24 + $0x18] sm:$0xf0]  ;;  %v757_v40 = vor.u32 %v820_v37, %v756_v36  ;;  %v748_v42 = vld [vmem:[%s1035_s24] sm:$0xf]  ;;  %v818_v43 = vld [vmem:[%s1035_s24 + $0x4] sm:$0xf0] }
  0xe2   : > { %v761_v41 = vor.u32 %v819_v38, %v758_v39  ;;  %v817_v44 = vld [vmem:[%s1035_s24 + $0x4] sm:$0xf]  ;;  %v750_v45 = vld [vmem:[%s1035_s24 + $0x8] sm:$0xf0]  ;;  %v749_v46 = vor.u32 %v818_v43, %v748_v42  ;;  %v816_v48 = vld [vmem:[#allocation2] sm:$0xff]  ;;  %s833_s10 = sshll.u32 (%p994_p6), %s919_s20, 3 }
  0xe3   : > { %557 = vmatpush.bf16.msra.mxu0 %v789_v16  ;;  %v753_v47 = vor.u32 %v817_v44, %v750_v45  ;;  %v463_v49 = vld [vmem:[%s369_s17] sm:$0x3]  ;;  %s599_s13 = scalar_lea.vmem (%p994_p6), %s1116_s5, %s833_s10 }
  0xe4   : > { %571 = vmatpush.bf16.msra.mxu1 %v793_v17  ;;  %v465_v50 = vperm.slane %v463_v49, 0  ;;  %v466_v51 = vperm.slane %v463_v49, 1 }
  0xe7   : > { %558 = vmatpush.bf16.msra.mxu0 %v781_v22 }
  0xe8   : > { %572 = vmatpush.bf16.msra.mxu1 %v785_v23 }
  0xeb   : > { %559 = vmatpush.bf16.msra.mxu0 %v773_v28 }
  0xec   : > { %573 = vmatpush.bf16.msra.mxu1 %v777_v29 }
  0xef   : > { %560 = vmatpush.bf16.msra.mxu0 %v765_v34 }
  0xf0   : > { %574 = vmatpush.bf16.msra.mxu1 %v769_v35 }
  0xf3   : > { %561 = vmatpush.bf16.msra.mxu0 %v757_v40 }
  0xf4   : > { %575 = vmatpush.bf16.msra.mxu1 %v761_v41 }
  0xf7   : > { %562 = vmatpush.bf16.msra.mxu0 %v749_v46 }
  0xf8   : > { %576 = vmatpush.bf16.msra.mxu1 %v753_v47 }
  0xfa   : > { %563 = vmatmul.bf16.vlgmr.msra.gmra.mxu0 %v816_v48 }
  0xfb   : > { %577 = vmatmul.bf16.vlgmr.msra.gmra.mxu1 %v816_v48 }
 0x177   : > { %v564_v52 = vpop.f32.mrf.mxu0 }
 0x178   : > { %v565_v53 = vadd.f32 %v564_v52, %v465_v50  ;;  %v578_v54 = vpop.f32.mrf.mxu1 }
 0x179   : > { %v579_v55 = vadd.f32 %v578_v54, %v466_v51 }
 0x17b   : > { %v583_v56 = vpack.c.bf16 %v579_v55, %v565_v53 }
 0x17d   : > { %585 = vst [vmem:[%s1037_s25] sm:$0xff] %v583_v56 }
 0x17f   : > { %v566_v57 = vpop.f32.mrf.mxu0 }
 0x180   : > { %v567_v58 = vadd.f32 %v566_v57, %v465_v50  ;;  %v580_v59 = vpop.f32.mrf.mxu1 }
 0x181   : > { %v581_v60 = vadd.f32 %v580_v59, %v466_v51  ;;  %593 = sbr.rel (!%p994_p6) target bundleno = 398 (0x18e), region = 86 }
 0x183   : > { %v584_v61 = vpack.c.bf16 %v581_v60, %v567_v58 }
 0x184   : > { %v630_v62 = vld [vmem:[%s1037_s25] sm:$0xff] (%p994_p6) }
 0x185   : > { %586 = vst [vmem:[%s1037_s25 + $0x8] sm:$0xff] %v584_v61 }
 0x186   : > { %631 = vst [vmem:[%s599_s13] sm:$0xff] %v630_v62 }
 0x18c   : > { %v632_v63 = vld [vmem:[%s1037_s25 + $0x8] sm:$0xff] }
 0x18d   : > { %633 = vst [vmem:[%s599_s13 + $0x18] sm:$0xff] %v632_v63 }
 0x18e PF: > { %s15_s22 = sadd.s32 1, %s927_s22   ;;  %s1118_s18 = smov %s915_s19 }
 0x18f   : > { %p12_p13 = scmp.ge.s32.totalorder %s15_s22, 5   ;;  %s1119_s19 = smov %s999_s28 }
 0x190   : > { %s1120_s20 = smov %s923_s21  ;;  %s1121_s21 = smov %s1123_s23 }
 0x191   :  { %14 = sbr.rel (!%p12_p13) target bundleno = 3 (0x3), region = 161 }

// kernel: forward.19
= control target key start
LH: loop header
LB: loop body
LE: loop exit
PB: predicated region body
PF: predicated region fallthrough
CT: control target
= control target key end

     0   :  { %s1109_s12 = smov 0   ;;  %s1111_s13 = smov 0   ;;  %s1440_s0 = inlined_call_operand.vmem [shape: bf16[8,2,768], index: 0, kind: input, shape index: {}]   ;;  %s1441_s1 = inlined_call_operand.vmem [shape: bf16[2,128,384], index: 1, kind: input, shape index: {}]   ;;  %s1442_s2 = inlined_call_operand.vmem [shape: f32[2,1,384], index: 2, kind: input, shape index: {}]   ;;  %s1443_s3 = inlined_call_operand.vmem [shape: bf16[8,2,256], index: 3, kind: output, shape index: {}]  }
   0x1   :  { %s1113_s14 = smov 0   ;;  %s1115_s15 = smov 0  }
   0x2   :  { %s1117_s16 = smov 0  }
   0x3 LB: > { %s32_s17 = sadd.s32 1, %s1074_s15  ;;  %s829_s18 = sadd.s32 4294967295, %s1078_s16   ;;  %s1078_s16 = sphi %s1117_s16, %s13_s16   ;;  %s1074_s15 = sphi %s1115_s15, %s1465_s15   ;;  %s1070_s14 = sphi %s1113_s14, %s1464_s14   ;;  %s1066_s13 = sphi %s1111_s13, %s1463_s13   ;;  %s1062_s12 = sphi %s1109_s12, %s1462_s12  }
   0x4   : > { %p34_p0 = scmp.ge.s32.totalorder %s32_s17, 2  ;;  %p58_p1 = scmp.ne.s32.totalorder %s1066_s13, %s1062_s12 }
   0x5   : > { %p59_p2 = scmp.eq.s32.totalorder %s1078_s16, 0  ;;  %p152_p4 = scmp.eq.s32.totalorder %s829_s18, 1 }
   0x6   : > { %s1467_s17 = smov (%p34_p0, %s32_s17), 0  ;;  %s51_s20 = sadd.s32 1, %s1066_s13 }
   0x7   : > { %p60_p3 = por %p59_p2, %p58_p1  ;;  %s47_s19 = ssub.s32 %s1074_s15, %s1467_s17 }
   0x8   : > { %p49_p5 = scmp.eq.s32.totalorder %s47_s19, 0  ;;  %p1144_p6 = por %p152_p4, %p58_p1 }
   0x9   : > { %p832_p7 = scmp.ge.s32.totalorder %s1078_s16, 2 }
   0xa   : > { %s1149_s22 = scalar_select %p49_p5, %s1066_s13, %s51_s20  }
   0xb   : > { %174 = sbr.rel (%p832_p7) target bundleno = 29 (0x1d), region = 16 }
  0x10   : > { %177 = sbr.rel (!%p60_p3) target bundleno = 29 (0x1d), region = 20  ;;  %s179_s23 = sand.u32 (%p60_p3), 1, %s1066_s13  }
  0x11   : > { %s187_s24 = smul.u32 (%p60_p3), 3, %s1074_s15 }
  0x12   : > { %s961_s25 = smul.u32 (%p60_p3), 24, %s179_s23 }
  0x13   : > { %s192_s28 = scalar_lea.vmem (%p60_p3), %s1440_s0, %s187_s24 }
  0x14   : > { %v209_v0 = vld [vmem:[%s192_s28] sm:$0x7] (%p60_p3)  ;;  %v211_v1 = vld [vmem:[%s192_s28 + $0x6] sm:$0x7] (%p60_p3)  ;;  %s181_s29 = scalar_lea.vmem (%p60_p3), [#allocation3], %s961_s25 }
  0x15   : > { %210 = vst [vmem:[%s181_s29] sm:$0x7] %v209_v0  ;;  %v213_v2 = vld [vmem:[%s192_s28 + $0xc] sm:$0x7]  ;;  %v215_v3 = vld [vmem:[%s192_s28 + $0x12] sm:$0x7] }
  0x16   : > { %212 = vst [vmem:[%s181_s29 + $0x3] sm:$0x7] %v211_v1  ;;  %v217_v4 = vld [vmem:[%s192_s28 + $0x18] sm:$0x7]  ;;  %v219_v5 = vld [vmem:[%s192_s28 + $0x1e] sm:$0x7] }
  0x17   : > { %214 = vst [vmem:[%s181_s29 + $0x6] sm:$0x7] %v213_v2  ;;  %v221_v6 = vld [vmem:[%s192_s28 + $0x24] sm:$0x7]  ;;  %v223_v7 = vld [vmem:[%s192_s28 + $0x2a] sm:$0x7] }
  0x18   : > { %216 = vst [vmem:[%s181_s29 + $0x9] sm:$0x7] %v215_v3 }
  0x19   : > { %218 = vst [vmem:[%s181_s29 + $0xc] sm:$0x7] %v217_v4 }
  0x1a   : > { %220 = vst [vmem:[%s181_s29 + $0xf] sm:$0x7] %v219_v5 }
  0x1b   : > { %222 = vst [vmem:[%s181_s29 + $0x12] sm:$0x7] %v221_v6 }
  0x1c   : > { %224 = vst [vmem:[%s181_s29 + $0x15] sm:$0x7] %v223_v7 }
  0x1d PF: > { %p833_p8 = scmp.ge.s32.totalorder %s1078_s16, 1  ;;  %p278_p9 = scmp.lt.s32.totalorder %s1078_s16, 3 }
  0x1f   : > { %p279_p10 = pnand %p833_p8, %p278_p9 }
  0x21   : > { %282 = sbr.rel (%p279_p10) target bundleno = 290 (0x122), region = 69 }
  0x26   : > { %s285_s30 = sand.u32 1, %s1062_s12   ;;  %p322_p11 = scmp.lt.s32.totalorder %s1070_s14, 1  ;;  %v1088_v8 = vmov 0.0  }
  0x27   : > { %s1161_s4 = smul.u32 24, %s285_s30  ;;  %s1163_s5 = sshll.u32 %s285_s30, 3  ;;  %340 = vst [vmem:[#allocation2] sm:$0x3] %v1088_v8 }
  0x28   : > { %s1166_s6 = scalar_select %p322_p11, %s1070_s14, 1 }
  0x29   : > { %s287_s20 = scalar_lea.vmem [#allocation3], %s1161_s4  ;;  %s1328_s23 = scalar_lea.vmem [#allocation4], %s1163_s5 }
  0x2a   : > { %s963_s7 = smul.u32 192, %s1166_s6  ;;  %s1332_s24 = smov 0  }
  0x2b   : > { %s964_s11 = smul.u32 3, %s1166_s6 }
  0x2c   : > { %s1172_s10 = scalar_lea.vmem %s1441_s1, %s963_s7 }
  0x2d   : > { %v1176_v10 = vld [vmem:[%s1172_s10 + $0x4] sm:$0xf]  ;;  %v1179_v11 = vld [vmem:[%s1172_s10] sm:$0xf]  ;;  %v1182_v12 = vld [vmem:[%s1172_s10 + $0x8] sm:$0xf]  ;;  %s330_s19 = scalar_lea.vmem %s1442_s2, %s964_s11 }
  0x2e   : > { %v379_v9 = vld [vmem:[#allocation2] sm:$0x3]   ;;  %1445 = vst [vmem:[#allocation5_spill] sm:$0xff] %v1176_v10  ;;  %v1185_v13 = vld [vmem:[%s1172_s10 + $0xc] sm:$0xf0] }
  0x2f   : > { %1446 = vst [vmem:[#allocation6_spill] sm:$0xff] %v1179_v11  ;;  %v1188_v14 = vld [vmem:[%s1172_s10 + $0x8] sm:$0xf0]  ;;  %v1191_v15 = vld [vmem:[%s1172_s10 + $0x10] sm:$0xf0] }
  0x30   : > { %1447 = vst [vmem:[#allocation7_spill] sm:$0xff] %v1182_v12  ;;  %v1194_v16 = vld [vmem:[%s1172_s10 + $0x1c] sm:$0xf]  ;;  %v1197_v17 = vld [vmem:[%s1172_s10 + $0x18] sm:$0xf] }
  0x31   : > { %1448 = vst [vmem:[#allocation8_spill] sm:$0xff] %v1185_v13  ;;  %v1200_v18 = vld [vmem:[%s1172_s10 + $0x20] sm:$0xf]  ;;  %v1203_v19 = vld [vmem:[%s1172_s10 + $0x24] sm:$0xf0] }
  0x32   : > { %1449 = vst [vmem:[#allocation9_spill] sm:$0xff] %v1188_v14  ;;  %v1206_v20 = vld [vmem:[%s1172_s10 + $0x20] sm:$0xf0]  ;;  %v1209_v21 = vld [vmem:[%s1172_s10 + $0x28] sm:$0xf0] }
  0x33   : > { %1450 = vst [vmem:[#allocation10_spill] sm:$0xff] %v1191_v15  ;;  %v1212_v22 = vld [vmem:[%s1172_s10 + $0x34] sm:$0xf]  ;;  %v1215_v23 = vld [vmem:[%s1172_s10 + $0x30] sm:$0xf] }
  0x34   : > { %1451 = vst [vmem:[#allocation11_spill] sm:$0xff] %v1194_v16  ;;  %v1218_v24 = vld [vmem:[%s1172_s10 + $0x38] sm:$0xf]  ;;  %v1221_v25 = vld [vmem:[%s1172_s10 + $0x3c] sm:$0xf0] }
  0x35   : > { %1452 = vst [vmem:[#allocation12_spill] sm:$0xff] %v1197_v17  ;;  %v1224_v26 = vld [vmem:[%s1172_s10 + $0x38] sm:$0xf0]  ;;  %v1227_v27 = vld [vmem:[%s1172_s10 + $0x40] sm:$0xf0] }
  0x36   : > { %v1230_v28 = vld [vmem:[%s1172_s10 + $0x4c] sm:$0xf]  ;;  %v1233_v29 = vld [vmem:[%s1172_s10 + $0x48] sm:$0xf]  ;;  %v1236_v30 = vld [vmem:[%s1172_s10 + $0x50] sm:$0xf] }
  0x37   : > { %v1239_v31 = vld [vmem:[%s1172_s10 + $0x54] sm:$0xf0]  ;;  %v1242_v32 = vld [vmem:[%s1172_s10 + $0x50] sm:$0xf0]  ;;  %v1245_v33 = vld [vmem:[%s1172_s10 + $0x58] sm:$0xf0] }
  0x38   : > { %v1248_v34 = vld [vmem:[%s1172_s10 + $0x64] sm:$0xf]  ;;  %v1251_v35 = vld [vmem:[%s1172_s10 + $0x60] sm:$0xf]  ;;  %v1254_v36 = vld [vmem:[%s1172_s10 + $0x68] sm:$0xf] }
  0x39   : > { %v1257_v37 = vld [vmem:[%s1172_s10 + $0x6c] sm:$0xf0]  ;;  %v1260_v38 = vld [vmem:[%s1172_s10 + $0x68] sm:$0xf0]  ;;  %v1263_v39 = vld [vmem:[%s1172_s10 + $0x70] sm:$0xf0] }
  0x3a   : > { %v1266_v40 = vld [vmem:[%s1172_s10 + $0x7c] sm:$0xf]  ;;  %v1269_v41 = vld [vmem:[%s1172_s10 + $0x78] sm:$0xf]  ;;  %v1272_v42 = vld [vmem:[%s1172_s10 + $0x80] sm:$0xf] }
  0x3b   : > { %v1275_v43 = vld [vmem:[%s1172_s10 + $0x84] sm:$0xf0]  ;;  %v1278_v44 = vld [vmem:[%s1172_s10 + $0x80] sm:$0xf0]  ;;  %v1281_v45 = vld [vmem:[%s1172_s10 + $0x88] sm:$0xf0] }
  0x3c   : > { %v1284_v46 = vld [vmem:[%s1172_s10 + $0x94] sm:$0xf]  ;;  %v1287_v47 = vld [vmem:[%s1172_s10 + $0x90] sm:$0xf]  ;;  %v1290_v48 = vld [vmem:[%s1172_s10 + $0x98] sm:$0xf] }
  0x3d   : > { %v1298_v49 = vld [vmem:[%s1172_s10 + $0x9c] sm:$0xf0]  ;;  %v1301_v50 = vld [vmem:[%s1172_s10 + $0x98] sm:$0xf0]  ;;  %v1304_v51 = vld [vmem:[%s1172_s10 + $0xa0] sm:$0xf0] }
  0x3e   : > { %v1307_v52 = vld [vmem:[%s1172_s10 + $0xac] sm:$0xf]  ;;  %v1310_v53 = vld [vmem:[%s1172_s10 + $0xa8] sm:$0xf]  ;;  %v1313_v54 = vld [vmem:[%s1172_s10 + $0xb0] sm:$0xf] }
  0x3f   : > { %v1316_v55 = vld [vmem:[%s1172_s10 + $0xb4] sm:$0xf0]  ;;  %v1319_v56 = vld [vmem:[%s1172_s10 + $0xb0] sm:$0xf0]  ;;  %v1322_v57 = vld [vmem:[%s1172_s10 + $0xb8] sm:$0xf0] }
  0x40   : > { %v1324_v58 = vld [vmem:[%s330_s19] sm:$0x7] }
  0x41 LB: >> { %v923_v59 = vor.u32 %v1319_v56, %v1310_v53  ;;  %v927_v60 = vor.u32 %v1307_v52, %v1316_v55  ;;  %v911_v61 = vor.u32 %v1301_v50, %v1287_v47  ;;  %v915_v62 = vor.u32 %v1284_v46, %v1298_v49  ;;  %v1453_v17 = vld [vmem:[#allocation12_spill] sm:$0xff]  ;;  %v1454_v16 = vld [vmem:[#allocation11_spill] sm:$0xff]  ;;  %v1455_v11 = vld [vmem:[#allocation6_spill] sm:$0xff]  ;;  %p387_p12 = scmp.eq.s32.totalorder %s1070_s14, 0  ;;  %s388_s25 = ssub.s32 7, %s1086_s24  ;;  %s1086_s24 = sphi %s1332_s24, %s385_s24   ;;  %v1082_v9 = vphi %v379_v9, %v1461_v9  }
  0x42   : >> { %v931_v63 = vor.u32 %v1322_v57, %v1313_v54  ;;  %v919_v0 = vor.u32 %v1304_v51, %v1290_v48  ;;  %v899_v1 = vor.u32 %v1278_v44, %v1269_v41  ;;  %v903_v2 = vor.u32 %v1266_v40, %v1275_v43  ;;  %v1456_v14 = vld [vmem:[#allocation9_spill] sm:$0xff]  ;;  %v1457_v13 = vld [vmem:[#allocation8_spill] sm:$0xff]  ;;  %v1459_v12 = vld [vmem:[#allocation7_spill] sm:$0xff] }
  0x43   : >> { %531 = vmatpush.bf16.msra.mxu0 %v923_v59  ;;  %544 = vmatpush.bf16.msra.mxu1 %v927_v60  ;;  %v907_v3 = vor.u32 %v1281_v45, %v1272_v42  ;;  %v887_v4 = vor.u32 %v1260_v38, %v1251_v35  ;;  %v891_v5 = vor.u32 %v1248_v34, %v1257_v37  ;;  %v1458_v10 = vld [vmem:[#allocation5_spill] sm:$0xff]  ;;  %v1460_v15 = vld [vmem:[#allocation10_spill] sm:$0xff]  ;;  %s1393_s26 = scalar_select %p387_p12, %s1086_s24, %s388_s25 }
  0x44   : >> { %557 = vmatpush.bf16.msra.mxu2 %v931_v63  ;;  %v895_v6 = vor.u32 %v1263_v39, %v1254_v36  ;;  %v875_v7 = vor.u32 %v1242_v32, %v1233_v29  ;;  %v879_v8 = vor.u32 %v1230_v28, %v1239_v31  ;;  %v883_v59 = vor.u32 %v1245_v33, %v1236_v30  ;;  %s385_s24 = sadd.s32 1, %s1086_s24  }
  0x45   : >> { %v863_v60 = vor.u32 %v1224_v26, %v1215_v23  ;;  %v851_v63 = vor.u32 %v1206_v20, %v1453_v17  ;;  %s391_s27 = smul.u32 3, %s1393_s26  ;;  %p622_p13 = scmp.lt.s32.totalorder %s1393_s26, 8 }
  0x46   : >> { %s628_s30 = scalar_lea.vmem %s1328_s23, %s1393_s26 [#allocation4]  ;;  %p382_p0 = scmp.ge.s32.totalorder %s385_s24, 8  }
  0x47   : >> { %532 = vmatpush.bf16.msra.mxu0 %v911_v61  ;;  %545 = vmatpush.bf16.msra.mxu1 %v915_v62  ;;  %v867_v61 = vor.u32 %v1212_v22, %v1221_v25  ;;  %v871_v62 = vor.u32 %v1227_v27, %v1218_v24  ;;  %s392_s28 = scalar_lea.vmem %s287_s20, %s391_s27 [#allocation3] }
  0x48   : >> { %558 = vmatpush.bf16.msra.mxu2 %v919_v0  ;;  %v855_v0 = vor.u32 %v1454_v16, %v1203_v19  ;;  %s623_s29 = scalar_select %p622_p13, 1, 0 }
  0x4b   : >> { %533 = vmatpush.bf16.msra.mxu0 %v899_v1  ;;  %546 = vmatpush.bf16.msra.mxu1 %v903_v2  ;;  %v859_v1 = vor.u32 %v1209_v21, %v1200_v18  ;;  %v839_v2 = vor.u32 %v1456_v14, %v1455_v11 }
  0x4c   : >> { %559 = vmatpush.bf16.msra.mxu2 %v907_v3  ;;  %v843_v3 = vor.u32 %v1458_v10, %v1457_v13 }
  0x4f   : >> { %534 = vmatpush.bf16.msra.mxu0 %v887_v4  ;;  %547 = vmatpush.bf16.msra.mxu1 %v891_v5  ;;  %v847_v4 = vor.u32 %v1460_v15, %v1459_v12  ;;  %v395_v5 = vpack.c.bf16 %v1082_v9, %v1082_v9 }
  0x50   : >> { %560 = vmatpush.bf16.msra.mxu2 %v895_v6  ;;  %v393_v6 = vld [vmem:[%s392_s28] sm:$0x7] }
  0x53   : >> { %535 = vmatpush.bf16.msra.mxu0 %v875_v7  ;;  %548 = vmatpush.bf16.msra.mxu1 %v879_v8  ;;  %v394_v7 = vunpack.c.l.bf16 %v393_v6  ;;  %v397_v8 = vperm.slane %v1324_v58, 0 }
  0x54   : >> { %561 = vmatpush.bf16.msra.mxu2 %v883_v59  ;;  %v398_v59 = vperm.slane %v1324_v58, 1 }
  0x57   : >> { %536 = vmatpush.bf16.msra.mxu0 %v863_v60  ;;  %549 = vmatpush.bf16.msra.mxu1 %v867_v61  ;;  %v591_v60 = vrot.slane %v394_v7, 2 }
  0x58   : >> { %562 = vmatpush.bf16.msra.mxu2 %v871_v62 }
  0x5b   : >> { %537 = vmatpush.bf16.msra.mxu0 %v851_v63  ;;  %550 = vmatpush.bf16.msra.mxu1 %v855_v0 }
  0x5c   : >> { %563 = vmatpush.bf16.msra.mxu2 %v859_v1 }
  0x5f   : >> { %538 = vmatpush.bf16.msra.mxu0 %v839_v2  ;;  %551 = vmatpush.bf16.msra.mxu1 %v843_v3 }
  0x60   : >> { %564 = vmatpush.bf16.msra.mxu2 %v847_v4 }
  0x62   : >> { %539 = vmatmul.bf16.vlgmr.msra.gmra.mxu0 %v395_v5  ;;  %552 = vmatmul.bf16.vlgmr.msra.gmra.mxu1 %v395_v5 }
  0x63   : >> { %565 = vmatmul.bf16.vlgmr.msra.gmra.mxu2 %v395_v5 }
  0xdf   : >> { %v540_v61 = vpop.f32.mrf.mxu0  ;;  %v553_v62 = vpop.f32.mrf.mxu1 }
  0xe0   : >> { %v541_v63 = vadd.f32 %v540_v61, %v397_v8  ;;  %v554_v0 = vadd.f32 %v553_v62, %v398_v59 }
  0xe2   : >> { %v570_v1 = vadd.f32 %v541_v63, %v394_v7  ;;  %v593_v2 = vadd.f32 %v591_v60, %v554_v0  ;;  %v399_v60 = vperm.slane %v1324_v58, 2 }
  0xe4   : >> { %v932_v3 = vmul.f32 -1.442695, %v570_v1  ;;  %v933_v4 = vmul.f32 -1.442695, %v593_v2 }
  0xe6   : >> { %1022 = vpow2.f32 %v932_v3  ;;  %v566_v11 = vpop.f32.mrf.mxu2 }
  0xe7   : >> { %1024 = vpow2.f32 %v933_v4  ;;  %v542_v5 = vpop.f32.mrf.mxu0  ;;  %v555_v10 = vpop.f32.mrf.mxu1  ;;  %v567_v2 = vadd.f32 %v566_v11, %v399_v60  ;;  %v614_v4 = vrot.slane %v394_v7, 4 }
  0xec   : >> { %v1023_v12 = vpop.eup %1022 }
  0xed   : >> { %v1025_v6 = vpop.eup %1024  ;;  %v574_v13 = vadd.f32 1.0, %v1023_v12 }
  0xee   : >> { %v597_v14 = vadd.f32 1.0, %v1025_v6  ;;  %v568_v15 = vpop.f32.mrf.mxu2 }
  0xef   : >> { %1026 = vrcp.f32 %v574_v13  ;;  %v586_v63 = vand.u32 2147483648, %v574_v13  ;;  %v584_v10 = vand.u32 2147483647, %v574_v13  ;;  %vm580_vm1 = vweird.f32 %v574_v13 }
  0xf0   : >> { %1028 = vrcp.f32 %v597_v14  ;;  %vm603_vm4 = vweird.f32 %v597_v14 }
  0xf1   : >> { %v587_v3 = vor.u32 1.1754944e-38, %v586_v63  ;;  %vm585_vm3 = vcmp.eq.f32.partialorder %v584_v10, 8.507059e+37 }
  0xf5   : >> { %v1027_v16 = vpop.eup %1026 }
  0xf6   : >> { %v1029_v17 = vpop.eup %1028  ;;  %v576_v8 = vmul.f32 %v1027_v16, %v574_v13  ;;  %vm581_vm0 = vweird.f32 %v1027_v16 }
  0xf7   : >> { %v599_v59 = vmul.f32 %v1029_v17, %v597_v14  ;;  %vm582_vm2 = vmor %vm580_vm1, %vm581_vm0  ;;  %vm604_vm5 = vweird.f32 %v1029_v17 }
  0xf8   : >> { %v577_v61 = vsub.f32 1.0, %v576_v8  ;;  %v609_v8 = vand.u32 2147483648, %v597_v14  ;;  %vm605_vm6 = vmor %vm603_vm4, %vm604_vm5 }
  0xf9   : >> { %v600_v62 = vsub.f32 1.0, %v599_v59 }
  0xfa   : >> { %v578_v0 = vmul.f32 %v1027_v16, %v577_v61  ;;  %v607_v61 = vand.u32 2147483647, %v597_v14  ;;  %v610_v60 = vor.u32 1.1754944e-38, %v609_v8 }
  0xfb   : >> { %v601_v1 = vmul.f32 %v1029_v17, %v600_v62 }
  0xfc   : >> { %v579_v12 = vadd.f32 %v1027_v16, %v578_v0  ;;  %vm608_vm7 = vcmp.eq.f32.partialorder %v607_v61, 8.507059e+37 }
  0xfd   : >> { %v602_v6 = vadd.f32 %v1029_v17, %v601_v1 }
  0xfe   : >> { %v583_v15 = vsel %vm582_vm2, %v1027_v16, %v579_v12  ;;  %v624_v16 = vstv %s623_s29 }
  0xff   : >> { %v588_v5 = vsel %vm585_vm3, %v587_v3, %v583_v15  ;;  %v606_v11 = vsel %vm605_vm6, %v1029_v17, %v602_v6  ;;  %vm625_vm8 = vcmp.eq.s32.totalorder %v624_v16, 1 }
 0x100   : >> { %v613_v59 = vmul.f32 %v588_v5, %v567_v2  ;;  %v611_v13 = vsel %vm608_vm7, %v610_v60, %v606_v11 }
 0x101   : >> { %v618_v7 = vsub.f32 1.0, %v611_v13  ;;  %v620_v10 = vmul.f32 %v1082_v9, %v611_v13 }
 0x102   : >> { %v616_v62 = vadd.f32 %v614_v4, %v613_v59 }
 0x104   : >> { %1030 = vtanh.f32 %v616_v62 }
 0x10a   : >> { %v1031_v63 = vpop.eup %1030 }
 0x10b   : >> { %v619_v0 = vmul.f32 %v1031_v63, %v618_v7 }
 0x10d   : >> { %v621_v1 = vadd.f32 %v620_v10, %v619_v0 }
 0x10e   : > { %384 = sbr.rel (!%p382_p0) target bundleno = 65 (0x41), region = 168 }
 0x10f   : >> { %v626_v14 = vsel %vm625_vm8, %v621_v1, %v1082_v9  }
 0x110   : >> { %v627_v2 = vpack.c.bf16 %v626_v14, %v626_v14  ;;  %v1461_v9 = vmov %v626_v14  ;;  %630 = vst [vmem:[#allocation2] sm:$0x3] (%p382_p0), %v626_v14 }
 0x112   : >> { %629 = vst [vmem:[%s628_s30] sm:$0x1] %v627_v2 }
 0x113   : > { %637 = sbr.rel (!%p1144_p6) target bundleno = 290 (0x122), region = 88  ;;  %s647_s7 = scalar_lea.vmem (%p1144_p6), %s1443_s3, %s1070_s14 }
 0x119   : > { %v664_v9 = vld [vmem:[%s1328_s23] sm:$0x1]  ;;  %v666_v17 = vld [vmem:[%s1328_s23 + $0x1] sm:$0x1]  ;;  %v668_v12 = vld [vmem:[%s1328_s23 + $0x2] sm:$0x1] }
 0x11a   : > { %665 = vst [vmem:[%s647_s7] sm:$0x1] %v664_v9  ;;  %v670_v18 = vld [vmem:[%s1328_s23 + $0x3] sm:$0x1]  ;;  %v672_v19 = vld [vmem:[%s1328_s23 + $0x4] sm:$0x1] }
 0x11b   : > { %667 = vst [vmem:[%s647_s7 + $0x2] sm:$0x1] %v666_v17  ;;  %v674_v20 = vld [vmem:[%s1328_s23 + $0x5] sm:$0x1]  ;;  %v676_v21 = vld [vmem:[%s1328_s23 + $0x6] sm:$0x1] }
 0x11c   : > { %669 = vst [vmem:[%s647_s7 + $0x4] sm:$0x1] %v668_v12  ;;  %v678_v22 = vld [vmem:[%s1328_s23 + $0x7] sm:$0x1] }
 0x11d   : > { %671 = vst [vmem:[%s647_s7 + $0x6] sm:$0x1] %v670_v18 }
 0x11e   : > { %673 = vst [vmem:[%s647_s7 + $0x8] sm:$0x1] %v672_v19 }
 0x11f   : > { %675 = vst [vmem:[%s647_s7 + $0xa] sm:$0x1] %v674_v20 }
 0x120   : > { %677 = vst [vmem:[%s647_s7 + $0xc] sm:$0x1] %v676_v21 }
 0x121   : > { %679 = vst [vmem:[%s647_s7 + $0xe] sm:$0x1] %v678_v22 }
 0x122 PF: > { %s13_s16 = sadd.s32 1, %s1078_s16   ;;  %s1462_s12 = smov %s1066_s13 }
 0x123   : > { %p10_p1 = scmp.ge.s32.totalorder %s13_s16, 4   ;;  %s1463_s13 = smov %s1149_s22 }
 0x124   : > { %s1464_s14 = smov %s1074_s15  ;;  %s1465_s15 = smov %s1467_s17 }
 0x125   :  { %12 = sbr.rel (!%p10_p1) target bundleno = 3 (0x3), region = 179 }

// kernel: forward.20
= control target key start
LH: loop header
LB: loop body
LE: loop exit
PB: predicated region body
PF: predicated region fallthrough
CT: control target
= control target key end

     0   :  { %s1250_s18 = smov 0   ;;  %s1252_s19 = smov 0   ;;  %s1499_s0 = inlined_call_operand.vmem [shape: bf16[16,256], index: 0, kind: input, shape index: {}]   ;;  %s1500_s1 = inlined_call_operand.vmem [shape: f32[1,256], index: 1, kind: input, shape index: {}]   ;;  %s1501_s2 = inlined_call_operand.vmem [shape: f32[1,256], index: 2, kind: input, shape index: {}]   ;;  %s1502_s3 = inlined_call_operand.vmem [shape: bf16[256,768], index: 3, kind: input, shape index: {}]   ;;  %s1503_s4 = inlined_call_operand.vmem [shape: f32[1,768], index: 4, kind: input, shape index: {}]   ;;  %s1504_s5 = inlined_call_operand.vmem [shape: bf16[16,768], index: 5, kind: output, shape index: {}]  }
   0x1   :  { %s1254_s20 = smov 0   ;;  %s1256_s21 = smov 0  }
   0x2   :  { %s1258_s22 = smov 0  }
   0x3 LB: > { %s24_s23 = sadd.s32 1, %s1214_s21  ;;  %s946_s24 = sadd.s32 4294967295, %s1218_s22   ;;  %s1218_s22 = sphi %s1258_s22, %s15_s22   ;;  %s1214_s21 = sphi %s1256_s21, %s1509_s21   ;;  %s1210_s20 = sphi %s1254_s20, %s1508_s20   ;;  %s1206_s19 = sphi %s1252_s19, %s1507_s19   ;;  %s1202_s18 = sphi %s1250_s18, %s1506_s18  }
   0x4   : > { %p25_p0 = scmp.ge.s32.totalorder %s24_s23, 3  ;;  %p109_p1 = scmp.ne.s32.totalorder %s1206_s19, %s1202_s18 }
   0x5   : > { %p110_p2 = scmp.eq.s32.totalorder %s1218_s22, 0  ;;  %p167_p4 = scmp.eq.s32.totalorder %s946_s24, 2 }
   0x6   : > { %s1511_s23 = smov (%p25_p0, %s24_s23), 0  ;;  %s102_s26 = sadd.s32 1, %s1206_s19 }
   0x7   : > { %p111_p3 = por %p110_p2, %p109_p1  ;;  %s99_s25 = ssub.s32 %s1214_s21, %s1511_s23 }
   0x8   : > { %p100_p5 = scmp.eq.s32.totalorder %s99_s25, 0  ;;  %p1285_p6 = por %p167_p4, %p109_p1 }
   0x9   : > { %p950_p7 = scmp.ge.s32.totalorder %s1218_s22, 3 }
   0xa   : > { %s1290_s28 = scalar_select %p100_p5, %s1206_s19, %s102_s26  }
   0xb   : > { %205 = sbr.rel (%p950_p7) target bundleno = 52 (0x34), region = 28 }
  0x10   : > { %208 = sbr.rel (!%p111_p3) target bundleno = 52 (0x34), region = 32  ;;  %s210_s29 = sand.u32 (%p111_p3), 1, %s1206_s19  }
  0x11   : > { %s1100_s30 = sshll.u32 (%p111_p3), %s1214_s21, 3  ;;  %s951_s6 = sshll.u32 (%p111_p3), %s210_s29, 8 }
  0x12   : > { %s1298_s9 = scalar_lea.vmem (%p111_p3), %s1502_s3, %s1100_s30  ;;  %s1303_s10 = scalar_lea.vmem (%p111_p3), [#allocation3], %s951_s6 }
  0x13   : > { %v306_v0 = vld [vmem:[%s1298_s9] sm:$0xff] (%p111_p3)  ;;  %v308_v1 = vld [vmem:[%s1298_s9 + $0x18] sm:$0xff] (%p111_p3)  ;;  %v310_v2 = vld [vmem:[%s1298_s9 + $0x30] sm:$0xff] (%p111_p3) }
  0x14   : > { %307 = vst [vmem:[%s1303_s10] sm:$0xff] (%p111_p3), %v306_v0  ;;  %v312_v3 = vld [vmem:[%s1298_s9 + $0x48] sm:$0xff] (%p111_p3)  ;;  %v314_v4 = vld [vmem:[%s1298_s9 + $0x60] sm:$0xff] (%p111_p3)  ;;  %v316_v5 = vld [vmem:[%s1298_s9 + $0x78] sm:$0xff] (%p111_p3) }
  0x15   : > { %309 = vst [vmem:[%s1303_s10 + $0x8] sm:$0xff] %v308_v1  ;;  %v318_v6 = vld [vmem:[%s1298_s9 + $0x90] sm:$0xff]  ;;  %v320_v7 = vld [vmem:[%s1298_s9 + $0xa8] sm:$0xff]  ;;  %v322_v8 = vld [vmem:[%s1298_s9 + $0xc0] sm:$0xff] }
  0x16   : > { %311 = vst [vmem:[%s1303_s10 + $0x10] sm:$0xff] %v310_v2  ;;  %v324_v9 = vld [vmem:[%s1298_s9 + $0xd8] sm:$0xff]  ;;  %v326_v10 = vld [vmem:[%s1298_s9 + $0xf0] sm:$0xff]  ;;  %v328_v11 = vld [vmem:[%s1298_s9 + $0x108] sm:$0xff] }
  0x17   : > { %313 = vst [vmem:[%s1303_s10 + $0x18] sm:$0xff] %v312_v3  ;;  %v330_v12 = vld [vmem:[%s1298_s9 + $0x120] sm:$0xff]  ;;  %v332_v13 = vld [vmem:[%s1298_s9 + $0x138] sm:$0xff]  ;;  %v334_v14 = vld [vmem:[%s1298_s9 + $0x150] sm:$0xff] }
  0x18   : > { %315 = vst [vmem:[%s1303_s10 + $0x20] sm:$0xff] %v314_v4  ;;  %v336_v15 = vld [vmem:[%s1298_s9 + $0x168] sm:$0xff]  ;;  %v338_v16 = vld [vmem:[%s1298_s9 + $0x180] sm:$0xff]  ;;  %v340_v17 = vld [vmem:[%s1298_s9 + $0x198] sm:$0xff] }
  0x19   : > { %317 = vst [vmem:[%s1303_s10 + $0x28] sm:$0xff] %v316_v5  ;;  %v342_v18 = vld [vmem:[%s1298_s9 + $0x1b0] sm:$0xff]  ;;  %v344_v19 = vld [vmem:[%s1298_s9 + $0x1c8] sm:$0xff]  ;;  %v346_v20 = vld [vmem:[%s1298_s9 + $0x1e0] sm:$0xff] }
  0x1a   : > { %319 = vst [vmem:[%s1303_s10 + $0x30] sm:$0xff] %v318_v6  ;;  %v348_v21 = vld [vmem:[%s1298_s9 + $0x1f8] sm:$0xff]  ;;  %v350_v22 = vld [vmem:[%s1298_s9 + $0x210] sm:$0xff]  ;;  %v352_v23 = vld [vmem:[%s1298_s9 + $0x228] sm:$0xff] }
  0x1b   : > { %321 = vst [vmem:[%s1303_s10 + $0x38] sm:$0xff] %v320_v7  ;;  %v354_v24 = vld [vmem:[%s1298_s9 + $0x240] sm:$0xff]  ;;  %v356_v25 = vld [vmem:[%s1298_s9 + $0x258] sm:$0xff]  ;;  %v358_v26 = vld [vmem:[%s1298_s9 + $0x270] sm:$0xff] }
  0x1c   : > { %323 = vst [vmem:[%s1303_s10 + $0x40] sm:$0xff] %v322_v8  ;;  %v360_v27 = vld [vmem:[%s1298_s9 + $0x288] sm:$0xff]  ;;  %v362_v28 = vld [vmem:[%s1298_s9 + $0x2a0] sm:$0xff]  ;;  %v364_v29 = vld [vmem:[%s1298_s9 + $0x2b8] sm:$0xff] }
  0x1d   : > { %325 = vst [vmem:[%s1303_s10 + $0x48] sm:$0xff] %v324_v9  ;;  %v366_v30 = vld [vmem:[%s1298_s9 + $0x2d0] sm:$0xff]  ;;  %v368_v31 = vld [vmem:[%s1298_s9 + $0x2e8] sm:$0xff] }
  0x1e   : > { %327 = vst [vmem:[%s1303_s10 + $0x50] sm:$0xff] %v326_v10 }
  0x1f   : > { %329 = vst [vmem:[%s1303_s10 + $0x58] sm:$0xff] %v328_v11 }
  0x20   : > { %331 = vst [vmem:[%s1303_s10 + $0x60] sm:$0xff] %v330_v12 }
  0x21   : > { %333 = vst [vmem:[%s1303_s10 + $0x68] sm:$0xff] %v332_v13 }
  0x22   : > { %335 = vst [vmem:[%s1303_s10 + $0x70] sm:$0xff] %v334_v14 }
  0x23   : > { %337 = vst [vmem:[%s1303_s10 + $0x78] sm:$0xff] %v336_v15 }
  0x24   : > { %339 = vst [vmem:[%s1303_s10 + $0x80] sm:$0xff] %v338_v16 }
  0x25   : > { %341 = vst [vmem:[%s1303_s10 + $0x88] sm:$0xff] %v340_v17 }
  0x26   : > { %343 = vst [vmem:[%s1303_s10 + $0x90] sm:$0xff] %v342_v18 }
  0x27   : > { %345 = vst [vmem:[%s1303_s10 + $0x98] sm:$0xff] %v344_v19 }
  0x28   : > { %347 = vst [vmem:[%s1303_s10 + $0xa0] sm:$0xff] %v346_v20 }
  0x29   : > { %349 = vst [vmem:[%s1303_s10 + $0xa8] sm:$0xff] %v348_v21 }
  0x2a   : > { %351 = vst [vmem:[%s1303_s10 + $0xb0] sm:$0xff] %v350_v22 }
  0x2b   : > { %353 = vst [vmem:[%s1303_s10 + $0xb8] sm:$0xff] %v352_v23 }
  0x2c   : > { %355 = vst [vmem:[%s1303_s10 + $0xc0] sm:$0xff] %v354_v24 }
  0x2d   : > { %357 = vst [vmem:[%s1303_s10 + $0xc8] sm:$0xff] %v356_v25 }
  0x2e   : > { %359 = vst [vmem:[%s1303_s10 + $0xd0] sm:$0xff] %v358_v26 }
  0x2f   : > { %361 = vst [vmem:[%s1303_s10 + $0xd8] sm:$0xff] %v360_v27 }
  0x30   : > { %363 = vst [vmem:[%s1303_s10 + $0xe0] sm:$0xff] %v362_v28 }
  0x31   : > { %365 = vst [vmem:[%s1303_s10 + $0xe8] sm:$0xff] %v364_v29 }
  0x32   : > { %367 = vst [vmem:[%s1303_s10 + $0xf0] sm:$0xff] %v366_v30 }
  0x33   : > { %369 = vst [vmem:[%s1303_s10 + $0xf8] sm:$0xff] %v368_v31 }
  0x34 PF: > { %p954_p8 = scmp.ge.s32.totalorder %s1218_s22, 1  ;;  %p382_p9 = scmp.lt.s32.totalorder %s1218_s22, 4 }
  0x36   : > { %p383_p10 = pnand %p954_p8, %p382_p9 }
  0x37   : > { %s389_s11 = sand.u32 (!%p383_p10), 1, %s1202_s18   ;;  %s957_s12 = sshll.u32 (!%p383_p10), %s1210_s20, 1 }
  0x38   : > { %386 = sbr.rel (%p383_p10) target bundleno = 424 (0x1a8), region = 74  ;;  %s955_s13 = sshll.u32 (!%p383_p10), %s389_s11, 8 }
  0x39   : > { %s956_s14 = sshll.u32 (!%p383_p10), %s389_s11, 4  ;;  %p434_p11 = scmp.lt.s32.totalorder (!%p383_p10), %s957_s12, 5 }
  0x3a   : > { %s1376_s24 = scalar_lea.vmem (!%p383_p10), [#allocation3], %s955_s13  ;;  %s1378_s25 = scalar_lea.vmem (!%p383_p10), [#allocation4], %s956_s14 }
  0x3b   : > { %p958_p12 = scmp.ne.s32.totalorder (!%p383_p10), %s1210_s20, 0 }
  0x3d   : > { %s1513_s12 = smov (!%p434_p11, %s957_s12), 5  ;;  %443 = sbr.rel (%p958_p12) target bundleno = 234 (0xea), region = 82 }
  0x3e   : > { %s436_s17 = scalar_lea.vmem %s1503_s4, %s1513_s12 }
  0x42   : > { %v444_v32 = vld [vmem:[%s1499_s0] sm:$0xff]  ;;  %v445_v33 = vld [vmem:[%s1499_s0 + $0x8] sm:$0xff] }
  0x43   : > { %v446_v34 = vunpack.c.l.bf16 %v444_v32  ;;  %v447_v35 = vunpack.c.h.bf16 %v444_v32  ;;  %v1387_v36 = vunpack.c.l.bf16 %v445_v33  ;;  %v1389_v40 = vunpack.c.h.bf16 %v445_v33  ;;  %v506_v2 = vld [vmem:[%s1500_s1] sm:$0x3] }
  0x44   : > { %v516_v4 = vld [vmem:[%s1501_s2] sm:$0x3]  ;;  %v508_v6 = vperm.slane %v506_v2, 0  ;;  %v509_v10 = vperm.slane %v506_v2, 1 }
  0x45   : > { %v450_v37 = vadd.f32 %v447_v35, %v446_v34  ;;  %v456_v38 = vmul.f32 %v446_v34, %v446_v34  ;;  %v457_v39 = vmul.f32 %v447_v35, %v447_v35  ;;  %v458_v42 = vmul.f32 %v1387_v36, %v1387_v36 }
  0x46   : > { %v459_v43 = vmul.f32 %v1389_v40, %v1389_v40  ;;  %v453_v44 = vadd.f32 %v1389_v40, %v1387_v36  ;;  %v518_v12 = vperm.slane %v516_v4, 0  ;;  %v519_v14 = vperm.slane %v516_v4, 1 }
  0x47   : > { %451 = vadd.xlane.f32.xlu0 %v450_v37  ;;  %v460_v41 = vadd.f32 %v457_v39, %v456_v38 }
  0x48   : > { %v463_v45 = vadd.f32 %v459_v43, %v458_v42 }
  0x49   : > { %461 = vadd.xlane.f32.xlu1 %v460_v41 }
  0x4f   : > { %454 = vadd.xlane.f32.xlu0 %v453_v44 }
  0x51   : > { %464 = vadd.xlane.f32.xlu1 %v463_v45 }
  0xba   : > { %v452_v46 = vpop.xlane.xlu0 %451 }
  0xbb   : > { %v466_v47 = vmul.f32 0.015625, %v452_v46 }
  0xbc   : > { %v462_v48 = vpop.xlane.xlu1 %461 }
  0xbd   : > { %v468_v49 = vmul.f32 0.015625, %v462_v48  ;;  %v470_v50 = vmul.f32 %v466_v47, %v466_v47  ;;  %v498_v8 = vsub.f32 %v446_v34, %v466_v47  ;;  %v499_v9 = vsub.f32 %v447_v35, %v466_v47 }
  0xbf   : > { %v472_v51 = vsub.f32 %v468_v49, %v470_v50 }
  0xc1   : > { %v474_v52 = vmax.f32 %v472_v51, 0.0 }
  0xc2   : > { %v455_v53 = vpop.xlane.xlu0 %454 }
  0xc3   : > { %v476_v54 = vadd.f32 1e-05, %v474_v52  ;;  %v467_v55 = vmul.f32 0.015625, %v455_v53 }
  0xc4   : > { %v465_v56 = vpop.xlane.xlu1 %464 }
  0xc5   : > { %1176 = vrsqrt.f32 %v476_v54  ;;  %v469_v57 = vmul.f32 0.015625, %v465_v56  ;;  %v471_v58 = vmul.f32 %v467_v55, %v467_v55  ;;  %vm484_vm1 = vweird.f32 %v476_v54 }
  0xc6   : > { %v500_v27 = vsub.f32 %v1387_v36, %v467_v55  ;;  %v501_v28 = vsub.f32 %v1389_v40, %v467_v55 }
  0xc7   : > { %v473_v59 = vsub.f32 %v469_v57, %v471_v58 }
  0xc9   : > { %v475_v60 = vmax.f32 %v473_v59, 0.0 }
  0xcb   : > { %v1177_v61 = vpop.eup %1176  ;;  %v477_v63 = vadd.f32 1e-05, %v475_v60 }
  0xcc   : > { %v479_v62 = vmul.f32 %v1177_v61, %v476_v54  ;;  %vm485_vm0 = vweird.f32 %v1177_v61 }
  0xcd   : > { %1178 = vrsqrt.f32 %v477_v63  ;;  %vm486_vm2 = vmor %vm484_vm1, %vm485_vm0  ;;  %vm494_vm4 = vweird.f32 %v477_v63 }
  0xce   : > { %v480_v0 = vmul.f32 %v1177_v61, %v479_v62 }
  0xd0   : > { %v481_v1 = vmul.f32 0.5, %v480_v0 }
  0xd2   : > { %v482_v3 = vsub.f32 1.5, %v481_v1 }
  0xd3   : > { %v1179_v5 = vpop.eup %1178 }
  0xd4   : > { %v483_v7 = vmul.f32 %v1177_v61, %v482_v3  ;;  %v489_v11 = vmul.f32 %v1179_v5, %v477_v63  ;;  %vm495_vm3 = vweird.f32 %v1179_v5 }
  0xd5   : > { %vm496_vm5 = vmor %vm494_vm4, %vm495_vm3 }
  0xd6   : > { %v487_v13 = vsel %vm486_vm2, %v1177_v61, %v483_v7  ;;  %v490_v17 = vmul.f32 %v1179_v5, %v489_v11 }
  0xd7   : > { %v502_v15 = vmul.f32 %v498_v8, %v487_v13  ;;  %v503_v16 = vmul.f32 %v499_v9, %v487_v13 }
  0xd8   : > { %v491_v20 = vmul.f32 0.5, %v490_v17 }
  0xd9   : > { %v512_v18 = vmul.f32 %v508_v6, %v502_v15  ;;  %v513_v19 = vmul.f32 %v509_v10, %v503_v16 }
  0xda   : > { %v492_v23 = vsub.f32 1.5, %v491_v20 }
  0xdb   : > { %v522_v21 = vadd.f32 %v518_v12, %v512_v18  ;;  %v523_v22 = vadd.f32 %v519_v14, %v513_v19 }
  0xdc   : > { %v493_v26 = vmul.f32 %v1179_v5, %v492_v23 }
  0xdd   : > { %v526_v24 = vmax.f32 %v522_v21, 0.0  ;;  %v527_v25 = vmax.f32 %v523_v22, 0.0 }
  0xde   : > { %v497_v30 = vsel %vm496_vm5, %v1179_v5, %v493_v26 }
  0xdf   : > { %v530_v29 = vpack.c.bf16 %v527_v25, %v526_v24  ;;  %v504_v31 = vmul.f32 %v500_v27, %v497_v30  ;;  %v505_v32 = vmul.f32 %v501_v28, %v497_v30 }
  0xe1   : > { %532 = vst [vmem:[#allocation2] sm:$0xff] %v530_v29  ;;  %v514_v33 = vmul.f32 %v508_v6, %v504_v31  ;;  %v515_v34 = vmul.f32 %v509_v10, %v505_v32 }
  0xe3   : > { %v524_v35 = vadd.f32 %v518_v12, %v514_v33  ;;  %v525_v37 = vadd.f32 %v519_v14, %v515_v34 }
  0xe5   : > { %v528_v38 = vmax.f32 %v524_v35, 0.0  ;;  %v529_v39 = vmax.f32 %v525_v37, 0.0 }
  0xe7   : > { %v531_v41 = vpack.c.bf16 %v529_v39, %v528_v38 }
  0xe9   : > { %533 = vst [vmem:[#allocation2 + $0x8] sm:$0xff] %v531_v41 }
  0xea PF: > { %v1025_v36 = vld [vmem:[%s1376_s24 + $0x70] sm:$0xf]  ;;  %v1118_v40 = vld [vmem:[%s1376_s24 + $0x74] sm:$0xf0]  ;;  %v1117_v45 = vld [vmem:[%s1376_s24 + $0x74] sm:$0xf] }
  0xeb   : > { %v1089_v42 = vld [vmem:[%s1376_s24 + $0xf0] sm:$0xf]  ;;  %v1026_v43 = vor.u32 %v1118_v40, %v1025_v36  ;;  %v1134_v44 = vld [vmem:[%s1376_s24 + $0xf4] sm:$0xf0]  ;;  %v1027_v46 = vld [vmem:[%s1376_s24 + $0x78] sm:$0xf0] }
  0xec   : > { %v1090_v47 = vor.u32 %v1134_v44, %v1089_v42  ;;  %v1030_v48 = vor.u32 %v1117_v45, %v1027_v46  ;;  %v1133_v49 = vld [vmem:[%s1376_s24 + $0xf4] sm:$0xf]  ;;  %v1091_v50 = vld [vmem:[%s1376_s24 + $0xf8] sm:$0xf0]  ;;  %v1017_v51 = vld [vmem:[%s1376_s24 + $0x60] sm:$0xf] }
  0xed   : > { %744 = vmatpush.bf16.msra.mxu0 %v1026_v43  ;;  %v1094_v52 = vor.u32 %v1133_v49, %v1091_v50  ;;  %v1116_v53 = vld [vmem:[%s1376_s24 + $0x64] sm:$0xf0]  ;;  %v1081_v54 = vld [vmem:[%s1376_s24 + $0xe0] sm:$0xf]  ;;  %v1115_v58 = vld [vmem:[%s1376_s24 + $0x64] sm:$0xf] }
  0xee   : > { %v1132_v55 = vld [vmem:[%s1376_s24 + $0xe4] sm:$0xf0]  ;;  %758 = vmatpush.bf16.msra.mxu1 %v1090_v47  ;;  %772 = vmatpush.bf16.msra.mxu2 %v1030_v48  ;;  %v1018_v56 = vor.u32 %v1116_v53, %v1017_v51  ;;  %v1019_v59 = vld [vmem:[%s1376_s24 + $0x68] sm:$0xf0]  ;;  %v1131_v60 = vld [vmem:[%s1376_s24 + $0xe4] sm:$0xf] }
  0xef   : > { %v1082_v57 = vor.u32 %v1132_v55, %v1081_v54  ;;  %786 = vmatpush.bf16.msra.mxu3 %v1094_v52  ;;  %v1022_v61 = vor.u32 %v1115_v58, %v1019_v59  ;;  %v1083_v62 = vld [vmem:[%s1376_s24 + $0xe8] sm:$0xf0]  ;;  %v1009_v63 = vld [vmem:[%s1376_s24 + $0x50] sm:$0xf]  ;;  %v1114_v0 = vld [vmem:[%s1376_s24 + $0x54] sm:$0xf0] }
  0xf0   : > { %v1086_v1 = vor.u32 %v1131_v60, %v1083_v62  ;;  %v1073_v2 = vld [vmem:[%s1376_s24 + $0xd0] sm:$0xf]  ;;  %v1130_v3 = vld [vmem:[%s1376_s24 + $0xd4] sm:$0xf0]  ;;  %v1113_v4 = vld [vmem:[%s1376_s24 + $0x54] sm:$0xf]  ;;  %v1010_v5 = vor.u32 %v1114_v0, %v1009_v63 }
  0xf1   : > { %745 = vmatpush.bf16.msra.mxu0 %v1018_v56  ;;  %v1011_v6 = vld [vmem:[%s1376_s24 + $0x58] sm:$0xf0]  ;;  %v1129_v7 = vld [vmem:[%s1376_s24 + $0xd4] sm:$0xf]  ;;  %v1074_v9 = vor.u32 %v1130_v3, %v1073_v2  ;;  %v1001_v11 = vld [vmem:[%s1376_s24 + $0x40] sm:$0xf] }
  0xf2   : > { %v1075_v8 = vld [vmem:[%s1376_s24 + $0xd8] sm:$0xf0]  ;;  %759 = vmatpush.bf16.msra.mxu1 %v1082_v57  ;;  %773 = vmatpush.bf16.msra.mxu2 %v1022_v61  ;;  %v1014_v10 = vor.u32 %v1113_v4, %v1011_v6  ;;  %v1112_v12 = vld [vmem:[%s1376_s24 + $0x44] sm:$0xf0]  ;;  %v1065_v13 = vld [vmem:[%s1376_s24 + $0xc0] sm:$0xf] }
  0xf3   : > { %787 = vmatpush.bf16.msra.mxu3 %v1086_v1  ;;  %v1078_v14 = vor.u32 %v1129_v7, %v1075_v8  ;;  %v1128_v15 = vld [vmem:[%s1376_s24 + $0xc4] sm:$0xf0]  ;;  %v1111_v16 = vld [vmem:[%s1376_s24 + $0x44] sm:$0xf]  ;;  %v1003_v17 = vld [vmem:[%s1376_s24 + $0x48] sm:$0xf0]  ;;  %v1002_v20 = vor.u32 %v1112_v12, %v1001_v11 }
  0xf4   : > { %v1127_v18 = vld [vmem:[%s1376_s24 + $0xc4] sm:$0xf]  ;;  %v1067_v19 = vld [vmem:[%s1376_s24 + $0xc8] sm:$0xf0]  ;;  %v1066_v21 = vor.u32 %v1128_v15, %v1065_v13  ;;  %v1006_v22 = vor.u32 %v1111_v16, %v1003_v17  ;;  %v993_v23 = vld [vmem:[%s1376_s24 + $0x30] sm:$0xf] }
  0xf5   : > { %746 = vmatpush.bf16.msra.mxu0 %v1010_v5  ;;  %v1110_v24 = vld [vmem:[%s1376_s24 + $0x34] sm:$0xf0]  ;;  %v1057_v25 = vld [vmem:[%s1376_s24 + $0xb0] sm:$0xf]  ;;  %v1070_v26 = vor.u32 %v1127_v18, %v1067_v19  ;;  %v1109_v28 = vld [vmem:[%s1376_s24 + $0x34] sm:$0xf] }
  0xf6   : > { %760 = vmatpush.bf16.msra.mxu1 %v1074_v9  ;;  %774 = vmatpush.bf16.msra.mxu2 %v1014_v10  ;;  %v1126_v27 = vld [vmem:[%s1376_s24 + $0xb4] sm:$0xf0]  ;;  %v995_v29 = vld [vmem:[%s1376_s24 + $0x38] sm:$0xf0]  ;;  %v1125_v30 = vld [vmem:[%s1376_s24 + $0xb4] sm:$0xf]  ;;  %v994_v32 = vor.u32 %v1110_v24, %v993_v23 }
  0xf7   : > { %788 = vmatpush.bf16.msra.mxu3 %v1078_v14  ;;  %v1059_v31 = vld [vmem:[%s1376_s24 + $0xb8] sm:$0xf0]  ;;  %v1058_v33 = vor.u32 %v1126_v27, %v1057_v25  ;;  %v998_v34 = vor.u32 %v1109_v28, %v995_v29  ;;  %v985_v35 = vld [vmem:[%s1376_s24 + $0x20] sm:$0xf]  ;;  %v1108_v37 = vld [vmem:[%s1376_s24 + $0x24] sm:$0xf0] }
  0xf8   : > { %v1049_v38 = vld [vmem:[%s1376_s24 + $0xa0] sm:$0xf]  ;;  %v1062_v39 = vor.u32 %v1125_v30, %v1059_v31  ;;  %v1124_v41 = vld [vmem:[%s1376_s24 + $0xa4] sm:$0xf0]  ;;  %v1107_v36 = vld [vmem:[%s1376_s24 + $0x24] sm:$0xf]  ;;  %v986_v44 = vor.u32 %v1108_v37, %v985_v35 }
  0xf9   : > { %747 = vmatpush.bf16.msra.mxu0 %v1002_v20  ;;  %v987_v40 = vld [vmem:[%s1376_s24 + $0x28] sm:$0xf0]  ;;  %v1123_v42 = vld [vmem:[%s1376_s24 + $0xa4] sm:$0xf]  ;;  %v1050_v45 = vor.u32 %v1124_v41, %v1049_v38  ;;  %v977_v47 = vld [vmem:[%s1376_s24 + $0x10] sm:$0xf] }
  0xfa   : > { %761 = vmatpush.bf16.msra.mxu1 %v1066_v21  ;;  %775 = vmatpush.bf16.msra.mxu2 %v1006_v22  ;;  %v1051_v43 = vld [vmem:[%s1376_s24 + $0xa8] sm:$0xf0]  ;;  %v990_v46 = vor.u32 %v1107_v36, %v987_v40  ;;  %v1106_v48 = vld [vmem:[%s1376_s24 + $0x14] sm:$0xf0]  ;;  %v1041_v49 = vld [vmem:[%s1376_s24 + $0x90] sm:$0xf] }
  0xfb   : > { %789 = vmatpush.bf16.msra.mxu3 %v1070_v26  ;;  %v1054_v50 = vor.u32 %v1123_v42, %v1051_v43  ;;  %v1122_v51 = vld [vmem:[%s1376_s24 + $0x94] sm:$0xf0]  ;;  %v1105_v52 = vld [vmem:[%s1376_s24 + $0x14] sm:$0xf]  ;;  %v979_v53 = vld [vmem:[%s1376_s24 + $0x18] sm:$0xf0]  ;;  %v978_v56 = vor.u32 %v1106_v48, %v977_v47 }
  0xfc   : > { %v1121_v54 = vld [vmem:[%s1376_s24 + $0x94] sm:$0xf]  ;;  %v1043_v55 = vld [vmem:[%s1376_s24 + $0x98] sm:$0xf0]  ;;  %v1042_v57 = vor.u32 %v1122_v51, %v1041_v49  ;;  %v982_v58 = vor.u32 %v1105_v52, %v979_v53  ;;  %v969_v59 = vld [vmem:[%s1376_s24] sm:$0xf] }
  0xfd   : > { %748 = vmatpush.bf16.msra.mxu0 %v994_v32  ;;  %v1104_v60 = vld [vmem:[%s1376_s24 + $0x4] sm:$0xf0]  ;;  %v1033_v61 = vld [vmem:[%s1376_s24 + $0x80] sm:$0xf]  ;;  %v1046_v62 = vor.u32 %v1121_v54, %v1043_v55  ;;  %v1103_v0 = vld [vmem:[%s1376_s24 + $0x4] sm:$0xf] }
  0xfe   : > { %762 = vmatpush.bf16.msra.mxu1 %v1058_v33  ;;  %776 = vmatpush.bf16.msra.mxu2 %v998_v34  ;;  %v1120_v63 = vld [vmem:[%s1376_s24 + $0x84] sm:$0xf0]  ;;  %v971_v1 = vld [vmem:[%s1376_s24 + $0x8] sm:$0xf0]  ;;  %v1119_v2 = vld [vmem:[%s1376_s24 + $0x84] sm:$0xf]  ;;  %v970_v4 = vor.u32 %v1104_v60, %v969_v59 }
  0xff   : > { %790 = vmatpush.bf16.msra.mxu3 %v1062_v39  ;;  %v1035_v3 = vld [vmem:[%s1376_s24 + $0x88] sm:$0xf0]  ;;  %v961_v5 = vld [vmem:[#allocation2] sm:$0xf]  ;;  %v1102_v6 = vld [vmem:[#allocation2 + $0x4] sm:$0xf0]  ;;  %v1034_v7 = vor.u32 %v1120_v63, %v1033_v61  ;;  %v974_v8 = vor.u32 %v1103_v0, %v971_v1 }
 0x100   : > { %v1101_v9 = vld [vmem:[#allocation2 + $0x4] sm:$0xf]  ;;  %v963_v10 = vld [vmem:[#allocation2 + $0x8] sm:$0xf0]  ;;  %v1038_v11 = vor.u32 %v1119_v2, %v1035_v3  ;;  %v962_v12 = vor.u32 %v1102_v6, %v961_v5  ;;  %v568_v14 = vld [vmem:[%s436_s17] sm:$0x3] }
 0x101   : > { %749 = vmatpush.bf16.msra.mxu0 %v986_v44  ;;  %v966_v13 = vor.u32 %v1101_v9, %v963_v10  ;;  %v570_v15 = vperm.slane %v568_v14, 0  ;;  %v571_v18 = vperm.slane %v568_v14, 1  ;;  %s1135_s12 = sshll.u32 (%p1285_p6), %s1210_s20, 3 }
 0x102   : > { %763 = vmatpush.bf16.msra.mxu1 %v1050_v45  ;;  %777 = vmatpush.bf16.msra.mxu2 %v990_v46  ;;  %s816_s15 = scalar_lea.vmem (%p1285_p6), %s1504_s5, %s1135_s12 }
 0x103   : > { %791 = vmatpush.bf16.msra.mxu3 %v1054_v50 }
 0x105   : > { %750 = vmatpush.bf16.msra.mxu0 %v978_v56 }
 0x106   : > { %764 = vmatpush.bf16.msra.mxu1 %v1042_v57  ;;  %778 = vmatpush.bf16.msra.mxu2 %v982_v58 }
 0x107   : > { %792 = vmatpush.bf16.msra.mxu3 %v1046_v62 }
 0x109   : > { %751 = vmatpush.bf16.msra.mxu0 %v970_v4 }
 0x10a   : > { %765 = vmatpush.bf16.msra.mxu1 %v1034_v7  ;;  %779 = vmatpush.bf16.msra.mxu2 %v974_v8 }
 0x10b   : > { %793 = vmatpush.bf16.msra.mxu3 %v1038_v11 }
 0x10c   : > { %752 = vmatmul.bf16.vlgmr.msra.gmra.mxu0 %v962_v12 }
 0x10d   : > { %766 = vmatmul.bf16.vlgmr.msra.gmra.mxu1 %v966_v13  ;;  %780 = vmatmul.bf16.vlgmr.msra.gmra.mxu2 %v962_v12 }
 0x10e   : > { %794 = vmatmul.bf16.vlgmr.msra.gmra.mxu3 %v966_v13 }
 0x189   : > { %v753_v16 = vpop.f32.mrf.mxu0 }
 0x18a   : > { %v754_v17 = vadd.f32 %v753_v16, %v570_v15  ;;  %v767_v19 = vpop.f32.mrf.mxu1 }
 0x18c   : > { %v768_v21 = vadd.f32 %v767_v19, %v754_v17 }
 0x190   : > { %v781_v20 = vpop.f32.mrf.mxu2 }
 0x191   : > { %v782_v22 = vadd.f32 %v781_v20, %v571_v18  ;;  %v795_v23 = vpop.f32.mrf.mxu3  ;;  %v755_v25 = vpop.f32.mrf.mxu0 }
 0x192   : > { %v756_v27 = vadd.f32 %v755_v25, %v570_v15  ;;  %v769_v30 = vpop.f32.mrf.mxu1 }
 0x193   : > { %v796_v24 = vadd.f32 %v795_v23, %v782_v22 }
 0x194   : > { %v770_v32 = vadd.f32 %v769_v30, %v756_v27 }
 0x195   : > { %v800_v26 = vpack.c.bf16 %v796_v24, %v768_v21 }
 0x197   : > { %802 = vst [vmem:[%s1378_s25] sm:$0xff] %v800_v26 }
 0x198   : > { %v783_v28 = vpop.f32.mrf.mxu2 }
 0x199   : > { %v784_v29 = vadd.f32 %v783_v28, %v571_v18  ;;  %v797_v31 = vpop.f32.mrf.mxu3 }
 0x19b   : > { %v798_v33 = vadd.f32 %v797_v31, %v784_v29  ;;  %810 = sbr.rel (!%p1285_p6) target bundleno = 424 (0x1a8), region = 86 }
 0x19d   : > { %v801_v34 = vpack.c.bf16 %v798_v33, %v770_v32 }
 0x19e   : > { %v847_v35 = vld [vmem:[%s1378_s25] sm:$0xff] (%p1285_p6) }
 0x19f   : > { %803 = vst [vmem:[%s1378_s25 + $0x8] sm:$0xff] %v801_v34 }
 0x1a0   : > { %848 = vst [vmem:[%s816_s15] sm:$0xff] %v847_v35 }
 0x1a6   : > { %v849_v37 = vld [vmem:[%s1378_s25 + $0x8] sm:$0xff] }
 0x1a7   : > { %850 = vst [vmem:[%s816_s15 + $0x18] sm:$0xff] %v849_v37 }
 0x1a8 PF: > { %s15_s22 = sadd.s32 1, %s1218_s22   ;;  %s1506_s18 = smov %s1206_s19 }
 0x1a9   : > { %p12_p13 = scmp.ge.s32.totalorder %s15_s22, 5   ;;  %s1507_s19 = smov %s1290_s28 }
 0x1aa   : > { %s1508_s20 = smov %s1214_s21  ;;  %s1509_s21 = smov %s1511_s23 }
 0x1ab   :  { %14 = sbr.rel (!%p12_p13) target bundleno = 3 (0x3), region = 161 }

// kernel: forward.21
= control target key start
LH: loop header
LB: loop body
LE: loop exit
PB: predicated region body
PF: predicated region fallthrough
CT: control target
= control target key end

     0   :  { %s1067_s12 = smov 0   ;;  %s1069_s13 = smov 0   ;;  %s1396_s0 = inlined_call_operand.vmem [shape: bf16[2,8,768], index: 0, kind: input, shape index: {}]   ;;  %s1397_s1 = inlined_call_operand.vmem [shape: bf16[2,128,384], index: 1, kind: input, shape index: {}]   ;;  %s1398_s2 = inlined_call_operand.vmem [shape: f32[2,1,384], index: 2, kind: input, shape index: {}]   ;;  %s1399_s3 = inlined_call_operand.vmem [shape: bf16[2,8,256], index: 3, kind: output, shape index: {}]  }
   0x1   :  { %s1071_s14 = smov 0   ;;  %s1073_s15 = smov 0  }
   0x2   :  { %s1075_s16 = smov 0  }
   0x3 LB: > { %s32_s17 = sadd.s32 1, %s1033_s15  ;;  %s778_s18 = sadd.s32 4294967295, %s1037_s16   ;;  %s1037_s16 = sphi %s1075_s16, %s13_s16   ;;  %s1033_s15 = sphi %s1073_s15, %s1420_s15   ;;  %s1029_s14 = sphi %s1071_s14, %s1419_s14   ;;  %s1025_s13 = sphi %s1069_s13, %s1418_s13   ;;  %s1021_s12 = sphi %s1067_s12, %s1417_s12  }
   0x4   : > { %p34_p0 = scmp.ge.s32.totalorder %s32_s17, 2  ;;  %p58_p1 = scmp.ne.s32.totalorder %s1025_s13, %s1021_s12 }
   0x5   : > { %p59_p2 = scmp.eq.s32.totalorder %s1037_s16, 0  ;;  %p152_p4 = scmp.eq.s32.totalorder %s778_s18, 1 }
   0x6   : > { %s1422_s17 = smov (%p34_p0, %s32_s17), 0  ;;  %s51_s20 = sadd.s32 1, %s1025_s13 }
   0x7   : > { %p60_p3 = por %p59_p2, %p58_p1  ;;  %s47_s19 = ssub.s32 %s1033_s15, %s1422_s17 }
   0x8   : > { %p49_p5 = scmp.eq.s32.totalorder %s47_s19, 0  ;;  %p1102_p6 = por %p152_p4, %p58_p1 }
   0x9   : > { %p781_p7 = scmp.ge.s32.totalorder %s1037_s16, 2 }
   0xa   : > { %s1107_s22 = scalar_select %p49_p5, %s1025_s13, %s51_s20  }
   0xb   : > { %174 = sbr.rel (%p781_p7) target bundleno = 25 (0x19), region = 16 }
  0x10   : > { %177 = sbr.rel (!%p60_p3) target bundleno = 25 (0x19), region = 20  ;;  %s179_s23 = sand.u32 (%p60_p3), 1, %s1025_s13  }
  0x11   : > { %s894_s24 = smul.u32 (%p60_p3), 12, %s1033_s15 }
  0x12   : > { %s920_s25 = smul.u32 (%p60_p3), 24, %s179_s23 }
  0x13   : > { %s193_s28 = scalar_lea.vmem (%p60_p3), %s1396_s0, %s894_s24 }
  0x14   : > { %v208_v0 = vld [vmem:[%s193_s28] sm:$0xff] (%p60_p3)  ;;  %v210_v1 = vld [vmem:[%s193_s28 + $0x18] sm:$0xff] (%p60_p3)  ;;  %v783_v2 = vld [vmem:[%s193_s28 + $0x8] sm:$0xf] (%p60_p3)  ;;  %s181_s29 = scalar_lea.vmem (%p60_p3), [#allocation3], %s920_s25 }
  0x15   : > { %209 = vst [vmem:[%s181_s29] sm:$0xff] %v208_v0  ;;  %v785_v3 = vld [vmem:[%s193_s28 + $0x20] sm:$0xf] }
  0x16   : > { %211 = vst [vmem:[%s181_s29 + $0xc] sm:$0xff] %v210_v1 }
  0x17   : > { %784 = vst [vmem:[%s181_s29 + $0x8] sm:$0xf] %v783_v2 }
  0x18   : > { %786 = vst [vmem:[%s181_s29 + $0x14] sm:$0xf] %v785_v3 }
  0x19 PF: > { %p787_p8 = scmp.ge.s32.totalorder %s1037_s16, 1  ;;  %p243_p9 = scmp.lt.s32.totalorder %s1037_s16, 3 }
  0x1b   : > { %p244_p10 = pnand %p787_p8, %p243_p9 }
  0x1d   : > { %247 = sbr.rel (%p244_p10) target bundleno = 279 (0x117), region = 54 }
  0x22   : > { %s250_s30 = sand.u32 1, %s1021_s12   ;;  %p287_p11 = scmp.lt.s32.totalorder %s1029_s14, 1  ;;  %v1288_v53 = vmov 0.0  }
  0x23   : > { %s1119_s4 = smul.u32 24, %s250_s30  ;;  %s1121_s5 = sshll.u32 %s250_s30, 3 }
  0x24   : > { %s1124_s6 = scalar_select %p287_p11, %s1029_s14, 1 }
  0x25   : > { %s252_s20 = scalar_lea.vmem [#allocation3], %s1119_s4  ;;  %s1286_s23 = scalar_lea.vmem [#allocation4], %s1121_s5 }
  0x26   : > { %s922_s7 = smul.u32 192, %s1124_s6  ;;  %s1290_s24 = smov 0  }
  0x27   : > { %s923_s11 = smul.u32 3, %s1124_s6 }
  0x28   : > { %s1130_s10 = scalar_lea.vmem %s1397_s1, %s922_s7 }
  0x29   : > { %v1134_v4 = vld [vmem:[%s1130_s10 + $0x4] sm:$0xf]  ;;  %v1137_v5 = vld [vmem:[%s1130_s10] sm:$0xf]  ;;  %v1140_v6 = vld [vmem:[%s1130_s10 + $0x8] sm:$0xf]  ;;  %s295_s19 = scalar_lea.vmem %s1398_s2, %s923_s11 }
  0x2a   : > { %1401 = vst [vmem:[#allocation5_spill] sm:$0xff] %v1134_v4  ;;  %v1143_v7 = vld [vmem:[%s1130_s10 + $0xc] sm:$0xf0]  ;;  %v1146_v8 = vld [vmem:[%s1130_s10 + $0x8] sm:$0xf0] }
  0x2b   : > { %1402 = vst [vmem:[#allocation6_spill] sm:$0xff] %v1137_v5  ;;  %v1149_v9 = vld [vmem:[%s1130_s10 + $0x10] sm:$0xf0]  ;;  %v1152_v10 = vld [vmem:[%s1130_s10 + $0x1c] sm:$0xf] }
  0x2c   : > { %1403 = vst [vmem:[#allocation7_spill] sm:$0xff] %v1140_v6  ;;  %v1155_v11 = vld [vmem:[%s1130_s10 + $0x18] sm:$0xf]  ;;  %v1158_v12 = vld [vmem:[%s1130_s10 + $0x20] sm:$0xf] }
  0x2d   : > { %1404 = vst [vmem:[#allocation8_spill] sm:$0xff] %v1143_v7  ;;  %v1161_v13 = vld [vmem:[%s1130_s10 + $0x24] sm:$0xf0]  ;;  %v1164_v14 = vld [vmem:[%s1130_s10 + $0x20] sm:$0xf0] }
  0x2e   : > { %1405 = vst [vmem:[#allocation9_spill] sm:$0xff] %v1146_v8  ;;  %v1167_v15 = vld [vmem:[%s1130_s10 + $0x28] sm:$0xf0]  ;;  %v1170_v16 = vld [vmem:[%s1130_s10 + $0x34] sm:$0xf] }
  0x2f   : > { %1406 = vst [vmem:[#allocation10_spill] sm:$0xff] %v1149_v9  ;;  %v1173_v17 = vld [vmem:[%s1130_s10 + $0x30] sm:$0xf]  ;;  %v1176_v18 = vld [vmem:[%s1130_s10 + $0x38] sm:$0xf] }
  0x30   : > { %1407 = vst [vmem:[#allocation11_spill] sm:$0xff] %v1152_v10  ;;  %v1179_v19 = vld [vmem:[%s1130_s10 + $0x3c] sm:$0xf0]  ;;  %v1182_v20 = vld [vmem:[%s1130_s10 + $0x38] sm:$0xf0] }
  0x31   : > { %1408 = vst [vmem:[#allocation12_spill] sm:$0xff] %v1155_v11  ;;  %v1185_v21 = vld [vmem:[%s1130_s10 + $0x40] sm:$0xf0]  ;;  %v1188_v22 = vld [vmem:[%s1130_s10 + $0x4c] sm:$0xf] }
  0x32   : > { %v1191_v23 = vld [vmem:[%s1130_s10 + $0x48] sm:$0xf]  ;;  %v1194_v24 = vld [vmem:[%s1130_s10 + $0x50] sm:$0xf]  ;;  %v1197_v25 = vld [vmem:[%s1130_s10 + $0x54] sm:$0xf0] }
  0x33   : > { %v1200_v26 = vld [vmem:[%s1130_s10 + $0x50] sm:$0xf0]  ;;  %v1203_v27 = vld [vmem:[%s1130_s10 + $0x58] sm:$0xf0]  ;;  %v1206_v28 = vld [vmem:[%s1130_s10 + $0x64] sm:$0xf] }
  0x34   : > { %v1209_v29 = vld [vmem:[%s1130_s10 + $0x60] sm:$0xf]  ;;  %v1212_v30 = vld [vmem:[%s1130_s10 + $0x68] sm:$0xf]  ;;  %v1215_v31 = vld [vmem:[%s1130_s10 + $0x6c] sm:$0xf0] }
  0x35   : > { %v1218_v32 = vld [vmem:[%s1130_s10 + $0x68] sm:$0xf0]  ;;  %v1221_v33 = vld [vmem:[%s1130_s10 + $0x70] sm:$0xf0]  ;;  %v1224_v34 = vld [vmem:[%s1130_s10 + $0x7c] sm:$0xf] }
  0x36   : > { %v1227_v35 = vld [vmem:[%s1130_s10 + $0x78] sm:$0xf]  ;;  %v1230_v36 = vld [vmem:[%s1130_s10 + $0x80] sm:$0xf]  ;;  %v1233_v37 = vld [vmem:[%s1130_s10 + $0x84] sm:$0xf0] }
  0x37   : > { %v1236_v38 = vld [vmem:[%s1130_s10 + $0x80] sm:$0xf0]  ;;  %v1239_v39 = vld [vmem:[%s1130_s10 + $0x88] sm:$0xf0]  ;;  %v1242_v40 = vld [vmem:[%s1130_s10 + $0x94] sm:$0xf] }
  0x38   : > { %v1245_v41 = vld [vmem:[%s1130_s10 + $0x90] sm:$0xf]  ;;  %v1248_v42 = vld [vmem:[%s1130_s10 + $0x98] sm:$0xf]  ;;  %v1256_v43 = vld [vmem:[%s1130_s10 + $0x9c] sm:$0xf0] }
  0x39   : > { %v1259_v44 = vld [vmem:[%s1130_s10 + $0x98] sm:$0xf0]  ;;  %v1262_v45 = vld [vmem:[%s1130_s10 + $0xa0] sm:$0xf0]  ;;  %v1265_v46 = vld [vmem:[%s1130_s10 + $0xac] sm:$0xf] }
  0x3a   : > { %v1268_v47 = vld [vmem:[%s1130_s10 + $0xa8] sm:$0xf]  ;;  %v1271_v48 = vld [vmem:[%s1130_s10 + $0xb0] sm:$0xf]  ;;  %v1274_v49 = vld [vmem:[%s1130_s10 + $0xb4] sm:$0xf0] }
  0x3b   : > { %v1277_v50 = vld [vmem:[%s1130_s10 + $0xb0] sm:$0xf0]  ;;  %v1280_v51 = vld [vmem:[%s1130_s10 + $0xb8] sm:$0xf0]  ;;  %v1282_v52 = vld [vmem:[%s295_s19] sm:$0x7] }
  0x3c LB: >> { %v878_v54 = vor.u32 %v1277_v50, %v1268_v47  ;;  %v882_v55 = vor.u32 %v1265_v46, %v1274_v49  ;;  %v866_v56 = vor.u32 %v1259_v44, %v1245_v41  ;;  %v870_v57 = vor.u32 %v1242_v40, %v1256_v43  ;;  %v1409_v11 = vld [vmem:[#allocation12_spill] sm:$0xff]  ;;  %v1410_v10 = vld [vmem:[#allocation11_spill] sm:$0xff]  ;;  %v1411_v5 = vld [vmem:[#allocation6_spill] sm:$0xff]  ;;  %p352_p12 = scmp.eq.s32.totalorder %s1029_s14, 0  ;;  %s353_s25 = ssub.s32 1, %s1045_s24  ;;  %s1045_s24 = sphi %s1290_s24, %s350_s24   ;;  %v1041_v53 = vphi %v1288_v53, %v590_v53  }
  0x3d   : >> { %v886_v58 = vor.u32 %v1280_v51, %v1271_v48  ;;  %v874_v59 = vor.u32 %v1262_v45, %v1248_v42  ;;  %v854_v60 = vor.u32 %v1236_v38, %v1227_v35  ;;  %v858_v61 = vor.u32 %v1224_v34, %v1233_v37  ;;  %v1412_v8 = vld [vmem:[#allocation9_spill] sm:$0xff]  ;;  %v1413_v7 = vld [vmem:[#allocation8_spill] sm:$0xff]  ;;  %v1415_v6 = vld [vmem:[#allocation7_spill] sm:$0xff] }
  0x3e   : >> { %500 = vmatpush.bf16.msra.mxu0 %v878_v54  ;;  %513 = vmatpush.bf16.msra.mxu1 %v882_v55  ;;  %v862_v62 = vor.u32 %v1239_v39, %v1230_v36  ;;  %v842_v63 = vor.u32 %v1218_v32, %v1209_v29  ;;  %v846_v0 = vor.u32 %v1206_v28, %v1215_v31  ;;  %v1414_v4 = vld [vmem:[#allocation5_spill] sm:$0xff]  ;;  %v1416_v9 = vld [vmem:[#allocation10_spill] sm:$0xff]  ;;  %s1351_s26 = scalar_select %p352_p12, %s1045_s24, %s353_s25 }
  0x3f   : >> { %526 = vmatpush.bf16.msra.mxu2 %v886_v58  ;;  %v850_v1 = vor.u32 %v1221_v33, %v1212_v30  ;;  %v830_v2 = vor.u32 %v1200_v26, %v1191_v23  ;;  %v834_v3 = vor.u32 %v1188_v22, %v1197_v25  ;;  %v838_v54 = vor.u32 %v1203_v27, %v1194_v24  ;;  %s350_s24 = sadd.s32 1, %s1045_s24  }
  0x40   : >> { %v818_v55 = vor.u32 %v1182_v20, %v1173_v17  ;;  %v806_v58 = vor.u32 %v1164_v14, %v1409_v11  ;;  %s919_s27 = smul.u32 12, %s1351_s26  ;;  %p586_p13 = scmp.lt.s32.totalorder %s1351_s26, 2 }
  0x41   : >> { %s889_s30 = sshll.u32 %s1351_s26, 2  ;;  %p347_p0 = scmp.ge.s32.totalorder %s350_s24, 2  }
  0x42   : >> { %501 = vmatpush.bf16.msra.mxu0 %v866_v56  ;;  %514 = vmatpush.bf16.msra.mxu1 %v870_v57  ;;  %v822_v56 = vor.u32 %v1170_v16, %v1179_v19  ;;  %v826_v57 = vor.u32 %v1185_v21, %v1176_v18  ;;  %s1356_s28 = scalar_lea.vmem %s252_s20, %s919_s27 [#allocation3]  ;;  %s593_s5 = scalar_lea.vmem %s1286_s23, %s889_s30 [#allocation4] }
  0x43   : >> { %527 = vmatpush.bf16.msra.mxu2 %v874_v59  ;;  %v810_v59 = vor.u32 %v1410_v10, %v1161_v13  ;;  %s587_s29 = scalar_select %p586_p13, 1, 0 }
  0x46   : >> { %502 = vmatpush.bf16.msra.mxu0 %v854_v60  ;;  %515 = vmatpush.bf16.msra.mxu1 %v858_v61  ;;  %v814_v60 = vor.u32 %v1167_v15, %v1158_v12  ;;  %v794_v61 = vor.u32 %v1412_v8, %v1411_v5 }
  0x47   : >> { %528 = vmatpush.bf16.msra.mxu2 %v862_v62  ;;  %v798_v62 = vor.u32 %v1414_v4, %v1413_v7 }
  0x4a   : >> { %503 = vmatpush.bf16.msra.mxu0 %v842_v63  ;;  %516 = vmatpush.bf16.msra.mxu1 %v846_v0  ;;  %v802_v63 = vor.u32 %v1416_v9, %v1415_v6  ;;  %v364_v0 = vpack.c.bf16 %v1041_v53, %v1041_v53 }
  0x4b   : >> { %529 = vmatpush.bf16.msra.mxu2 %v850_v1  ;;  %v359_v1 = vld [vmem:[%s1356_s28] sm:$0xff] }
  0x4e   : >> { %504 = vmatpush.bf16.msra.mxu0 %v830_v2  ;;  %517 = vmatpush.bf16.msra.mxu1 %v834_v3  ;;  %v366_v2 = vperm.slane %v1282_v52, 0  ;;  %v367_v3 = vperm.slane %v1282_v52, 1 }
  0x4f   : >> { %530 = vmatpush.bf16.msra.mxu2 %v838_v54  ;;  %v361_v54 = vunpack.c.l.bf16 %v359_v1 }
  0x52   : >> { %505 = vmatpush.bf16.msra.mxu0 %v818_v55  ;;  %518 = vmatpush.bf16.msra.mxu1 %v822_v56  ;;  %v362_v55 = vunpack.c.h.bf16 %v359_v1 }
  0x53   : >> { %531 = vmatpush.bf16.msra.mxu2 %v826_v57 }
  0x56   : >> { %506 = vmatpush.bf16.msra.mxu0 %v806_v58  ;;  %519 = vmatpush.bf16.msra.mxu1 %v810_v59 }
  0x57   : >> { %532 = vmatpush.bf16.msra.mxu2 %v814_v60 }
  0x5a   : >> { %507 = vmatpush.bf16.msra.mxu0 %v794_v61  ;;  %520 = vmatpush.bf16.msra.mxu1 %v798_v62 }
  0x5b   : >> { %533 = vmatpush.bf16.msra.mxu2 %v802_v63 }
  0x5d   : >> { %508 = vmatmul.bf16.vlgmr.msra.gmra.mxu0 %v364_v0  ;;  %521 = vmatmul.bf16.vlgmr.msra.gmra.mxu1 %v364_v0 }
  0x5e   : >> { %534 = vmatmul.bf16.vlgmr.msra.gmra.mxu2 %v364_v0 }
  0xda   : >> { %v509_v56 = vpop.f32.mrf.mxu0  ;;  %v522_v57 = vpop.f32.mrf.mxu1 }
  0xdb   : >> { %v510_v58 = vadd.f32 %v509_v56, %v366_v2  ;;  %v523_v59 = vadd.f32 %v522_v57, %v367_v3 }
  0xdd   : >> { %v539_v60 = vadd.f32 %v510_v58, %v361_v54  ;;  %v559_v61 = vadd.f32 %v523_v59, %v362_v55  ;;  %v368_v55 = vperm.slane %v1282_v52, 2 }
  0xdf   : >> { %v887_v62 = vmul.f32 -1.442695, %v539_v60  ;;  %v888_v63 = vmul.f32 -1.442695, %v559_v61 }
  0xe1   : >> { %981 = vpow2.f32 %v887_v62  ;;  %v535_v5 = vpop.f32.mrf.mxu2 }
  0xe2   : >> { %983 = vpow2.f32 %v888_v63  ;;  %v511_v0 = vpop.f32.mrf.mxu0  ;;  %v524_v4 = vpop.f32.mrf.mxu1 }
  0xe7   : >> { %v982_v6 = vpop.eup %981 }
  0xe8   : >> { %v984_v7 = vpop.eup %983  ;;  %v543_v8 = vadd.f32 1.0, %v982_v6  ;;  %v360_v6 = vld [vmem:[%s1356_s28 + $0x8] sm:$0xf] }
  0xe9   : >> { %v563_v9 = vadd.f32 1.0, %v984_v7  ;;  %v537_v1 = vpop.f32.mrf.mxu2  ;;  %v536_v7 = vadd.f32 %v535_v5, %v368_v55  ;;  %v363_v63 = vunpack.c.l.bf16 %v360_v6 }
  0xea   : >> { %985 = vrcp.f32 %v543_v8  ;;  %v555_v58 = vand.u32 2147483648, %v543_v8  ;;  %v553_v4 = vand.u32 2147483647, %v543_v8  ;;  %vm549_vm1 = vweird.f32 %v543_v8 }
  0xeb   : >> { %987 = vrcp.f32 %v563_v9  ;;  %vm569_vm4 = vweird.f32 %v563_v9 }
  0xec   : >> { %v556_v62 = vor.u32 1.1754944e-38, %v555_v58  ;;  %vm554_vm3 = vcmp.eq.f32.partialorder %v553_v4, 8.507059e+37 }
  0xf0   : >> { %v986_v10 = vpop.eup %985 }
  0xf1   : >> { %v988_v2 = vpop.eup %987  ;;  %v545_v3 = vmul.f32 %v986_v10, %v543_v8  ;;  %vm550_vm0 = vweird.f32 %v986_v10 }
  0xf2   : >> { %v565_v54 = vmul.f32 %v988_v2, %v563_v9  ;;  %vm551_vm2 = vmor %vm549_vm1, %vm550_vm0  ;;  %vm570_vm5 = vweird.f32 %v988_v2 }
  0xf3   : >> { %v546_v56 = vsub.f32 1.0, %v545_v3  ;;  %vm571_vm6 = vmor %vm569_vm4, %vm570_vm5 }
  0xf4   : >> { %v566_v57 = vsub.f32 1.0, %v565_v54  ;;  %v575_v54 = vand.u32 2147483648, %v563_v9 }
  0xf5   : >> { %v547_v59 = vmul.f32 %v986_v10, %v546_v56  ;;  %v573_v56 = vand.u32 2147483647, %v563_v9 }
  0xf6   : >> { %v567_v60 = vmul.f32 %v988_v2, %v566_v57  ;;  %v576_v55 = vor.u32 1.1754944e-38, %v575_v54 }
  0xf7   : >> { %v548_v61 = vadd.f32 %v986_v10, %v547_v59  ;;  %vm574_vm7 = vcmp.eq.f32.partialorder %v573_v56, 8.507059e+37 }
  0xf8   : >> { %v568_v3 = vadd.f32 %v988_v2, %v567_v60 }
  0xf9   : >> { %v552_v0 = vsel %vm551_vm2, %v986_v10, %v548_v61  ;;  %v588_v10 = vstv %s587_s29 }
  0xfa   : >> { %v557_v1 = vsel %vm554_vm3, %v556_v62, %v552_v0  ;;  %v572_v5 = vsel %vm571_vm6, %v988_v2, %v568_v3  ;;  %vm589_vm8 = vcmp.eq.s32.totalorder %v588_v10, 1 }
  0xfb   : >> { %v579_v11 = vmul.f32 %v557_v1, %v536_v7  ;;  %v577_v8 = vsel %vm574_vm7, %v576_v55, %v572_v5 }
  0xfc   : >> { %v582_v58 = vsub.f32 1.0, %v577_v8  ;;  %v584_v60 = vmul.f32 %v1041_v53, %v577_v8 }
  0xfd   : >> { %v580_v57 = vadd.f32 %v579_v11, %v363_v63 }
  0xff   : >> { %989 = vtanh.f32 %v580_v57 }
 0x105   : >> { %v990_v59 = vpop.eup %989 }
 0x106   : >> { %v583_v4 = vmul.f32 %v990_v59, %v582_v58 }
 0x108   : >> { %v585_v6 = vadd.f32 %v584_v60, %v583_v4 }
 0x109   : > { %349 = sbr.rel (!%p347_p0) target bundleno = 60 (0x3c), region = 159 }
 0x10a   : >> { %v590_v53 = vsel %vm589_vm8, %v585_v6, %v1041_v53  }
 0x10b   : >> { %v591_v9 = vpack.c.bf16 %v590_v53, %v590_v53 }
 0x10d   : >> { %594 = vst [vmem:[%s593_s5] sm:$0xf] %v591_v9 }
 0x10e   : > { %602 = sbr.rel (!%p1102_p6) target bundleno = 279 (0x117), region = 73  ;;  %s891_s6 = sshll.u32 (%p1102_p6), %s1029_s14, 2 }
 0x10f   : > { %s613_s9 = scalar_lea.vmem (%p1102_p6), %s1399_s3, %s891_s6 }
 0x114   : > { %v630_v11 = vld [vmem:[%s1286_s23] sm:$0xf]  ;;  %v632_v2 = vld [vmem:[%s1286_s23 + $0x4] sm:$0xf] }
 0x115   : > { %631 = vst [vmem:[%s613_s9] sm:$0xf] %v630_v11 }
 0x116   : > { %633 = vst [vmem:[%s613_s9 + $0x8] sm:$0xf] %v632_v2 }
 0x117 PF: > { %s13_s16 = sadd.s32 1, %s1037_s16   ;;  %s1417_s12 = smov %s1025_s13 }
 0x118   : > { %p10_p1 = scmp.ge.s32.totalorder %s13_s16, 4   ;;  %s1418_s13 = smov %s1107_s22 }
 0x119   : > { %s1419_s14 = smov %s1033_s15  ;;  %s1420_s15 = smov %s1422_s17 }
 0x11a   :  { %12 = sbr.rel (!%p10_p1) target bundleno = 3 (0x3), region = 170 }

// kernel: forward.23
= control target key start
LH: loop header
LB: loop body
LE: loop exit
PB: predicated region body
PF: predicated region fallthrough
CT: control target
= control target key end

     0   :  { %s255_s0 = inlined_call_operand.vmem [shape: bf16[16,128], index: 0, kind: input, shape index: {}]   ;;  %s256_s1 = inlined_call_operand.vmem [shape: bf16[128,10], index: 1, kind: input, shape index: {}]   ;;  %s257_s2 = inlined_call_operand.vmem [shape: f32[1,10], index: 2, kind: input, shape index: {}]   ;;  %s258_s3 = inlined_call_operand.hbm [shape: f32[16,10], index: 3, kind: output, shape index: {}]  }
   0x1   :  { %v164_v0 = vld [vmem:[%s256_s1 + $0x38] sm:$0xff]  ;;  %v163_v1 = vld [vmem:[%s256_s1 + $0x30] sm:$0xff] }
   0x2   :  { %90 = vmatpush.bf16.msra.mxu0 %v164_v0 }
   0x3   :  { %8 = vsyncpa [#allocation3], 0  ;;  %v162_v2 = vld [vmem:[%s256_s1 + $0x28] sm:$0xff]  ;;  %v161_v3 = vld [vmem:[%s256_s1 + $0x20] sm:$0xff]  ;;  %vm104_vm0 = vcmask 80896   ;;  %s113_s8 = sshll.u32 %s258_s3, 4  ;;  %s114_s8 = int_to_ptr.hbm [resolvable:$true] %s113_s8 }
   0x4   :  { %v160_v4 = vld [vmem:[%s256_s1 + $0x18] sm:$0xff]  ;;  %v159_v5 = vld [vmem:[%s256_s1 + $0x10] sm:$0xff]  ;;  %v166_v6 = vld [vmem:[%s255_s0] sm:$0xff]   ;;  %s199_s0 = smov [#allocation2]   ;;  %s201_s9 = smov 8  }
   0x5   :  { %v167_v7 = vunpack.c.l.bf16 %v166_v6  ;;  %v168_v8 = vunpack.c.h.bf16 %v166_v6  ;;  %v158_v9 = vld [vmem:[%s256_s1 + $0x8] sm:$0xff]  ;;  %v157_v12 = vld [vmem:[%s256_s1] sm:$0xff]  ;;  %s111_s5 = sshll.u32 %s199_s0, 4  ;;  %s200_s1 = smov 128   ;;  %s112_s5 = int_to_ptr.vmem [resolvable:$true] %s111_s5 }
   0x6   :  { %91 = vmatpush.bf16.msra.mxu0 %v163_v1  ;;  %v172_v14 = vld [vmem:[%s257_s2] ss:$0 sm:$0xff] }
   0x7   :  { %v19_v10 = vmax.f32 %v167_v7, 0.0  ;;  %v20_v11 = vmax.f32 %v168_v8, 0.0 }
   0x9   :  { %v21_v13 = vpack.c.bf16 %v20_v11, %v19_v10 }
   0xa   :  { %92 = vmatpush.bf16.msra.mxu0 %v162_v2 }
   0xe   :  { %93 = vmatpush.bf16.msra.mxu0 %v161_v3 }
  0x12   :  { %94 = vmatpush.bf16.msra.mxu0 %v160_v4 }
  0x16   :  { %95 = vmatpush.bf16.msra.mxu0 %v159_v5 }
  0x1a   :  { %96 = vmatpush.bf16.msra.mxu0 %v158_v9 }
  0x1e   :  { %97 = vmatpush.bf16.msra.mxu0 %v157_v12 }
  0x21   :  { %98 = vmatmul.bf16.vlgmr.msra.gmra.mxu0 %v21_v13 }
  0x9e   :  { %v99_v15 = vpop.f32.mrf.mxu0 }
  0x9f   :  { %v100_v16 = vadd.f32 %v172_v14, %v99_v15 }
  0xa1   :  { %105 = vst.msk [vmem:[#allocation2] sm:$0xff] %vm104_vm0, %v100_v16 }
  0xa6   :  { %v101_v17 = vpop.f32.mrf.mxu0 }
  0xa7   :  { %v102_v18 = vadd.f32 %v172_v14, %v101_v17 }
  0xa9   :  { %106 = vst.msk [vmem:[#allocation2 + $0x8] sm:$0xff] %vm104_vm0, %v102_v18 }
  0xaa   :  { %119 = dma.vmem_to_hbm [thread:$0]  %s112_s5, 256, %s114_s8, [#allocation3], %s200_s1, %s200_s1, %s201_s9  }
  0xab   :  { %197 = dma.done.wait [#allocation3], 256  }
  0xac   :  { %198 = vsyncadd [#allocation3], 4294967040 }
  0xad   :  { %124 = vsyncpa [#allocation3], 1 }

</bundles_post_ra>
